<compile_context>
chip_gen: v7x
topology: tpu7x:2x2x1
jax: 0.10.0
libtpu: 0.0.40
codegen_flags: <defaults>
</compile_context>

<pallas_src>
import functools

import jax
import jax.numpy as jnp
import numpy as np
from jax.experimental import pallas as pl
from jax.experimental.pallas import tpu as pltpu

EPS = 1e-5


# ----------------------------------------------------------------------------
# Generation-aware VMEM limit (~85% of physical: ~109 MiB v5e/v6e, ~54 MiB v7x).
def _vmem_limit_bytes():
    try:
        return int(pltpu.get_tpu_info().vmem_capacity_bytes * 0.85)
    except Exception:
        return 48 * 1024 * 1024  # safe on every generation


def _compiler_params():
    return pltpu.CompilerParams(
        dimension_semantics=("parallel",),
        vmem_limit_bytes=_vmem_limit_bytes(),
    )


def _full_spec(shape):
    nd = len(shape)
    return pl.BlockSpec(shape, lambda *_, nd=nd: (0,) * nd)


# ----------------------------------------------------------------------------
# Pass 1: conv1 (1x1) as a (tm, Cin) x (Cin, WPAD) bf16 MXU matmul + partial BN1 stats.
def _conv1_kernel(x_ref, w1_ref, a1_ref, st1_ref):
    a = jnp.dot(x_ref[...].astype(jnp.bfloat16), w1_ref[...],
                preferred_element_type=jnp.float32)
    ab = a.astype(jnp.bfloat16)        # stored bf16 (it only ever feeds a bf16 matmul)
    af = ab.astype(jnp.float32)        # stats of the values actually stored
    a1_ref[...] = ab
    st1_ref[:, 0:1, :] = jnp.sum(af, axis=0, keepdims=True).reshape(1, 1, -1)
    st1_ref[:, 1:2, :] = jnp.sum(af * af, axis=0, keepdims=True).reshape(1, 1, -1)


# ----------------------------------------------------------------------------
# Pass 2: bn1 (precomputed scale/shift) + relu + conv2 (3x3, pad=1, stride=1) as
# 9 accumulating bf16 tap-dots over a halo-padded bf16 scratch + partial BN2 stats.
def _conv2_kernel(a1_ref, s1_ref, t1_ref, w2_ref, a2_ref, st2_ref, hpad_ref):
    _, H, W, C = a1_ref.shape
    HW = H * W
    s1 = s1_ref[...].reshape(1, 1, 1, C)
    t1 = t1_ref[...].reshape(1, 1, 1, C)
    h1b = jnp.maximum(a1_ref[...].astype(jnp.float32) * s1 + t1, 0.0).astype(jnp.bfloat16)

    # Halo: one full unmasked zero store + one interior store (no per-edge masked stores).
    hpad_ref[...] = jnp.zeros(hpad_ref.shape, jnp.bfloat16)
    hpad_ref[:, 1:H + 1, 1:W + 1, :] = h1b

    # conv2 as 9 accumulating dots -- no im2col scratch; window loads overlap matmuls.
    acc = jnp.zeros((HW, C), jnp.float32)
    for t in range(9):
        ky, kx = t // 3, t % 3
        win = hpad_ref[:, ky:ky + H, kx:kx + W, :].reshape(HW, C)
        acc = acc + jnp.dot(win, w2_ref[t], preferred_element_type=jnp.float32)

    ab = acc.astype(jnp.bfloat16)
    af = ab.astype(jnp.float32)
    a2_ref[...] = ab.reshape(1, H, W, C)
    st2_ref[:, 0:1, :] = jnp.sum(af, axis=0, keepdims=True).reshape(1, 1, -1)
    st2_ref[:, 1:2, :] = jnp.sum(af * af, axis=0, keepdims=True).reshape(1, 1, -1)


# ----------------------------------------------------------------------------
# Pass 3: bn2 + relu + conv3 (1x1) + partial BN3 stats.
def _conv3_kernel(a2_ref, s2_ref, t2_ref, w3_ref, a3_ref, st3_ref):
    h2 = jnp.maximum(a2_ref[...].astype(jnp.float32) * s2_ref[...] + t2_ref[...], 0.0)
    a = jnp.dot(h2.astype(jnp.bfloat16), w3_ref[...],
                preferred_element_type=jnp.float32)
    ab = a.astype(jnp.bfloat16)
    af = ab.astype(jnp.float32)
    a3_ref[...] = ab
    st3_ref[:, 0:1, :] = jnp.sum(af, axis=0, keepdims=True).reshape(1, 1, -1)
    st3_ref[:, 1:2, :] = jnp.sum(af * af, axis=0, keepdims=True).reshape(1, 1, -1)


# ----------------------------------------------------------------------------
# Pass 4: bn3 + identity add (downsample=None) + relu.
def _bn3_residual_kernel(a3_ref, x_ref, s3_ref, t3_ref, out_ref):
    y = a3_ref[...].astype(jnp.float32) * s3_ref[...] + t3_ref[...]
    out_ref[...] = jnp.maximum(y + x_ref[...], 0.0)


# ----------------------------------------------------------------------------
def _bn_scale_shift(partial_stats, gamma, beta, m):
    """Reduce per-block (sum, sumsq) to exact training-mode BN scale/shift."""
    s = jnp.sum(partial_stats, axis=0)                 # (2, C)
    mean = s[0] / m
    var = jnp.maximum(s[1] / m - mean * mean, 0.0)      # biased batch variance
    scale = gamma * jax.lax.rsqrt(var + EPS)            # (1, C)
    shift = beta - mean * scale                         # (1, C)
    return scale.astype(jnp.float32), shift.astype(jnp.float32)


@functools.partial(jax.jit, static_argnames=("tm",))
def bottleneck_forward(x_nchw, params, *, tm=512):
    """x_nchw: (N, Cin, H, W) float32; returns (N, Cout, H, W) float32."""
    w1, w2, w3, g1, b1, g2, b2, g3, b3 = params
    x = jnp.transpose(x_nchw, (0, 2, 3, 1)).astype(jnp.float32)    # -> NHWC
    N, H, W, Cin = x.shape
    width = w1.shape[1]
    Cout = w3.shape[1]
    assert Cin == Cout, "identity path requires inplanes == planes * expansion"
    M = N * H * W

    # Lane-dense bottleneck width: padded channels stay exactly zero end to end
    # because gamma/beta/weights are zero-padded.
    WPAD = ((width + 127) // 128) * 128
    padc = WPAD - width
    w1p = jnp.pad(w1, ((0, 0), (0, padc))).astype(jnp.bfloat16)               # (Cin, WPAD)
    w2p = jnp.pad(w2, ((0, 0), (0, padc), (0, padc))).astype(jnp.bfloat16)     # (9, WPAD, WPAD)
    w3p = jnp.pad(w3, ((0, padc), (0, 0))).astype(jnp.bfloat16)                # (WPAD, Cout)
    g1p, b1p = jnp.pad(g1, ((0, 0), (0, padc))), jnp.pad(b1, ((0, 0), (0, padc)))
    g2p, b2p = jnp.pad(g2, ((0, 0), (0, padc))), jnp.pad(b2, ((0, 0), (0, padc)))

    # Row-block size over the flattened N*H*W axis (target >=512 on v6e/v7x).
    tm = (min(tm, M) // 8) * 8
    while tm > 8 and M % tm != 0:
        tm -= 8
    assert tm >= 8 and M % tm == 0, "N*H*W must be a multiple of 8"
    nblk = M // tm
    cp = _compiler_params()
    x2d = x.reshape(M, Cin)

    # ---- pass 1: conv1 + partial BN1 stats -----------------------------------
    a1, st1 = pl.pallas_call(
        _conv1_kernel,
        grid=(nblk,),
        in_specs=[pl.BlockSpec((tm, Cin), lambda i: (i, 0)),
                  _full_spec((Cin, WPAD))],
        out_specs=[pl.BlockSpec((tm, WPAD), lambda i: (i, 0)),
                   pl.BlockSpec((1, 2, WPAD), lambda i: (i, 0, 0))],
        out_shape=[jax.ShapeDtypeStruct((M, WPAD), jnp.bfloat16),
                   jax.ShapeDtypeStruct((nblk, 2, WPAD), jnp.float32)],
        compiler_params=cp,
    )(x2d, w1p)
    s1, t1 = _bn_scale_shift(st1, g1p, b1p, M)

    # ---- pass 2: bn1+relu + conv2 (3x3) + partial BN2 stats, per image -------
    a2, st2 = pl.pallas_call(
        _conv2_kernel,
        grid=(N,),
        in_specs=[pl.BlockSpec((1, H, W, WPAD), lambda n: (n, 0, 0, 0)),
                  _full_spec((1, WPAD)),
                  _full_spec((1, WPAD)),
                  _full_spec((9, WPAD, WPAD))],
        out_specs=[pl.BlockSpec((1, H, W, WPAD), lambda n: (n, 0, 0, 0)),
                   pl.BlockSpec((1, 2, WPAD), lambda n: (n, 0, 0))],
        out_shape=[jax.ShapeDtypeStruct((N, H, W, WPAD), jnp.bfloat16),
                   jax.ShapeDtypeStruct((N, 2, WPAD), jnp.float32)],
        scratch_shapes=[pltpu.VMEM((1, H + 2, W + 2, WPAD), jnp.bfloat16)],
        compiler_params=cp,
    )(a1.reshape(N, H, W, WPAD), s1, t1, w2p)
    s2, t2 = _bn_scale_shift(st2, g2p, b2p, M)

    # ---- pass 3: bn2+relu + conv3 + partial BN3 stats -------------------------
    a3, st3 = pl.pallas_call(
        _conv3_kernel,
        grid=(nblk,),
        in_specs=[pl.BlockSpec((tm, WPAD), lambda i: (i, 0)),
                  _full_spec((1, WPAD)),
                  _full_spec((1, WPAD)),
                  _full_spec((WPAD, Cout))],
        out_specs=[pl.BlockSpec((tm, Cout), lambda i: (i, 0)),
                   pl.BlockSpec((1, 2, Cout), lambda i: (i, 0, 0))],
        out_shape=[jax.ShapeDtypeStruct((M, Cout), jnp.bfloat16),
                   jax.ShapeDtypeStruct((nblk, 2, Cout), jnp.float32)],
        compiler_params=cp,
    )(a2.reshape(M, WPAD), s2, t2, w3p)
    s3, t3 = _bn_scale_shift(st3, g3, b3, M)

    # ---- pass 4: bn3 + identity + relu ----------------------------------------
    out2d = pl.pallas_call(
        _bn3_residual_kernel,
        grid=(nblk,),
        in_specs=[pl.BlockSpec((tm, Cout), lambda i: (i, 0)),
                  pl.BlockSpec((tm, Cin), lambda i: (i, 0)),
                  _full_spec((1, Cout)),
                  _full_spec((1, Cout))],
        out_specs=pl.BlockSpec((tm, Cout), lambda i: (i, 0)),
        out_shape=jax.ShapeDtypeStruct((M, Cout), jnp.float32),
        compiler_params=cp,
    )(a3, x2d, s3, t3)

    return jnp.transpose(out2d.reshape(N, H, W, Cout), (0, 3, 1, 2))   # -> NCHW


# ----------------------------------------------------------------------------
def reference_forward(x_nchw, params):
    """Plain-JAX reference mirroring the kernel's precision choices (bf16 MXU
    operands + bf16 storage of intermediate activations, f32 accumulation and
    f32 training-mode BatchNorm statistics)."""
    w1, w2, w3, g1, b1, g2, b2, g3, b3 = params
    x = jnp.transpose(x_nchw, (0, 2, 3, 1)).astype(jnp.float32)
    N, H, W, _ = x.shape

    def mm(a, w):
        return jnp.einsum('nhwc,cd->nhwd', a.astype(jnp.bfloat16),
                          w.astype(jnp.bfloat16),
                          preferred_element_type=jnp.float32)

    def bn(z, g, b):
        mean = jnp.mean(z, axis=(0, 1, 2), keepdims=True)
        var = jnp.maximum(jnp.mean(z * z, axis=(0, 1, 2), keepdims=True) - mean * mean, 0.0)
        return (z - mean) * jax.lax.rsqrt(var + EPS) * g.reshape(1, 1, 1, -1) \
            + b.reshape(1, 1, 1, -1)

    def q(z):  # mirror bf16 storage of intermediates
        return z.astype(jnp.bfloat16).astype(jnp.float32)

    a1 = q(mm(x, w1))
    h = jax.nn.relu(bn(a1, g1, b1))
    hp = jnp.pad(h, ((0, 0), (1, 1), (1, 1), (0, 0)))
    acc = 0.0
    for ky in range(3):
        for kx in range(3):
            acc = acc + mm(hp[:, ky:ky + H, kx:kx + W, :], w2[ky * 3 + kx])
    a2 = q(acc)
    h = jax.nn.relu(bn(a2, g2, b2))
    a3 = q(mm(h, w3))
    out = jax.nn.relu(bn(a3, g3, b3) + x)
    return jnp.transpose(out, (0, 3, 1, 2))


def make_params(key, inplanes, planes, base_width=64, groups=1):
    width = int(planes * (base_width / 64.0)) * groups
    cout = planes * 4  # expansion
    ks = jax.random.split(key, 9)
    # conv weights stored as (Cin, Cout) per tap (PyTorch weight is (Cout, Cin, kh, kw)).
    w1 = 0.05 * jax.random.normal(ks[0], (inplanes, width), jnp.float32)
    w2 = 0.05 * jax.random.normal(ks[1], (9, width, width), jnp.float32)
    w3 = 0.05 * jax.random.normal(ks[2], (width, cout), jnp.float32)
    g1 = 0.5 + jax.random.uniform(ks[3], (1, width), jnp.float32)
    b1 = 0.1 * jax.random.normal(ks[4], (1, width), jnp.float32)
    g2 = 0.5 + jax.random.uniform(ks[5], (1, width), jnp.float32)
    b2 = 0.1 * jax.random.normal(ks[6], (1, width), jnp.float32)
    g3 = 0.5 + jax.random.uniform(ks[7], (1, cout), jnp.float32)
    b3 = 0.1 * jax.random.normal(ks[8], (1, cout), jnp.float32)
    return (w1, w2, w3, g1, b1, g2, b2, g3, b3)


if __name__ == "__main__":
    # Module defaults: stride=1, downsample=None -> inplanes == planes*4.
    N, inplanes, H, W = 2, 128, 16, 16
    planes = 32  # width=32 (lane-padded to 128 in the wrapper), Cout=128 == inplanes

    key = jax.random.PRNGKey(0)
    kx, kp = jax.random.split(key)
    x = jax.random.normal(kx, (N, inplanes, H, W), jnp.float32)
    params = make_params(kp, inplanes, planes)

    # tm=256 -> 2 row-blocks at this demo size (production: >=512 on v6e/v7x).
    out = jax.block_until_ready(bottleneck_forward(x, params, tm=256))
    ref = jax.block_until_ready(reference_forward(x, params))
    np.testing.assert_allclose(np.asarray(out), np.asarray(ref), rtol=2e-2, atol=2e-2)

    print("KERNEL_OK")
</pallas_src>

<mosaic_0001>
module attributes {stable_mosaic.version = 11 : i64} {
  func.func @_conv1_kernel(%arg0: i32, %arg1: memref<256x128xf32, #tpu.memory_space<vmem>>, %arg2: memref<128x128xbf16, #tpu.memory_space<vmem>>, %arg3: memref<256x128xbf16, #tpu.memory_space<vmem>>, %arg4: memref<1x2x128xf32, #tpu.memory_space<vmem>>) attributes {dimension_semantics = [#tpu.dimension_semantics<parallel>], iteration_bounds = array<i64: 2>, scalar_prefetch = 0 : i64, scratch_operands = 0 : i64, tpu.core_type = #tpu.core_type<tc>, window_params = [{transform_indices = @transform_0, window_bounds = array<i64: 256, 128>}, {pipeline_mode = #tpu.pipeline_mode<synchronous>, transform_indices = @transform_1, window_bounds = array<i64: 128, 128>}, {transform_indices = @transform_2, window_bounds = array<i64: 256, 128>}, {transform_indices = @transform_3, window_bounds = array<i64: 1, 2, 128>}]} {
    %c0 = arith.constant 0 : index
    %c0_0 = arith.constant 0 : index
    %0 = vector.load %arg1[%c0, %c0_0] : memref<256x128xf32, #tpu.memory_space<vmem>>, vector<256x128xf32>
    %1 = arith.truncf %0 : vector<256x128xf32> to vector<256x128xbf16>
    %c0_1 = arith.constant 0 : index
    %c0_2 = arith.constant 0 : index
    %2 = vector.load %arg2[%c0_1, %c0_2] : memref<128x128xbf16, #tpu.memory_space<vmem>>, vector<128x128xbf16>
    %cst = arith.constant dense<0.000000e+00> : vector<256x128xf32>
    %3 = tpu.matmul %1, %2, %cst {dimension_numbers = #tpu.dot_dimension_numbers<[1], [0], [0], [1], [0, 0, 1, 1], [], []>} : vector<256x128xbf16>, vector<128x128xbf16>, vector<256x128xf32> -> vector<256x128xf32>
    %4 = arith.truncf %3 : vector<256x128xf32> to vector<256x128xbf16>
    %5 = arith.extf %4 : vector<256x128xbf16> to vector<256x128xf32>
    %c0_3 = arith.constant 0 : index
    %c0_4 = arith.constant 0 : index
    %6 = vector.load %arg3[%c0_3, %c0_4] : memref<256x128xbf16, #tpu.memory_space<vmem>>, vector<256x128xbf16>
    tpu.vector_store %arg3[%c0_3, %c0_4], %4 {strides = array<i32>} : memref<256x128xbf16, #tpu.memory_space<vmem>>, vector<256x128xbf16>,
    %cst_5 = arith.constant dense<0.000000e+00> : vector<128xf32>
    %7 = vector.multi_reduction <add>, %5, %cst_5 [0] : vector<256x128xf32> to vector<128xf32>
    %8 = vector.shape_cast %7 : vector<128xf32> to vector<1x128xf32>
    %9 = vector.shape_cast %8 : vector<1x128xf32> to vector<1x1x128xf32>
    %c0_6 = arith.constant 0 : index
    %c0_7 = arith.constant 0 : index
    %c0_8 = arith.constant 0 : index
    %10 = vector.load %arg4[%c0_6, %c0_7, %c0_8] : memref<1x2x128xf32, #tpu.memory_space<vmem>>, vector<1x1x128xf32>
    tpu.vector_store %arg4[%c0_6, %c0_7, %c0_8], %9 {strides = array<i32>} : memref<1x2x128xf32, #tpu.memory_space<vmem>>, vector<1x1x128xf32>,
    %11 = arith.mulf %5, %5 : vector<256x128xf32>
    %cst_9 = arith.constant dense<0.000000e+00> : vector<128xf32>
    %12 = vector.multi_reduction <add>, %11, %cst_9 [0] : vector<256x128xf32> to vector<128xf32>
    %13 = vector.shape_cast %12 : vector<128xf32> to vector<1x128xf32>
    %14 = vector.shape_cast %13 : vector<1x128xf32> to vector<1x1x128xf32>
    %c0_10 = arith.constant 0 : index
    %c1 = arith.constant 1 : index
    %c0_11 = arith.constant 0 : index
    %15 = vector.load %arg4[%c0_10, %c1, %c0_11] : memref<1x2x128xf32, #tpu.memory_space<vmem>>, vector<1x1x128xf32>
    tpu.vector_store %arg4[%c0_10, %c1, %c0_11], %14 {strides = array<i32>} : memref<1x2x128xf32, #tpu.memory_space<vmem>>, vector<1x1x128xf32>,
    return
  }
  func.func @transform_0(%arg0: i32) -> (i32, i32) {
    %c0_i32 = arith.constant 0 : i32
    %c0_i32_0 = arith.constant 0 : i32
    return %arg0, %c0_i32 : i32, i32
  }
  func.func @transform_1(%arg0: i32) -> (i32, i32) {
    %c0_i32 = arith.constant 0 : i32
    %c0_i32_0 = arith.constant 0 : i32
    %c0_i32_1 = arith.constant 0 : i32
    return %c0_i32, %c0_i32_0 : i32, i32
  }
  func.func @transform_2(%arg0: i32) -> (i32, i32) {
    %c0_i32 = arith.constant 0 : i32
    %c0_i32_0 = arith.constant 0 : i32
    return %arg0, %c0_i32 : i32, i32
  }
  func.func @transform_3(%arg0: i32) -> (i32, i32, i32) {
    %c0_i32 = arith.constant 0 : i32
    %c0_i32_0 = arith.constant 0 : i32
    %c0_i32_1 = arith.constant 0 : i32
    return %arg0, %c0_i32, %c0_i32_0 : i32, i32, i32
  }
}

module attributes {stable_mosaic.version = 11 : i64} {
  func.func @_conv2_kernel(%arg0: i32, %arg1: memref<1x16x16x128xbf16, #tpu.memory_space<vmem>>, %arg2: memref<1x128xf32, #tpu.memory_space<vmem>>, %arg3: memref<1x128xf32, #tpu.memory_space<vmem>>, %arg4: memref<9x128x128xbf16, #tpu.memory_space<vmem>>, %arg5: memref<1x16x16x128xbf16, #tpu.memory_space<vmem>>, %arg6: memref<1x2x128xf32, #tpu.memory_space<vmem>>, %arg7: memref<1x18x18x128xbf16, #tpu.memory_space<vmem>>) attributes {dimension_semantics = [#tpu.dimension_semantics<parallel>], iteration_bounds = array<i64: 2>, scalar_prefetch = 0 : i64, scratch_operands = 1 : i64, tpu.core_type = #tpu.core_type<tc>, window_params = [{transform_indices = @transform_0, window_bounds = array<i64: 1, 16, 16, 128>}, {pipeline_mode = #tpu.pipeline_mode<synchronous>, transform_indices = @transform_1, window_bounds = array<i64: 1, 128>}, {pipeline_mode = #tpu.pipeline_mode<synchronous>, transform_indices = @transform_2, window_bounds = array<i64: 1, 128>}, {pipeline_mode = #tpu.pipeline_mode<synchronous>, transform_indices = @transform_3, window_bounds = array<i64: 9, 128, 128>}, {transform_indices = @transform_4, window_bounds = array<i64: 1, 16, 16, 128>}, {transform_indices = @transform_5, window_bounds = array<i64: 1, 2, 128>}]} {
    %c0 = arith.constant 0 : index
    %c0_0 = arith.constant 0 : index
    %0 = vector.load %arg2[%c0, %c0_0] : memref<1x128xf32, #tpu.memory_space<vmem>>, vector<1x128xf32>
    %1 = vector.shape_cast %0 : vector<1x128xf32> to vector<1x1x1x128xf32>
    %c0_1 = arith.constant 0 : index
    %c0_2 = arith.constant 0 : index
    %2 = vector.load %arg3[%c0_1, %c0_2] : memref<1x128xf32, #tpu.memory_space<vmem>>, vector<1x128xf32>
    %3 = vector.shape_cast %2 : vector<1x128xf32> to vector<1x1x1x128xf32>
    %c0_3 = arith.constant 0 : index
    %c0_4 = arith.constant 0 : index
    %c0_5 = arith.constant 0 : index
    %c0_6 = arith.constant 0 : index
    %4 = vector.load %arg1[%c0_3, %c0_4, %c0_5, %c0_6] : memref<1x16x16x128xbf16, #tpu.memory_space<vmem>>, vector<1x16x16x128xbf16>
    %5 = arith.extf %4 : vector<1x16x16x128xbf16> to vector<1x16x16x128xf32>
    %6 = vector.broadcast %1 : vector<1x1x1x128xf32> to vector<1x16x16x128xf32>
    %7 = arith.mulf %5, %6 : vector<1x16x16x128xf32>
    %8 = vector.broadcast %3 : vector<1x1x1x128xf32> to vector<1x16x16x128xf32>
    %9 = arith.addf %7, %8 : vector<1x16x16x128xf32>
    %cst = arith.constant 0.000000e+00 : f32
    %10 = vector.broadcast %cst : f32 to vector<1x16x16x128xf32>
    %11 = arith.maximumf %9, %10 : vector<1x16x16x128xf32>
    %12 = arith.truncf %11 : vector<1x16x16x128xf32> to vector<1x16x16x128xbf16>
    %cst_7 = arith.constant 0.000000e+00 : bf16
    %13 = vector.broadcast %cst_7 : bf16 to vector<1x18x18x128xbf16>
    %c0_8 = arith.constant 0 : index
    %c0_9 = arith.constant 0 : index
    %c0_10 = arith.constant 0 : index
    %c0_11 = arith.constant 0 : index
    %14 = vector.load %arg7[%c0_8, %c0_9, %c0_10, %c0_11] : memref<1x18x18x128xbf16, #tpu.memory_space<vmem>>, vector<1x18x18x128xbf16>
    tpu.vector_store %arg7[%c0_8, %c0_9, %c0_10, %c0_11], %13 {strides = array<i32>} : memref<1x18x18x128xbf16, #tpu.memory_space<vmem>>, vector<1x18x18x128xbf16>,
    %c0_12 = arith.constant 0 : index
    %c1 = arith.constant 1 : index
    %c1_13 = arith.constant 1 : index
    %c0_14 = arith.constant 0 : index
    %15 = vector.load %arg7[%c0_12, %c1, %c1_13, %c0_14] : memref<1x18x18x128xbf16, #tpu.memory_space<vmem>>, vector<1x16x16x128xbf16>
    tpu.vector_store %arg7[%c0_12, %c1, %c1_13, %c0_14], %12 {strides = array<i32>} : memref<1x18x18x128xbf16, #tpu.memory_space<vmem>>, vector<1x16x16x128xbf16>,
    %cst_15 = arith.constant 0.000000e+00 : f32
    %16 = vector.broadcast %cst_15 : f32 to vector<256x128xf32>
    %c0_16 = arith.constant 0 : index
    %c0_17 = arith.constant 0 : index
    %c0_18 = arith.constant 0 : index
    %c0_19 = arith.constant 0 : index
    %17 = vector.load %arg7[%c0_16, %c0_17, %c0_18, %c0_19] : memref<1x18x18x128xbf16, #tpu.memory_space<vmem>>, vector<1x16x16x128xbf16>
    %18 = vector.shape_cast %17 : vector<1x16x16x128xbf16> to vector<256x128xbf16>
    %c0_20 = arith.constant 0 : index
    %c0_21 = arith.constant 0 : index
    %c0_22 = arith.constant 0 : index
    %19 = vector.load %arg4[%c0_20, %c0_21, %c0_22] : memref<9x128x128xbf16, #tpu.memory_space<vmem>>, vector<1x128x128xbf16>
    %20 = vector.shape_cast %19 : vector<1x128x128xbf16> to vector<128x128xbf16>
    %cst_23 = arith.constant dense<0.000000e+00> : vector<256x128xf32>
    %21 = tpu.matmul %18, %20, %cst_23 {dimension_numbers = #tpu.dot_dimension_numbers<[1], [0], [0], [1], [0, 0, 1, 1], [], []>} : vector<256x128xbf16>, vector<128x128xbf16>, vector<256x128xf32> -> vector<256x128xf32>
    %22 = arith.addf %16, %21 : vector<256x128xf32>
    %c0_24 = arith.constant 0 : index
    %c0_25 = arith.constant 0 : index
    %c1_26 = arith.constant 1 : index
    %c0_27 = arith.constant 0 : index
    %23 = vector.load %arg7[%c0_24, %c0_25, %c1_26, %c0_27] : memref<1x18x18x128xbf16, #tpu.memory_space<vmem>>, vector<1x16x16x128xbf16>
    %24 = vector.shape_cast %23 : vector<1x16x16x128xbf16> to vector<256x128xbf16>
    %c1_28 = arith.constant 1 : index
    %c0_29 = arith.constant 0 : index
    %c0_30 = arith.constant 0 : index
    %25 = vector.load %arg4[%c1_28, %c0_29, %c0_30] : memref<9x128x128xbf16, #tpu.memory_space<vmem>>, vector<1x128x128xbf16>
    %26 = vector.shape_cast %25 : vector<1x128x128xbf16> to vector<128x128xbf16>
    %cst_31 = arith.constant dense<0.000000e+00> : vector<256x128xf32>
    %27 = tpu.matmul %24, %26, %cst_31 {dimension_numbers = #tpu.dot_dimension_numbers<[1], [0], [0], [1], [0, 0, 1, 1], [], []>} : vector<256x128xbf16>, vector<128x128xbf16>, vector<256x128xf32> -> vector<256x128xf32>
    %28 = arith.addf %22, %27 : vector<256x128xf32>
    %c0_32 = arith.constant 0 : index
    %c0_33 = arith.constant 0 : index
    %c2 = arith.constant 2 : index
    %c0_34 = arith.constant 0 : index
    %29 = vector.load %arg7[%c0_32, %c0_33, %c2, %c0_34] : memref<1x18x18x128xbf16, #tpu.memory_space<vmem>>, vector<1x16x16x128xbf16>
    %30 = vector.shape_cast %29 : vector<1x16x16x128xbf16> to vector<256x128xbf16>
    %c2_35 = arith.constant 2 : index
    %c0_36 = arith.constant 0 : index
    %c0_37 = arith.constant 0 : index
    %31 = vector.load %arg4[%c2_35, %c0_36, %c0_37] : memref<9x128x128xbf16, #tpu.memory_space<vmem>>, vector<1x128x128xbf16>
    %32 = vector.shape_cast %31 : vector<1x128x128xbf16> to vector<128x128xbf16>
    %cst_38 = arith.constant dense<0.000000e+00> : vector<256x128xf32>
    %33 = tpu.matmul %30, %32, %cst_38 {dimension_numbers = #tpu.dot_dimension_numbers<[1], [0], [0], [1], [0, 0, 1, 1], [], []>} : vector<256x128xbf16>, vector<128x128xbf16>, vector<256x128xf32> -> vector<256x128xf32>
    %34 = arith.addf %28, %33 : vector<256x128xf32>
    %c0_39 = arith.constant 0 : index
    %c1_40 = arith.constant 1 : index
    %c0_41 = arith.constant 0 : index
    %c0_42 = arith.constant 0 : index
    %35 = vector.load %arg7[%c0_39, %c1_40, %c0_41, %c0_42] : memref<1x18x18x128xbf16, #tpu.memory_space<vmem>>, vector<1x16x16x128xbf16>
    %36 = vector.shape_cast %35 : vector<1x16x16x128xbf16> to vector<256x128xbf16>
    %c3 = arith.constant 3 : index
    %c0_43 = arith.constant 0 : index
    %c0_44 = arith.constant 0 : index
    %37 = vector.load %arg4[%c3, %c0_43, %c0_44] : memref<9x128x128xbf16, #tpu.memory_space<vmem>>, vector<1x128x128xbf16>
    %38 = vector.shape_cast %37 : vector<1x128x128xbf16> to vector<128x128xbf16>
    %cst_45 = arith.constant dense<0.000000e+00> : vector<256x128xf32>
    %39 = tpu.matmul %36, %38, %cst_45 {dimension_numbers = #tpu.dot_dimension_numbers<[1], [0], [0], [1], [0, 0, 1, 1], [], []>} : vector<256x128xbf16>, vector<128x128xbf16>, vector<256x128xf32> -> vector<256x128xf32>
    %40 = arith.addf %34, %39 : vector<256x128xf32>
    %c0_46 = arith.constant 0 : index
    %c1_47 = arith.constant 1 : index
    %c1_48 = arith.constant 1 : index
    %c0_49 = arith.constant 0 : index
    %41 = vector.load %arg7[%c0_46, %c1_47, %c1_48, %c0_49] : memref<1x18x18x128xbf16, #tpu.memory_space<vmem>>, vector<1x16x16x128xbf16>
    %42 = vector.shape_cast %41 : vector<1x16x16x128xbf16> to vector<256x128xbf16>
    %c4 = arith.constant 4 : index
    %c0_50 = arith.constant 0 : index
    %c0_51 = arith.constant 0 : index
    %43 = vector.load %arg4[%c4, %c0_50, %c0_51] : memref<9x128x128xbf16, #tpu.memory_space<vmem>>, vector<1x128x128xbf16>
    %44 = vector.shape_cast %43 : vector<1x128x128xbf16> to vector<128x128xbf16>
    %cst_52 = arith.constant dense<0.000000e+00> : vector<256x128xf32>
    %45 = tpu.matmul %42, %44, %cst_52 {dimension_numbers = #tpu.dot_dimension_numbers<[1], [0], [0], [1], [0, 0, 1, 1], [], []>} : vector<256x128xbf16>, vector<128x128xbf16>, vector<256x128xf32> -> vector<256x128xf32>
    %46 = arith.addf %40, %45 : vector<256x128xf32>
    %c0_53 = arith.constant 0 : index
    %c1_54 = arith.constant 1 : index
    %c2_55 = arith.constant 2 : index
    %c0_56 = arith.constant 0 : index
    %47 = vector.load %arg7[%c0_53, %c1_54, %c2_55, %c0_56] : memref<1x18x18x128xbf16, #tpu.memory_space<vmem>>, vector<1x16x16x128xbf16>
    %48 = vector.shape_cast %47 : vector<1x16x16x128xbf16> to vector<256x128xbf16>
    %c5 = arith.constant 5 : index
    %c0_57 = arith.constant 0 : index
    %c0_58 = arith.constant 0 : index
    %49 = vector.load %arg4[%c5, %c0_57, %c0_58] : memref<9x128x128xbf16, #tpu.memory_space<vmem>>, vector<1x128x128xbf16>
    %50 = vector.shape_cast %49 : vector<1x128x128xbf16> to vector<128x128xbf16>
    %cst_59 = arith.constant dense<0.000000e+00> : vector<256x128xf32>
    %51 = tpu.matmul %48, %50, %cst_59 {dimension_numbers = #tpu.dot_dimension_numbers<[1], [0], [0], [1], [0, 0, 1, 1], [], []>} : vector<256x128xbf16>, vector<128x128xbf16>, vector<256x128xf32> -> vector<256x128xf32>
    %52 = arith.addf %46, %51 : vector<256x128xf32>
    %c0_60 = arith.constant 0 : index
    %c2_61 = arith.constant 2 : index
    %c0_62 = arith.constant 0 : index
    %c0_63 = arith.constant 0 : index
    %53 = vector.load %arg7[%c0_60, %c2_61, %c0_62, %c0_63] : memref<1x18x18x128xbf16, #tpu.memory_space<vmem>>, vector<1x16x16x128xbf16>
    %54 = vector.shape_cast %53 : vector<1x16x16x128xbf16> to vector<256x128xbf16>
    %c6 = arith.constant 6 : index
    %c0_64 = arith.constant 0 : index
    %c0_65 = arith.constant 0 : index
    %55 = vector.load %arg4[%c6, %c0_64, %c0_65] : memref<9x128x128xbf16, #tpu.memory_space<vmem>>, vector<1x128x128xbf16>
    %56 = vector.shape_cast %55 : vector<1x128x128xbf16> to vector<128x128xbf16>
    %cst_66 = arith.constant dense<0.000000e+00> : vector<256x128xf32>
    %57 = tpu.matmul %54, %56, %cst_66 {dimension_numbers = #tpu.dot_dimension_numbers<[1], [0], [0], [1], [0, 0, 1, 1], [], []>} : vector<256x128xbf16>, vector<128x128xbf16>, vector<256x128xf32> -> vector<256x128xf32>
    %58 = arith.addf %52, %57 : vector<256x128xf32>
    %c0_67 = arith.constant 0 : index
    %c2_68 = arith.constant 2 : index
    %c1_69 = arith.constant 1 : index
    %c0_70 = arith.constant 0 : index
    %59 = vector.load %arg7[%c0_67, %c2_68, %c1_69, %c0_70] : memref<1x18x18x128xbf16, #tpu.memory_space<vmem>>, vector<1x16x16x128xbf16>
    %60 = vector.shape_cast %59 : vector<1x16x16x128xbf16> to vector<256x128xbf16>
    %c7 = arith.constant 7 : index
    %c0_71 = arith.constant 0 : index
    %c0_72 = arith.constant 0 : index
    %61 = vector.load %arg4[%c7, %c0_71, %c0_72] : memref<9x128x128xbf16, #tpu.memory_space<vmem>>, vector<1x128x128xbf16>
    %62 = vector.shape_cast %61 : vector<1x128x128xbf16> to vector<128x128xbf16>
    %cst_73 = arith.constant dense<0.000000e+00> : vector<256x128xf32>
    %63 = tpu.matmul %60, %62, %cst_73 {dimension_numbers = #tpu.dot_dimension_numbers<[1], [0], [0], [1], [0, 0, 1, 1], [], []>} : vector<256x128xbf16>, vector<128x128xbf16>, vector<256x128xf32> -> vector<256x128xf32>
    %64 = arith.addf %58, %63 : vector<256x128xf32>
    %c0_74 = arith.constant 0 : index
    %c2_75 = arith.constant 2 : index
    %c2_76 = arith.constant 2 : index
    %c0_77 = arith.constant 0 : index
    %65 = vector.load %arg7[%c0_74, %c2_75, %c2_76, %c0_77] : memref<1x18x18x128xbf16, #tpu.memory_space<vmem>>, vector<1x16x16x128xbf16>
    %66 = vector.shape_cast %65 : vector<1x16x16x128xbf16> to vector<256x128xbf16>
    %c8 = arith.constant 8 : index
    %c0_78 = arith.constant 0 : index
    %c0_79 = arith.constant 0 : index
    %67 = vector.load %arg4[%c8, %c0_78, %c0_79] : memref<9x128x128xbf16, #tpu.memory_space<vmem>>, vector<1x128x128xbf16>
    %68 = vector.shape_cast %67 : vector<1x128x128xbf16> to vector<128x128xbf16>
    %cst_80 = arith.constant dense<0.000000e+00> : vector<256x128xf32>
    %69 = tpu.matmul %66, %68, %cst_80 {dimension_numbers = #tpu.dot_dimension_numbers<[1], [0], [0], [1], [0, 0, 1, 1], [], []>} : vector<256x128xbf16>, vector<128x128xbf16>, vector<256x128xf32> -> vector<256x128xf32>
    %70 = arith.addf %64, %69 : vector<256x128xf32>
    %71 = arith.truncf %70 : vector<256x128xf32> to vector<256x128xbf16>
    %72 = arith.extf %71 : vector<256x128xbf16> to vector<256x128xf32>
    %73 = vector.shape_cast %71 : vector<256x128xbf16> to vector<1x16x16x128xbf16>
    %c0_81 = arith.constant 0 : index
    %c0_82 = arith.constant 0 : index
    %c0_83 = arith.constant 0 : index
    %c0_84 = arith.constant 0 : index
    %74 = vector.load %arg5[%c0_81, %c0_82, %c0_83, %c0_84] : memref<1x16x16x128xbf16, #tpu.memory_space<vmem>>, vector<1x16x16x128xbf16>
    tpu.vector_store %arg5[%c0_81, %c0_82, %c0_83, %c0_84], %73 {strides = array<i32>} : memref<1x16x16x128xbf16, #tpu.memory_space<vmem>>, vector<1x16x16x128xbf16>,
    %cst_85 = arith.constant dense<0.000000e+00> : vector<128xf32>
    %75 = vector.multi_reduction <add>, %72, %cst_85 [0] : vector<256x128xf32> to vector<128xf32>
    %76 = vector.shape_cast %75 : vector<128xf32> to vector<1x128xf32>
    %77 = vector.shape_cast %76 : vector<1x128xf32> to vector<1x1x128xf32>
    %c0_86 = arith.constant 0 : index
    %c0_87 = arith.constant 0 : index
    %c0_88 = arith.constant 0 : index
    %78 = vector.load %arg6[%c0_86, %c0_87, %c0_88] : memref<1x2x128xf32, #tpu.memory_space<vmem>>, vector<1x1x128xf32>
    tpu.vector_store %arg6[%c0_86, %c0_87, %c0_88], %77 {strides = array<i32>} : memref<1x2x128xf32, #tpu.memory_space<vmem>>, vector<1x1x128xf32>,
    %79 = arith.mulf %72, %72 : vector<256x128xf32>
    %cst_89 = arith.constant dense<0.000000e+00> : vector<128xf32>
    %80 = vector.multi_reduction <add>, %79, %cst_89 [0] : vector<256x128xf32> to vector<128xf32>
    %81 = vector.shape_cast %80 : vector<128xf32> to vector<1x128xf32>
    %82 = vector.shape_cast %81 : vector<1x128xf32> to vector<1x1x128xf32>
    %c0_90 = arith.constant 0 : index
    %c1_91 = arith.constant 1 : index
    %c0_92 = arith.constant 0 : index
    %83 = vector.load %arg6[%c0_90, %c1_91, %c0_92] : memref<1x2x128xf32, #tpu.memory_space<vmem>>, vector<1x1x128xf32>
    tpu.vector_store %arg6[%c0_90, %c1_91, %c0_92], %82 {strides = array<i32>} : memref<1x2x128xf32, #tpu.memory_space<vmem>>, vector<1x1x128xf32>,
    return
  }
  func.func @transform_0(%arg0: i32) -> (i32, i32, i32, i32) {
    %c0_i32 = arith.constant 0 : i32
    %c0_i32_0 = arith.constant 0 : i32
    %c0_i32_1 = arith.constant 0 : i32
    %c0_i32_2 = arith.constant 0 : i32
    return %arg0, %c0_i32, %c0_i32_0, %c0_i32_1 : i32, i32, i32, i32
  }
  func.func @transform_1(%arg0: i32) -> (i32, i32) {
    %c0_i32 = arith.constant 0 : i32
    %c0_i32_0 = arith.constant 0 : i32
    %c0_i32_1 = arith.constant 0 : i32
    return %c0_i32, %c0_i32_0 : i32, i32
  }
  func.func @transform_2(%arg0: i32) -> (i32, i32) {
    %c0_i32 = arith.constant 0 : i32
    %c0_i32_0 = arith.constant 0 : i32
    %c0_i32_1 = arith.constant 0 : i32
    return %c0_i32, %c0_i32_0 : i32, i32
  }
  func.func @transform_3(%arg0: i32) -> (i32, i32, i32) {
    %c0_i32 = arith.constant 0 : i32
    %c0_i32_0 = arith.constant 0 : i32
    %c0_i32_1 = arith.constant 0 : i32
    %c0_i32_2 = arith.constant 0 : i32
    return %c0_i32, %c0_i32_0, %c0_i32_1 : i32, i32, i32
  }
  func.func @transform_4(%arg0: i32) -> (i32, i32, i32, i32) {
    %c0_i32 = arith.constant 0 : i32
    %c0_i32_0 = arith.constant 0 : i32
    %c0_i32_1 = arith.constant 0 : i32
    %c0_i32_2 = arith.constant 0 : i32
    return %arg0, %c0_i32, %c0_i32_0, %c0_i32_1 : i32, i32, i32, i32
  }
  func.func @transform_5(%arg0: i32) -> (i32, i32, i32) {
    %c0_i32 = arith.constant 0 : i32
    %c0_i32_0 = arith.constant 0 : i32
    %c0_i32_1 = arith.constant 0 : i32
    return %arg0, %c0_i32, %c0_i32_0 : i32, i32, i32
  }
}

module attributes {stable_mosaic.version = 11 : i64} {
  func.func @_conv3_kernel(%arg0: i32, %arg1: memref<256x128xbf16, #tpu.memory_space<vmem>>, %arg2: memref<1x128xf32, #tpu.memory_space<vmem>>, %arg3: memref<1x128xf32, #tpu.memory_space<vmem>>, %arg4: memref<128x128xbf16, #tpu.memory_space<vmem>>, %arg5: memref<256x128xbf16, #tpu.memory_space<vmem>>, %arg6: memref<1x2x128xf32, #tpu.memory_space<vmem>>) attributes {dimension_semantics = [#tpu.dimension_semantics<parallel>], iteration_bounds = array<i64: 2>, scalar_prefetch = 0 : i64, scratch_operands = 0 : i64, tpu.core_type = #tpu.core_type<tc>, window_params = [{transform_indices = @transform_0, window_bounds = array<i64: 256, 128>}, {pipeline_mode = #tpu.pipeline_mode<synchronous>, transform_indices = @transform_1, window_bounds = array<i64: 1, 128>}, {pipeline_mode = #tpu.pipeline_mode<synchronous>, transform_indices = @transform_2, window_bounds = array<i64: 1, 128>}, {pipeline_mode = #tpu.pipeline_mode<synchronous>, transform_indices = @transform_3, window_bounds = array<i64: 128, 128>}, {transform_indices = @transform_4, window_bounds = array<i64: 256, 128>}, {transform_indices = @transform_5, window_bounds = array<i64: 1, 2, 128>}]} {
    %c0 = arith.constant 0 : index
    %c0_0 = arith.constant 0 : index
    %0 = vector.load %arg1[%c0, %c0_0] : memref<256x128xbf16, #tpu.memory_space<vmem>>, vector<256x128xbf16>
    %1 = arith.extf %0 : vector<256x128xbf16> to vector<256x128xf32>
    %c0_1 = arith.constant 0 : index
    %c0_2 = arith.constant 0 : index
    %2 = vector.load %arg2[%c0_1, %c0_2] : memref<1x128xf32, #tpu.memory_space<vmem>>, vector<1x128xf32>
    %3 = vector.broadcast %2 : vector<1x128xf32> to vector<256x128xf32>
    %4 = arith.mulf %1, %3 : vector<256x128xf32>
    %c0_3 = arith.constant 0 : index
    %c0_4 = arith.constant 0 : index
    %5 = vector.load %arg3[%c0_3, %c0_4] : memref<1x128xf32, #tpu.memory_space<vmem>>, vector<1x128xf32>
    %6 = vector.broadcast %5 : vector<1x128xf32> to vector<256x128xf32>
    %7 = arith.addf %4, %6 : vector<256x128xf32>
    %cst = arith.constant 0.000000e+00 : f32
    %8 = vector.broadcast %cst : f32 to vector<256x128xf32>
    %9 = arith.maximumf %7, %8 : vector<256x128xf32>
    %10 = arith.truncf %9 : vector<256x128xf32> to vector<256x128xbf16>
    %c0_5 = arith.constant 0 : index
    %c0_6 = arith.constant 0 : index
    %11 = vector.load %arg4[%c0_5, %c0_6] : memref<128x128xbf16, #tpu.memory_space<vmem>>, vector<128x128xbf16>
    %cst_7 = arith.constant dense<0.000000e+00> : vector<256x128xf32>
    %12 = tpu.matmul %10, %11, %cst_7 {dimension_numbers = #tpu.dot_dimension_numbers<[1], [0], [0], [1], [0, 0, 1, 1], [], []>} : vector<256x128xbf16>, vector<128x128xbf16>, vector<256x128xf32> -> vector<256x128xf32>
    %13 = arith.truncf %12 : vector<256x128xf32> to vector<256x128xbf16>
    %14 = arith.extf %13 : vector<256x128xbf16> to vector<256x128xf32>
    %c0_8 = arith.constant 0 : index
    %c0_9 = arith.constant 0 : index
    %15 = vector.load %arg5[%c0_8, %c0_9] : memref<256x128xbf16, #tpu.memory_space<vmem>>, vector<256x128xbf16>
    tpu.vector_store %arg5[%c0_8, %c0_9], %13 {strides = array<i32>} : memref<256x128xbf16, #tpu.memory_space<vmem>>, vector<256x128xbf16>,
    %cst_10 = arith.constant dense<0.000000e+00> : vector<128xf32>
    %16 = vector.multi_reduction <add>, %14, %cst_10 [0] : vector<256x128xf32> to vector<128xf32>
    %17 = vector.shape_cast %16 : vector<128xf32> to vector<1x128xf32>
    %18 = vector.shape_cast %17 : vector<1x128xf32> to vector<1x1x128xf32>
    %c0_11 = arith.constant 0 : index
    %c0_12 = arith.constant 0 : index
    %c0_13 = arith.constant 0 : index
    %19 = vector.load %arg6[%c0_11, %c0_12, %c0_13] : memref<1x2x128xf32, #tpu.memory_space<vmem>>, vector<1x1x128xf32>
    tpu.vector_store %arg6[%c0_11, %c0_12, %c0_13], %18 {strides = array<i32>} : memref<1x2x128xf32, #tpu.memory_space<vmem>>, vector<1x1x128xf32>,
    %20 = arith.mulf %14, %14 : vector<256x128xf32>
    %cst_14 = arith.constant dense<0.000000e+00> : vector<128xf32>
    %21 = vector.multi_reduction <add>, %20, %cst_14 [0] : vector<256x128xf32> to vector<128xf32>
    %22 = vector.shape_cast %21 : vector<128xf32> to vector<1x128xf32>
    %23 = vector.shape_cast %22 : vector<1x128xf32> to vector<1x1x128xf32>
    %c0_15 = arith.constant 0 : index
    %c1 = arith.constant 1 : index
    %c0_16 = arith.constant 0 : index
    %24 = vector.load %arg6[%c0_15, %c1, %c0_16] : memref<1x2x128xf32, #tpu.memory_space<vmem>>, vector<1x1x128xf32>
    tpu.vector_store %arg6[%c0_15, %c1, %c0_16], %23 {strides = array<i32>} : memref<1x2x128xf32, #tpu.memory_space<vmem>>, vector<1x1x128xf32>,
    return
  }
  func.func @transform_0(%arg0: i32) -> (i32, i32) {
    %c0_i32 = arith.constant 0 : i32
    %c0_i32_0 = arith.constant 0 : i32
    return %arg0, %c0_i32 : i32, i32
  }
  func.func @transform_1(%arg0: i32) -> (i32, i32) {
    %c0_i32 = arith.constant 0 : i32
    %c0_i32_0 = arith.constant 0 : i32
    %c0_i32_1 = arith.constant 0 : i32
    return %c0_i32, %c0_i32_0 : i32, i32
  }
  func.func @transform_2(%arg0: i32) -> (i32, i32) {
    %c0_i32 = arith.constant 0 : i32
    %c0_i32_0 = arith.constant 0 : i32
    %c0_i32_1 = arith.constant 0 : i32
    return %c0_i32, %c0_i32_0 : i32, i32
  }
  func.func @transform_3(%arg0: i32) -> (i32, i32) {
    %c0_i32 = arith.constant 0 : i32
    %c0_i32_0 = arith.constant 0 : i32
    %c0_i32_1 = arith.constant 0 : i32
    return %c0_i32, %c0_i32_0 : i32, i32
  }
  func.func @transform_4(%arg0: i32) -> (i32, i32) {
    %c0_i32 = arith.constant 0 : i32
    %c0_i32_0 = arith.constant 0 : i32
    return %arg0, %c0_i32 : i32, i32
  }
  func.func @transform_5(%arg0: i32) -> (i32, i32, i32) {
    %c0_i32 = arith.constant 0 : i32
    %c0_i32_0 = arith.constant 0 : i32
    %c0_i32_1 = arith.constant 0 : i32
    return %arg0, %c0_i32, %c0_i32_0 : i32, i32, i32
  }
}

module attributes {stable_mosaic.version = 11 : i64} {
  func.func @_bn3_residual_kernel(%arg0: i32, %arg1: memref<256x128xbf16, #tpu.memory_space<vmem>>, %arg2: memref<256x128xf32, #tpu.memory_space<vmem>>, %arg3: memref<1x128xf32, #tpu.memory_space<vmem>>, %arg4: memref<1x128xf32, #tpu.memory_space<vmem>>, %arg5: memref<256x128xf32, #tpu.memory_space<vmem>>) attributes {dimension_semantics = [#tpu.dimension_semantics<parallel>], iteration_bounds = array<i64: 2>, scalar_prefetch = 0 : i64, scratch_operands = 0 : i64, tpu.core_type = #tpu.core_type<tc>, window_params = [{transform_indices = @transform_0, window_bounds = array<i64: 256, 128>}, {transform_indices = @transform_1, window_bounds = array<i64: 256, 128>}, {pipeline_mode = #tpu.pipeline_mode<synchronous>, transform_indices = @transform_2, window_bounds = array<i64: 1, 128>}, {pipeline_mode = #tpu.pipeline_mode<synchronous>, transform_indices = @transform_3, window_bounds = array<i64: 1, 128>}, {transform_indices = @transform_4, window_bounds = array<i64: 256, 128>}]} {
    %c0 = arith.constant 0 : index
    %c0_0 = arith.constant 0 : index
    %0 = vector.load %arg1[%c0, %c0_0] : memref<256x128xbf16, #tpu.memory_space<vmem>>, vector<256x128xbf16>
    %1 = arith.extf %0 : vector<256x128xbf16> to vector<256x128xf32>
    %c0_1 = arith.constant 0 : index
    %c0_2 = arith.constant 0 : index
    %2 = vector.load %arg3[%c0_1, %c0_2] : memref<1x128xf32, #tpu.memory_space<vmem>>, vector<1x128xf32>
    %3 = vector.broadcast %2 : vector<1x128xf32> to vector<256x128xf32>
    %4 = arith.mulf %1, %3 : vector<256x128xf32>
    %c0_3 = arith.constant 0 : index
    %c0_4 = arith.constant 0 : index
    %5 = vector.load %arg4[%c0_3, %c0_4] : memref<1x128xf32, #tpu.memory_space<vmem>>, vector<1x128xf32>
    %6 = vector.broadcast %5 : vector<1x128xf32> to vector<256x128xf32>
    %7 = arith.addf %4, %6 : vector<256x128xf32>
    %c0_5 = arith.constant 0 : index
    %c0_6 = arith.constant 0 : index
    %8 = vector.load %arg2[%c0_5, %c0_6] : memref<256x128xf32, #tpu.memory_space<vmem>>, vector<256x128xf32>
    %9 = arith.addf %7, %8 : vector<256x128xf32>
    %cst = arith.constant 0.000000e+00 : f32
    %10 = vector.broadcast %cst : f32 to vector<256x128xf32>
    %11 = arith.maximumf %9, %10 : vector<256x128xf32>
    %c0_7 = arith.constant 0 : index
    %c0_8 = arith.constant 0 : index
    %12 = vector.load %arg5[%c0_7, %c0_8] : memref<256x128xf32, #tpu.memory_space<vmem>>, vector<256x128xf32>
    tpu.vector_store %arg5[%c0_7, %c0_8], %11 {strides = array<i32>} : memref<256x128xf32, #tpu.memory_space<vmem>>, vector<256x128xf32>,
    return
  }
  func.func @transform_0(%arg0: i32) -> (i32, i32) {
    %c0_i32 = arith.constant 0 : i32
    %c0_i32_0 = arith.constant 0 : i32
    return %arg0, %c0_i32 : i32, i32
  }
  func.func @transform_1(%arg0: i32) -> (i32, i32) {
    %c0_i32 = arith.constant 0 : i32
    %c0_i32_0 = arith.constant 0 : i32
    return %arg0, %c0_i32 : i32, i32
  }
  func.func @transform_2(%arg0: i32) -> (i32, i32) {
    %c0_i32 = arith.constant 0 : i32
    %c0_i32_0 = arith.constant 0 : i32
    %c0_i32_1 = arith.constant 0 : i32
    return %c0_i32, %c0_i32_0 : i32, i32
  }
  func.func @transform_3(%arg0: i32) -> (i32, i32) {
    %c0_i32 = arith.constant 0 : i32
    %c0_i32_0 = arith.constant 0 : i32
    %c0_i32_1 = arith.constant 0 : i32
    return %c0_i32, %c0_i32_0 : i32, i32
  }
  func.func @transform_4(%arg0: i32) -> (i32, i32) {
    %c0_i32 = arith.constant 0 : i32
    %c0_i32_0 = arith.constant 0 : i32
    return %arg0, %c0_i32 : i32, i32
  }
}

</mosaic_0001>

<bundles_post_ra>
// kernel: bottleneck_forward.4
= control target key start
LH: loop header
LB: loop body
LE: loop exit
PB: predicated region body
PF: predicated region fallthrough
CT: control target
= control target key end

     0   :  { %9 = vsyncpa [#allocation3], 0  ;;  %s1512_s0 = inlined_call_operand.hbm [shape: f32[512,128], index: 0, kind: input, shape index: {}]   ;;  %s1513_s1 = inlined_call_operand.vmem [shape: bf16[128,128], index: 1, kind: input, shape index: {}]   ;;  %s1514_s2 = inlined_call_operand.vmem [shape: bf16[512,128], index: 2, kind: output, shape index: {0}]   ;;  %s1515_s3 = inlined_call_operand.vmem [shape: f32[2,2,128], index: 3, kind: output, shape index: {1}]  }
   0x1   :  { %11 = vsyncpa [#allocation3 + $0x1], 0  ;;  %s1284_s12 = smov 0   ;;  %s1286_s13 = smov 0  }
   0x2   :  { %s1288_s14 = smov 0   ;;  %s1290_s15 = smov 0  }
   0x3 LB: > { %s1303_s16 = sadd.s32 4294967295, %s1259_s15   ;;  %s1306_s17 = sadd.s32 1, %s1259_s15   ;;  %s1259_s15 = sphi %s1290_s15, %s1522_s15   ;;  %s1255_s14 = sphi %s1288_s14, %s1521_s14   ;;  %s1251_s13 = sphi %s1286_s13, %s1520_s13   ;;  %s1247_s12 = sphi %s1284_s12, %s1519_s12  }
   0x4   : > { %s21_s18 = ssub.s32 %s1259_s15, %s1306_s17  ;;  %s24_s19 = sadd.s32 1, %s1255_s14 }
   0x5   : > { %p22_p0 = scmp.eq.s32.totalorder %s21_s18, 0  ;;  %p31_p1 = scmp.ne.s32.totalorder %s1255_s14, %s1251_s13 }
   0x6   : > { %p32_p2 = scmp.eq.s32.totalorder %s1259_s15, 0  ;;  %p37_p3 = scmp.ne.s32.totalorder %s1251_s13, %s1247_s12 }
   0x7   : > { %s1316_s20 = scalar_select %p22_p0, %s1255_s14, %s24_s19  }
   0x8   : > { %p33_p4 = por %p32_p2, %p31_p1  ;;  %p38_p5 = scmp.eq.s32.totalorder %s1303_s16, 0 }
   0x9   : > { %p1152_p6 = scmp.lt.s32.totalorder %s1259_s15, 2  ;;  %s137_s22 = sand.u32 1, %s1255_s14  }
   0xa   : > { %p1320_p7 = por %p38_p5, %p37_p3  ;;  %s880_s23 = sshll.u32 %s137_s22, 8 }
   0xb   : > { %s930_s24 = sshll.u32 %s1259_s15, 12  ;;  %s141_s28 = scalar_lea.vmem [#allocation2], %s880_s23 }
   0xc   : > { %s1329_s27 = scalar_lea.hbm %s1512_s0, %s930_s24  ;;  %s148_s29 = sshll.u32 %s141_s28, 4  ;;  %s1331_s29 = int_to_ptr.vmem [resolvable:$true] %s148_s29 }
   0xd   : > { %p1333_p8 = pnand %p1152_p6, %p33_p4  ;;  %s1338_s4 = scalar_lea.sflag [#allocation3], %s137_s22 }
   0xe   : > { %s1195_s5 = scalar_lea.hbm %s1329_s27, 4096  ;;  %s1200_s8 = scalar_lea.hbm %s1512_s0, 8192 }
   0xf   : > { %p1196_p10 = scmp.ne.s32.totalorder %s1329_s27, %s1195_s5  ;;  %p1197_p11 = pneg %p1333_p8 }
  0x10   : > { %p1201_p0 = scmp.lt.u32.totalorder %s1329_s27, %s1512_s0  ;;  %p1202_p1 = scmp.lt.u32.totalorder %s1200_s8, %s1195_s5 }
  0x11   : > { %p1198_p12 = pnand %p1197_p11, %p1196_p10  ;;  %p1204_p3 = scmp.lt.u32.totalorder %s1195_s5, %s1329_s27 }
  0x12   : > { %p1203_p2 = por %p1202_p1, %p1201_p0 }
  0x13   : > { %p1199_p13 = pneg %p1198_p12 }
  0x14   : > { %p1205_p4 = por %p1204_p3, %p1203_p2 }
  0x16   : > { %p1206_p5 = pnand %p1205_p4, %p1199_p13 }
  0x18   : > { %1209 = shalt.err (!%p1206_p5)
}
  0x19   : > { %s1210_s11 = scalar_lea.vmem %s1331_s29, 4096  ;;  %s1261_s12 = smov [#allocation2]  }
  0x1a   : > { %p1211_p6 = scmp.ne.s32.totalorder %s1331_s29, %s1210_s11  ;;  %s1215_s18 = sshll.u32 %s1261_s12, 4  ;;  %s1216_s18 = int_to_ptr.vmem [resolvable:$false] %s1215_s18 }
  0x1b   : > { %s1217_s19 = scalar_lea.vmem %s1216_s18, 8192  ;;  %p1218_p9 = scmp.lt.s32.totalorder %s1331_s29, %s1216_s18 }
  0x1c   : > { %p1213_p10 = pnand %p1211_p6, %p1197_p11  ;;  %p1219_p0 = scmp.lt.s32.totalorder %s1217_s19, %s1210_s11 }
  0x1e   : > { %p1214_p12 = pneg %p1213_p10  ;;  %p1220_p1 = por %p1219_p0, %p1218_p9 }
  0x20   : > { %p1221_p2 = pnand %p1220_p1, %p1214_p12 }
  0x22   : > { %1224 = shalt.err (!%p1221_p2)
}
  0x23   : > { %s1262_s22 = smov 128   ;;  %s1263_s23 = smov 8  }
  0x24   : > { %1151 = dma.hbm_to_vmem [thread:$0]  (!%p1333_p8), %s1329_s27, 4096, %s1331_s29, %s1338_s4, %s1262_s22, %s1262_s22, %s1263_s23  }
  0x25   : > { %p156_p11 = scmp.lt.s32.totalorder %s1259_s15, 3  ;;  %p1518_p13 = scmp.ge.s32.totalorder %s1259_s15, 1 }
  0x27   : > { %p157_p3 = pnand %p1518_p13, %p156_p11 }
  0x28   : > { %s162_s24 = sand.u32 (!%p157_p3), 1, %s1251_s13  }
  0x29   : > { %160 = sbr.rel (%p157_p3) target bundleno = 380 (0x17c), region = 28  ;;  %s884_s25 = sshll.u32 (!%p157_p3), %s162_s24, 8 }
  0x2a   : > { %s163_s26 = scalar_lea.sflag (!%p157_p3), [#allocation3], %s162_s24  ;;  %s1370_s28 = scalar_lea.vmem (!%p157_p3), [#allocation2], %s884_s25 }
  0x30   : > { %1242 = dma.done.wait (%p1320_p7), %s163_s26, 4096  }
  0x31   : > { %1244 = vsyncadd (%p1320_p7), %s163_s26, 4294963200  ;;  %v1187_v0 = vld [vmem:[%s1513_s1] sm:$0xff]   ;;  %v1188_v1 = vld [vmem:[%s1513_s1 + $0x8] sm:$0xff]   ;;  %s885_s22 = sshll.u32 %s1303_s16, 5  ;;  %p200_p8 = scmp.lt.s32.totalorder %s1303_s16, 1 }
  0x32   : > { %1082 = vmatprep.subr.bf16.mxu0 %v1187_v0  ;;  %1130 = vmatprep.subr.bf16.mxu1 %v1187_v0  ;;  %v1189_v2 = vld [vmem:[%s1513_s1 + $0x10] sm:$0xff]   ;;  %v1190_v3 = vld [vmem:[%s1513_s1 + $0x18] sm:$0xff]   ;;  %v205_v4 = vld [vmem:[%s1370_s28] sm:$0xff]  ;;  %p195_p7 = scmp.lt.s32.totalorder %s885_s22, 63 }
  0x33   : > { %1083 = vmatpush3.bf16.msra.mxu0 %v1187_v0  ;;  %1138 = vmatpush3.bf16.msra.mxu1 %v1187_v0  ;;  %v206_v5 = vld [vmem:[%s1370_s28 + $0x8] sm:$0xff]  ;;  %v1191_v7 = vld [vmem:[%s1513_s1 + $0x20] sm:$0xff]   ;;  %v1193_v12 = vld [vmem:[%s1513_s1 + $0x30] sm:$0xff]   ;;  %s1526_s16 = smov (!%p200_p8, %s1303_s16), 1 }
  0x34   : > { %1084 = vmatprep.subr.bf16.mxu0 %v1188_v1  ;;  %1131 = vmatprep.subr.bf16.mxu1 %v1188_v1  ;;  %v237_v6 = vpack.c.bf16 %v206_v5, %v205_v4  ;;  %v221_v8 = vld [vmem:[%s1370_s28 + $0x80] sm:$0xff]  ;;  %v222_v9 = vld [vmem:[%s1370_s28 + $0x88] sm:$0xff]  ;;  %v1194_v13 = vld [vmem:[%s1513_s1 + $0x38] sm:$0xff]   ;;  %s1524_s22 = smov (!%p195_p7, %s885_s22), 63 }
  0x35   : > { %v245_v10 = vpack.c.bf16 %v222_v9, %v221_v8  ;;  %v1192_v11 = vld [vmem:[%s1513_s1 + $0x28] sm:$0xff]   ;;  %v207_v14 = vld [vmem:[%s1370_s28 + $0x10] sm:$0xff]  ;;  %v208_v15 = vld [vmem:[%s1370_s28 + $0x18] sm:$0xff]  ;;  %s886_s23 = sshll.u32 %s1524_s22, 2 }
  0x36   : > { %1098 = vmatprep.mubr.bf16.mxu0 %v237_v6  ;;  %v209_v16 = vld [vmem:[%s1370_s28 + $0x20] sm:$0xff]  ;;  %v210_v17 = vld [vmem:[%s1370_s28 + $0x28] sm:$0xff]  ;;  %v223_v18 = vld [vmem:[%s1370_s28 + $0x90] sm:$0xff]  ;;  %v238_v22 = vpack.c.bf16 %v208_v15, %v207_v14  ;;  %s1436_s26 = scalar_lea.vmem %s1514_s2, %s886_s23 }
  0x37   : > { %1085 = vmatpush3.bf16.msra.mxu0 %v1188_v1  ;;  %1139 = vmatpush3.bf16.msra.mxu1 %v1188_v1  ;;  %v224_v19 = vld [vmem:[%s1370_s28 + $0x98] sm:$0xff]  ;;  %v225_v20 = vld [vmem:[%s1370_s28 + $0xa0] sm:$0xff]  ;;  %v226_v21 = vld [vmem:[%s1370_s28 + $0xa8] sm:$0xff]  ;;  %v239_v23 = vpack.c.bf16 %v210_v17, %v209_v16 }
  0x38   : > { %1086 = vmatprep.subr.bf16.mxu0 %v1189_v2  ;;  %1132 = vmatprep.subr.bf16.mxu1 %v1189_v2  ;;  %v246_v24 = vpack.c.bf16 %v224_v19, %v223_v18  ;;  %v247_v25 = vpack.c.bf16 %v226_v21, %v225_v20  ;;  %v211_v26 = vld [vmem:[%s1370_s28 + $0x30] sm:$0xff]  ;;  %v212_v27 = vld [vmem:[%s1370_s28 + $0x38] sm:$0xff]  ;;  %v213_v28 = vld [vmem:[%s1370_s28 + $0x40] sm:$0xff] }
  0x39   : > { %1114 = vmatprep.mubr.bf16.mxu1 %v245_v10  ;;  %v214_v29 = vld [vmem:[%s1370_s28 + $0x48] sm:$0xff]  ;;  %v227_v30 = vld [vmem:[%s1370_s28 + $0xb0] sm:$0xff]  ;;  %v228_v31 = vld [vmem:[%s1370_s28 + $0xb8] sm:$0xff]  ;;  %v240_v34 = vpack.c.bf16 %v212_v27, %v211_v26 }
  0x3a   : > { %v229_v32 = vld [vmem:[%s1370_s28 + $0xc0] sm:$0xff]  ;;  %v230_v33 = vld [vmem:[%s1370_s28 + $0xc8] sm:$0xff]  ;;  %v241_v35 = vpack.c.bf16 %v214_v29, %v213_v28  ;;  %v248_v36 = vpack.c.bf16 %v228_v31, %v227_v30  ;;  %v215_v38 = vld [vmem:[%s1370_s28 + $0x50] sm:$0xff] }
  0x3b   : > { %1087 = vmatpush3.bf16.msra.mxu0 %v1189_v2  ;;  %1140 = vmatpush3.bf16.msra.mxu1 %v1189_v2  ;;  %v249_v37 = vpack.c.bf16 %v230_v33, %v229_v32  ;;  %v216_v39 = vld [vmem:[%s1370_s28 + $0x58] sm:$0xff]  ;;  %v217_v40 = vld [vmem:[%s1370_s28 + $0x60] sm:$0xff]  ;;  %v218_v41 = vld [vmem:[%s1370_s28 + $0x68] sm:$0xff] }
  0x3c   : > { %1088 = vmatprep.subr.bf16.mxu0 %v1190_v3  ;;  %1133 = vmatprep.subr.bf16.mxu1 %v1190_v3  ;;  %v231_v42 = vld [vmem:[%s1370_s28 + $0xd0] sm:$0xff]  ;;  %v232_v43 = vld [vmem:[%s1370_s28 + $0xd8] sm:$0xff]  ;;  %v233_v44 = vld [vmem:[%s1370_s28 + $0xe0] sm:$0xff]  ;;  %v242_v46 = vpack.c.bf16 %v216_v39, %v215_v38  ;;  %v243_v47 = vpack.c.bf16 %v218_v41, %v217_v40 }
  0x3d   : > { %v234_v45 = vld [vmem:[%s1370_s28 + $0xe8] sm:$0xff]  ;;  %v250_v48 = vpack.c.bf16 %v232_v43, %v231_v42  ;;  %v219_v50 = vld [vmem:[%s1370_s28 + $0x70] sm:$0xff]  ;;  %v220_v51 = vld [vmem:[%s1370_s28 + $0x78] sm:$0xff] }
  0x3e   : > { %v251_v49 = vpack.c.bf16 %v234_v45, %v233_v44  ;;  %v235_v52 = vld [vmem:[%s1370_s28 + $0xf0] sm:$0xff]  ;;  %v236_v53 = vld [vmem:[%s1370_s28 + $0xf8] sm:$0xff]  ;;  %v244_v54 = vpack.c.bf16 %v220_v51, %v219_v50  ;;  %s887_s28 = sshll.u32 %s1526_s16, 1 }
  0x3f   : > { %1089 = vmatpush3.bf16.msra.mxu0 %v1190_v3  ;;  %1141 = vmatpush3.bf16.msra.mxu1 %v1190_v3  ;;  %v252_v55 = vpack.c.bf16 %v236_v53, %v235_v52  ;;  %s203_s15 = scalar_lea.vmem %s1515_s3, %s887_s28 }
  0x40   : > { %1090 = vmatprep.subr.bf16.mxu0 %v1191_v7  ;;  %1134 = vmatprep.subr.bf16.mxu1 %v1191_v7 }
  0x43   : > { %1091 = vmatpush3.bf16.msra.mxu0 %v1191_v7  ;;  %1142 = vmatpush3.bf16.msra.mxu1 %v1191_v7 }
  0x44   : > { %1092 = vmatprep.subr.bf16.mxu0 %v1192_v11  ;;  %1135 = vmatprep.subr.bf16.mxu1 %v1192_v11 }
  0x47   : > { %1093 = vmatpush3.bf16.msra.mxu0 %v1192_v11  ;;  %1143 = vmatpush3.bf16.msra.mxu1 %v1192_v11 }
  0x48   : > { %1094 = vmatprep.subr.bf16.mxu0 %v1193_v12  ;;  %1136 = vmatprep.subr.bf16.mxu1 %v1193_v12 }
  0x4b   : > { %1095 = vmatpush3.bf16.msra.mxu0 %v1193_v12  ;;  %1144 = vmatpush3.bf16.msra.mxu1 %v1193_v12 }
  0x4c   : > { %1096 = vmatprep.subr.bf16.mxu0 %v1194_v13  ;;  %1137 = vmatprep.subr.bf16.mxu1 %v1194_v13 }
  0x4f   : > { %1097 = vmatpush3.bf16.msra.mxu0 %v1194_v13  ;;  %1145 = vmatpush3.bf16.msra.mxu1 %v1194_v13 }
  0x52   : > { %1099 = vmatmul.mubr.bf16.vlgmr.msra.gmra.mrb[0].mxu0 %v238_v22  ;;  %1115 = vmatmul.mubr.bf16.vlgmr.msra.gmra.mrb[0].mxu1 %v246_v24 }
  0x53   : > { %1102 = vmatprep.mubr.bf16.mxu0 %v239_v23  ;;  %1118 = vmatprep.mubr.bf16.mxu1 %v247_v25 }
  0x5a   : > { %1103 = vmatmul.mubr.bf16.gmra.mrb[4].mxu0 %v240_v34  ;;  %1119 = vmatmul.mubr.bf16.gmra.mrb[4].mxu1 %v248_v36 }
  0x5b   : > { %1106 = vmatprep.mubr.bf16.mxu0 %v241_v35  ;;  %1122 = vmatprep.mubr.bf16.mxu1 %v249_v37 }
  0x62   : > { %1107 = vmatmul.mubr.bf16.gmra.mrb[8].mxu0 %v242_v46  ;;  %1123 = vmatmul.mubr.bf16.gmra.mrb[8].mxu1 %v250_v48 }
  0x63   : > { %1110 = vmatprep.mubr.bf16.mxu0 %v243_v47  ;;  %1126 = vmatprep.mubr.bf16.mxu1 %v251_v49 }
  0x6a   : > { %1111 = vmatmul.mubr.bf16.gmra.mrb[12].mxu0 %v244_v54  ;;  %1127 = vmatmul.mubr.bf16.gmra.mrb[12].mxu1 %v252_v55 }
 0x125   : > { %v1100_v56 = vpop.f32.mrb[0].mxu0  ;;  %v1116_v58 = vpop.f32.mrb[0].mxu1 }
 0x126   : > { %v351_v57 = vpop.f32.mrb[1].mxu0  ;;  %v415_v60 = vpop.f32.mrb[1].mxu1 }
 0x127   : > { %v1101_v59 = vpop.f32.mrb[2].mxu0  ;;  %v1117_v63 = vpop.f32.mrb[2].mxu1 }
 0x128   : > { %v479_v61 = vpack.c.bf16 %v1101_v59, %v1100_v56  ;;  %v354_v62 = vpop.f32.mrb[3].mxu0  ;;  %v1438_v1 = vpack.c.bf16 %v1117_v63, %v1116_v58  ;;  %v418_v2 = vpop.f32.mrb[3].mxu1 }
 0x129   : > { %v478_v0 = vpack.c.bf16 %v354_v62, %v351_v57  ;;  %v1441_v3 = vpack.c.bf16 %v418_v2, %v415_v60 }
 0x12a   : > { %1043 = vst [vmem:[%s1436_s26 + $0x8] sm:$0xff] %v479_v61   ;;  %v496_v4 = vunpack.c.l.bf16 %v479_v61  ;;  %1051 = vst [vmem:[%s1436_s26 + $0x48] sm:$0xff] %v1438_v1   ;;  %v497_v7 = vunpack.c.h.bf16 %v479_v61 }
 0x12b   : > { %v494_v5 = vunpack.c.l.bf16 %v478_v0  ;;  %v495_v6 = vunpack.c.h.bf16 %v478_v0  ;;  %967 = vst [vmem:[%s1436_s26] sm:$0xff] %v478_v0   ;;  %1050 = vst [vmem:[%s1436_s26 + $0x40] sm:$0xff] %v1441_v3  }
 0x12c   : > { %v710_v14 = vmul.f32 %v496_v4, %v496_v4  ;;  %v711_v19 = vmul.f32 %v497_v7, %v497_v7 }
 0x12d   : > { %v670_v8 = vadd.f32 %v495_v6, %v494_v5  ;;  %v708_v9 = vmul.f32 %v494_v5, %v494_v5  ;;  %v709_v10 = vmul.f32 %v495_v6, %v495_v6  ;;  %v1104_v11 = vpop.f32.mrb[4].mxu0  ;;  %v1120_v13 = vpop.f32.mrb[4].mxu1 }
 0x12e   : > { %v367_v12 = vpop.f32.mrb[5].mxu0  ;;  %v431_v18 = vpop.f32.mrb[5].mxu1 }
 0x12f   : > { %v671_v15 = vadd.f32 %v670_v8, %v496_v4  ;;  %v740_v16 = vadd.f32 %v709_v10, %v708_v9  ;;  %v1105_v17 = vpop.f32.mrb[6].mxu0  ;;  %v1121_v22 = vpop.f32.mrb[6].mxu1 }
 0x130   : > { %v481_v20 = vpack.c.bf16 %v1105_v17, %v1104_v11  ;;  %v370_v21 = vpop.f32.mrb[7].mxu0  ;;  %v1448_v26 = vpack.c.bf16 %v1121_v22, %v1120_v13  ;;  %v434_v27 = vpop.f32.mrb[7].mxu1 }
 0x131   : > { %v741_v23 = vadd.f32 %v740_v16, %v710_v14  ;;  %v480_v24 = vpack.c.bf16 %v370_v21, %v367_v12  ;;  %v672_v25 = vadd.f32 %v671_v15, %v497_v7  ;;  %v1451_v28 = vpack.c.bf16 %v434_v27, %v431_v18 }
 0x132   : > { %1045 = vst [vmem:[%s1436_s26 + $0x18] sm:$0xff] %v481_v20   ;;  %1053 = vst [vmem:[%s1436_s26 + $0x58] sm:$0xff] %v1448_v26   ;;  %v500_v32 = vunpack.c.l.bf16 %v481_v20  ;;  %v501_v36 = vunpack.c.h.bf16 %v481_v20 }
 0x133   : > { %v498_v29 = vunpack.c.l.bf16 %v480_v24  ;;  %v499_v30 = vunpack.c.h.bf16 %v480_v24  ;;  %1044 = vst [vmem:[%s1436_s26 + $0x10] sm:$0xff] %v480_v24   ;;  %v742_v31 = vadd.f32 %v741_v23, %v711_v19  ;;  %1052 = vst [vmem:[%s1436_s26 + $0x50] sm:$0xff] %v1451_v28  }
 0x134   : > { %v714_v44 = vmul.f32 %v500_v32, %v500_v32  ;;  %v715_v53 = vmul.f32 %v501_v36, %v501_v36 }
 0x135   : > { %v673_v33 = vadd.f32 %v672_v25, %v498_v29  ;;  %v712_v34 = vmul.f32 %v498_v29, %v498_v29  ;;  %v1108_v35 = vpop.f32.mrb[8].mxu0  ;;  %v1124_v38 = vpop.f32.mrb[8].mxu1  ;;  %v713_v40 = vmul.f32 %v499_v30, %v499_v30 }
 0x136   : > { %v383_v37 = vpop.f32.mrb[9].mxu0  ;;  %v447_v43 = vpop.f32.mrb[9].mxu1 }
 0x137   : > { %v674_v39 = vadd.f32 %v673_v33, %v499_v30  ;;  %v743_v41 = vadd.f32 %v742_v31, %v712_v34  ;;  %v1109_v42 = vpop.f32.mrb[10].mxu0  ;;  %v1125_v47 = vpop.f32.mrb[10].mxu1 }
 0x138   : > { %v483_v45 = vpack.c.bf16 %v1109_v42, %v1108_v35  ;;  %v386_v46 = vpop.f32.mrb[11].mxu0  ;;  %v1458_v51 = vpack.c.bf16 %v1125_v47, %v1124_v38  ;;  %v450_v52 = vpop.f32.mrb[11].mxu1  ;;  %v510_v38 = vunpack.c.l.bf16 %v1441_v3  ;;  %v513_v47 = vunpack.c.h.bf16 %v1438_v1 }
 0x139   : > { %v675_v48 = vadd.f32 %v674_v39, %v500_v32  ;;  %v744_v49 = vadd.f32 %v743_v41, %v713_v40  ;;  %v482_v50 = vpack.c.bf16 %v386_v46, %v383_v37  ;;  %v1461_v54 = vpack.c.bf16 %v450_v52, %v447_v43 }
 0x13a   : > { %1047 = vst [vmem:[%s1436_s26 + $0x28] sm:$0xff] %v483_v45   ;;  %1055 = vst [vmem:[%s1436_s26 + $0x68] sm:$0xff] %v1458_v51   ;;  %v504_v59 = vunpack.c.l.bf16 %v483_v45  ;;  %v505_v0 = vunpack.c.h.bf16 %v483_v45  ;;  %v511_v41 = vunpack.c.h.bf16 %v1441_v3  ;;  %v512_v43 = vunpack.c.l.bf16 %v1438_v1 }
 0x13b   : > { %v745_v55 = vadd.f32 %v744_v49, %v714_v44  ;;  %v502_v56 = vunpack.c.l.bf16 %v482_v50  ;;  %v503_v57 = vunpack.c.h.bf16 %v482_v50  ;;  %1046 = vst [vmem:[%s1436_s26 + $0x20] sm:$0xff] %v482_v50   ;;  %v676_v58 = vadd.f32 %v675_v48, %v501_v36  ;;  %1054 = vst [vmem:[%s1436_s26 + $0x60] sm:$0xff] %v1461_v54  }
 0x13c   : > { %v718_v10 = vmul.f32 %v504_v59, %v504_v59  ;;  %v719_v19 = vmul.f32 %v505_v0, %v505_v0  ;;  %v724_v45 = vmul.f32 %v510_v38, %v510_v38  ;;  %v725_v49 = vmul.f32 %v511_v41, %v511_v41 }
 0x13d   : > { %v677_v60 = vadd.f32 %v676_v58, %v502_v56  ;;  %v716_v61 = vmul.f32 %v502_v56, %v502_v56  ;;  %v746_v62 = vadd.f32 %v745_v55, %v715_v53  ;;  %v1112_v63 = vpop.f32.mrb[12].mxu0  ;;  %v1128_v4 = vpop.f32.mrb[12].mxu1  ;;  %v717_v6 = vmul.f32 %v503_v57, %v503_v57 }
 0x13e   : > { %v399_v2 = vpop.f32.mrb[13].mxu0  ;;  %v463_v9 = vpop.f32.mrb[13].mxu1  ;;  %v726_v52 = vmul.f32 %v512_v43, %v512_v43  ;;  %v514_v56 = vunpack.c.l.bf16 %v1451_v28  ;;  %v515_v3 = vunpack.c.h.bf16 %v1451_v28  ;;  %v517_v1 = vunpack.c.h.bf16 %v1448_v26 }
 0x13f   : > { %v678_v5 = vadd.f32 %v677_v60, %v503_v57  ;;  %v747_v7 = vadd.f32 %v746_v62, %v716_v61  ;;  %v1113_v8 = vpop.f32.mrb[14].mxu0  ;;  %v1129_v13 = vpop.f32.mrb[14].mxu1  ;;  %v727_v57 = vmul.f32 %v513_v47, %v513_v47  ;;  %v516_v60 = vunpack.c.l.bf16 %v1448_v26 }
 0x140   : > { %v485_v11 = vpack.c.bf16 %v1113_v8, %v1112_v63  ;;  %v402_v12 = vpop.f32.mrb[15].mxu0  ;;  %v1468_v17 = vpack.c.bf16 %v1129_v13, %v1128_v4  ;;  %v466_v18 = vpop.f32.mrb[15].mxu1  ;;  %v728_v62 = vmul.f32 %v514_v56, %v514_v56  ;;  %v518_v8 = vunpack.c.l.bf16 %v1461_v54 }
 0x141   : > { %v679_v14 = vadd.f32 %v678_v5, %v504_v59  ;;  %v748_v15 = vadd.f32 %v747_v7, %v717_v6  ;;  %v484_v16 = vpack.c.bf16 %v402_v12, %v399_v2  ;;  %v1471_v20 = vpack.c.bf16 %v466_v18, %v463_v9 }
 0x142   : > { %1049 = vst [vmem:[%s1436_s26 + $0x38] sm:$0xff] %v485_v11   ;;  %1057 = vst [vmem:[%s1436_s26 + $0x78] sm:$0xff] %v1468_v17   ;;  %v508_v25 = vunpack.c.l.bf16 %v485_v11  ;;  %v509_v31 = vunpack.c.h.bf16 %v485_v11  ;;  %v729_v2 = vmul.f32 %v515_v3, %v515_v3  ;;  %v730_v5 = vmul.f32 %v516_v60, %v516_v60 }
 0x143   : > { %v749_v21 = vadd.f32 %v748_v15, %v718_v10  ;;  %v506_v22 = vunpack.c.l.bf16 %v484_v16  ;;  %v507_v23 = vunpack.c.h.bf16 %v484_v16  ;;  %1048 = vst [vmem:[%s1436_s26 + $0x30] sm:$0xff] %v484_v16   ;;  %v680_v24 = vadd.f32 %v679_v14, %v505_v0  ;;  %1056 = vst [vmem:[%s1436_s26 + $0x70] sm:$0xff] %v1471_v20  }
 0x144   : > { %v722_v35 = vmul.f32 %v508_v25, %v508_v25  ;;  %v723_v39 = vmul.f32 %v509_v31, %v509_v31  ;;  %v731_v9 = vmul.f32 %v517_v1, %v517_v1  ;;  %v519_v28 = vunpack.c.h.bf16 %v1461_v54 }
 0x145   : > { %v681_v27 = vadd.f32 %v680_v24, %v506_v22  ;;  %v720_v29 = vmul.f32 %v506_v22, %v506_v22  ;;  %v750_v30 = vadd.f32 %v749_v21, %v719_v19  ;;  %v721_v33 = vmul.f32 %v507_v23, %v507_v23 }
 0x146   : > { %v520_v12 = vunpack.c.l.bf16 %v1458_v51  ;;  %v732_v14 = vmul.f32 %v518_v8, %v518_v8  ;;  %v521_v26 = vunpack.c.h.bf16 %v1458_v51  ;;  %v733_v18 = vmul.f32 %v519_v28, %v519_v28 }
 0x147   : > { %v682_v32 = vadd.f32 %v681_v27, %v507_v23  ;;  %v751_v34 = vadd.f32 %v750_v30, %v720_v29  ;;  %v522_v24 = vunpack.c.l.bf16 %v1471_v20  ;;  %v523_v54 = vunpack.c.h.bf16 %v1471_v20 }
 0x148   : > { %v734_v21 = vmul.f32 %v520_v12, %v520_v12  ;;  %v524_v30 = vunpack.c.l.bf16 %v1468_v17 }
 0x149   : > { %v683_v36 = vadd.f32 %v682_v32, %v508_v25  ;;  %v752_v37 = vadd.f32 %v751_v34, %v721_v33  ;;  %v735_v25 = vmul.f32 %v521_v26, %v521_v26  ;;  %v736_v32 = vmul.f32 %v522_v24, %v522_v24 }
 0x14a   : > { %v525_v33 = vunpack.c.h.bf16 %v1468_v17 }
 0x14b   : > { %v753_v40 = vadd.f32 %v752_v37, %v722_v35  ;;  %v684_v42 = vadd.f32 %v683_v36, %v509_v31  ;;  %v737_v35 = vmul.f32 %v523_v54, %v523_v54  ;;  %v738_v37 = vmul.f32 %v524_v30, %v524_v30 }
 0x14d   : > { %v685_v44 = vadd.f32 %v684_v42, %v510_v38  ;;  %v754_v46 = vadd.f32 %v753_v40, %v723_v39  ;;  %v739_v40 = vmul.f32 %v525_v33, %v525_v33 }
 0x14f   : > { %v686_v48 = vadd.f32 %v685_v44, %v511_v41  ;;  %v755_v50 = vadd.f32 %v754_v46, %v724_v45 }
 0x151   : > { %v687_v53 = vadd.f32 %v686_v48, %v512_v43  ;;  %v756_v55 = vadd.f32 %v755_v50, %v725_v49 }
 0x153   : > { %v757_v58 = vadd.f32 %v756_v55, %v726_v52  ;;  %v688_v59 = vadd.f32 %v687_v53, %v513_v47 }
 0x155   : > { %v689_v61 = vadd.f32 %v688_v59, %v514_v56  ;;  %v758_v63 = vadd.f32 %v757_v58, %v727_v57 }
 0x157   : > { %v690_v0 = vadd.f32 %v689_v61, %v515_v3  ;;  %v759_v4 = vadd.f32 %v758_v63, %v728_v62 }
 0x159   : > { %v691_v6 = vadd.f32 %v690_v0, %v516_v60  ;;  %v760_v7 = vadd.f32 %v759_v4, %v729_v2 }
 0x15b   : > { %v761_v10 = vadd.f32 %v760_v7, %v730_v5  ;;  %v692_v11 = vadd.f32 %v691_v6, %v517_v1 }
 0x15d   : > { %v693_v13 = vadd.f32 %v692_v11, %v518_v8  ;;  %v762_v15 = vadd.f32 %v761_v10, %v731_v9 }
 0x15f   : > { %v694_v16 = vadd.f32 %v693_v13, %v519_v28  ;;  %v763_v19 = vadd.f32 %v762_v15, %v732_v14 }
 0x161   : > { %v695_v22 = vadd.f32 %v694_v16, %v520_v12  ;;  %v764_v23 = vadd.f32 %v763_v19, %v733_v18 }
 0x163   : > { %v765_v27 = vadd.f32 %v764_v23, %v734_v21  ;;  %v696_v29 = vadd.f32 %v695_v22, %v521_v26 }
 0x165   : > { %v697_v31 = vadd.f32 %v696_v29, %v522_v24  ;;  %v766_v51 = vadd.f32 %v765_v27, %v735_v25 }
 0x167   : > { %v698_v34 = vadd.f32 %v697_v31, %v523_v54  ;;  %v767_v36 = vadd.f32 %v766_v51, %v736_v32 }
 0x169   : > { %v699_v38 = vadd.f32 %v698_v34, %v524_v30  ;;  %v768_v39 = vadd.f32 %v767_v36, %v737_v35 }
 0x16b   : > { %v700_v41 = vadd.f32 %v699_v38, %v525_v33  ;;  %v769_v42 = vadd.f32 %v768_v39, %v738_v37 }
 0x16d   : > { %v701_v20 = vrot.slane %v700_v41, 4  ;;  %v770_v43 = vadd.f32 %v769_v42, %v739_v40 }
 0x16f   : > { %v702_v44 = vadd.f32 %v701_v20, %v700_v41  ;;  %v771_v45 = vrot.slane %v770_v43, 4 }
 0x171   : > { %v703_v46 = vrot.slane %v702_v44, 2  ;;  %v772_v47 = vadd.f32 %v771_v45, %v770_v43 }
 0x173   : > { %v704_v48 = vadd.f32 %v703_v46, %v702_v44  ;;  %v773_v17 = vrot.slane %v772_v47, 2 }
 0x175   : > { %v705_v49 = vrot.slane %v704_v48, 1  ;;  %v774_v50 = vadd.f32 %v773_v17, %v772_v47 }
 0x177   : > { %v706_v52 = vadd.f32 %v705_v49, %v704_v48  ;;  %v775_v53 = vrot.slane %v774_v50, 1 }
 0x179   : > { %707 = vst [vmem:[%s203_s15] sm:$0x1] %v706_v52  ;;  %v776_v55 = vadd.f32 %v775_v53, %v774_v50 }
 0x17b   : > { %777 = vst [vmem:[%s203_s15 + $0x1] sm:$0x1] %v776_v55 }
 0x17c PF: > { %p14_p9 = scmp.ge.s32.totalorder %s1306_s17, 4   ;;  %s1519_s12 = smov %s1251_s13 }
 0x17d   : > { %s1520_s13 = smov %s1255_s14  ;;  %s1521_s14 = smov %s1316_s20 }
 0x17e   : > { %s1522_s15 = smov %s1306_s17  ;;  %16 = sbr.rel (!%p14_p9) target bundleno = 3 (0x3), region = 80 }
 0x185   :  { %814 = vsyncpa [#allocation3], 1 }
 0x186   :  { %816 = vsyncpa [#allocation3 + $0x1], 1 }

// kernel: bottleneck_forward.7
= control target key start
LH: loop header
LB: loop body
LE: loop exit
PB: predicated region body
PF: predicated region fallthrough
CT: control target
= control target key end

     0   :  { %9 = vsyncpa [#allocation3], 0  ;;  %s1081_s0 = inlined_call_operand.vmem [shape: bf16[512,128], index: 0, kind: input, shape index: {}]   ;;  %s1082_s1 = inlined_call_operand.vmem [shape: f32[512,128], index: 1, kind: input, shape index: {}]   ;;  %s1083_s2 = inlined_call_operand.vmem [shape: f32[1,128], index: 2, kind: input, shape index: {}]   ;;  %s1084_s3 = inlined_call_operand.vmem [shape: f32[1,128], index: 3, kind: input, shape index: {}]   ;;  %s1085_s4 = inlined_call_operand.hbm [shape: f32[512,128], index: 4, kind: output, shape index: {}]  }
   0x1   :  { %11 = vsyncpa [#allocation3 + $0x1], 0  ;;  %s808_s15 = smov 0   ;;  %s810_s16 = smov 0  }
   0x2   :  { %s812_s17 = smov 0   ;;  %s814_s18 = smov 0  }
   0x3 LB: > { %s829_s19 = sadd.s32 4294967295, %s778_s18   ;;  %s579_s20 = sadd.s32 4294967294, %s778_s18   ;;  %s778_s18 = sphi %s814_s18, %s1091_s18   ;;  %s774_s17 = sphi %s812_s17, %s1090_s17   ;;  %s770_s16 = sphi %s810_s16, %s1089_s16   ;;  %s766_s15 = sphi %s808_s15, %s1088_s15  }
   0x4   : > { %s833_s21 = sadd.s32 1, %s778_s18   ;;  %s118_s22 = sadd.s32 1, %s774_s17 }
   0x5   : > { %s115_s23 = ssub.s32 %s778_s18, %s833_s21  ;;  %p128_p0 = scmp.ne.s32.totalorder %s774_s17, %s770_s16 }
   0x6   : > { %p116_p1 = scmp.eq.s32.totalorder %s115_s23, 0  ;;  %p129_p2 = scmp.eq.s32.totalorder %s829_s19, 1 }
   0x7   : > { %p134_p3 = scmp.ne.s32.totalorder %s770_s16, %s766_s15  ;;  %p135_p4 = scmp.eq.s32.totalorder %s579_s20, 1 }
   0x8   : > { %s844_s24 = scalar_select %p116_p1, %s774_s17, %s118_s22  }
   0x9   : > { %p846_p5 = por %p129_p2, %p128_p0  ;;  %p850_p6 = por %p135_p4, %p134_p3 }
   0xa   : > { %p582_p7 = scmp.ge.s32.totalorder %s778_s18, 1  ;;  %p177_p8 = scmp.lt.s32.totalorder %s778_s18, 3 }
   0xc   : > { %p178_p9 = pnand %p582_p7, %p177_p8 }
   0xd   : > { %s584_s27 = sshll.u32 (!%p178_p9), %s829_s19, 5  ;;  %v866_v1 = vld [vmem:[%s1083_s2] ss:$0 sm:$0xff] (!%p178_p9)  ;;  %s205_s12 = sand.u32 (!%p178_p9), 1, %s770_s16  }
   0xe   : > { %181 = sbr.rel (%p178_p9) target bundleno = 82 (0x52), region = 36  ;;  %p209_p10 = scmp.lt.s32.totalorder (!%p178_p9), %s584_s27, 63  ;;  %v878_v5 = vld [vmem:[%s1084_s3] ss:$0 sm:$0xff] (!%p178_p9) }
   0xf   : > { %s890_s20 = sshll.u32 (!%p178_p9), %s205_s12, 8  ;;  %s595_s23 = sshll.u32 (!%p178_p9), %s829_s19, 12 }
  0x10   : > { %s914_s22 = scalar_lea.vmem (!%p178_p9), [#allocation2], %s890_s20  ;;  %s1040_s30 = scalar_lea.sflag (!%p178_p9), [#allocation3], %s205_s12 }
  0x15   : > { %s1093_s27 = smov (!%p209_p10, %s584_s27), 63 }
  0x16   : > { %s585_s28 = sshll.u32 %s1093_s27, 2  ;;  %s587_s29 = sshll.u32 %s1093_s27, 3 }
  0x17   : > { %s860_s6 = scalar_lea.vmem %s1081_s0, %s585_s28  ;;  %s871_s11 = scalar_lea.vmem %s1082_s1, %s587_s29 }
  0x18   : > { %v597_v0 = vld [vmem:[%s860_s6] sm:$0xff]   ;;  %v660_v4 = vld [vmem:[%s860_s6 + $0x8] sm:$0xff]   ;;  %v661_v8 = vld [vmem:[%s860_s6 + $0x10] sm:$0xff]   ;;  %s505_s27 = sshll.u32 %s914_s22, 4  ;;  %s1028_s29 = scalar_lea.hbm %s1085_s4, %s595_s23  ;;  %s1030_s27 = int_to_ptr.vmem [resolvable:$true] %s505_s27 }
  0x19   : > { %v598_v2 = vunpack.c.l.bf16 %v597_v0  ;;  %v599_v3 = vunpack.c.h.bf16 %v597_v0  ;;  %v602_v6 = vunpack.c.l.bf16 %v660_v4  ;;  %v603_v7 = vunpack.c.h.bf16 %v660_v4  ;;  %v662_v13 = vld [vmem:[%s860_s6 + $0x18] sm:$0xff]   ;;  %v363_v14 = vld [vmem:[%s871_s11] sm:$0xff]  ;;  %v364_v15 = vld [vmem:[%s871_s11 + $0x8] sm:$0xff]  ;;  %s716_s5 = scalar_lea.vmem %s1030_s27, 4096 }
  0x1a   : > { %v606_v11 = vunpack.c.l.bf16 %v661_v8  ;;  %v607_v12 = vunpack.c.h.bf16 %v661_v8  ;;  %v610_v18 = vunpack.c.l.bf16 %v662_v13  ;;  %v611_v19 = vunpack.c.h.bf16 %v662_v13  ;;  %v365_v22 = vld [vmem:[%s871_s11 + $0x10] sm:$0xff]  ;;  %v366_v23 = vld [vmem:[%s871_s11 + $0x18] sm:$0xff]  ;;  %v367_v28 = vld [vmem:[%s871_s11 + $0x20] sm:$0xff]  ;;  %p717_p11 = scmp.ne.s32.totalorder %s1030_s27, %s716_s5 }
  0x1b   : > { %v292_v9 = vmul.f32 %v598_v2, %v866_v1  ;;  %v293_v10 = vmul.f32 %v599_v3, %v866_v1  ;;  %v294_v16 = vmul.f32 %v602_v6, %v866_v1  ;;  %v295_v17 = vmul.f32 %v603_v7, %v866_v1  ;;  %v368_v29 = vld [vmem:[%s871_s11 + $0x28] sm:$0xff]  ;;  %v369_v36 = vld [vmem:[%s871_s11 + $0x30] sm:$0xff]  ;;  %v370_v37 = vld [vmem:[%s871_s11 + $0x38] sm:$0xff] }
  0x1c   : > { %v296_v24 = vmul.f32 %v606_v11, %v866_v1  ;;  %v297_v25 = vmul.f32 %v607_v12, %v866_v1  ;;  %v298_v30 = vmul.f32 %v610_v18, %v866_v1  ;;  %v299_v31 = vmul.f32 %v611_v19, %v866_v1  ;;  %v663_v42 = vld [vmem:[%s860_s6 + $0x20] sm:$0xff]   ;;  %v664_v47 = vld [vmem:[%s860_s6 + $0x28] sm:$0xff]   ;;  %v665_v52 = vld [vmem:[%s860_s6 + $0x30] sm:$0xff]   ;;  %p718_p12 = pnand %p717_p11, %p846_p5 }
  0x1d   : > { %v331_v20 = vadd.f32 %v878_v5, %v292_v9  ;;  %v332_v21 = vadd.f32 %v878_v5, %v293_v10  ;;  %v333_v26 = vadd.f32 %v878_v5, %v294_v16  ;;  %v334_v27 = vadd.f32 %v878_v5, %v295_v17  ;;  %v666_v57 = vld [vmem:[%s860_s6 + $0x38] sm:$0xff]   ;;  %v371_v3 = vld [vmem:[%s871_s11 + $0x40] sm:$0xff]  ;;  %v372_v4 = vld [vmem:[%s871_s11 + $0x48] sm:$0xff] }
  0x1e   : > { %v335_v34 = vadd.f32 %v878_v5, %v296_v24  ;;  %v336_v35 = vadd.f32 %v878_v5, %v297_v25  ;;  %v337_v40 = vadd.f32 %v878_v5, %v298_v30  ;;  %v338_v41 = vadd.f32 %v878_v5, %v299_v31  ;;  %v373_v12 = vld [vmem:[%s871_s11 + $0x50] sm:$0xff]  ;;  %v374_v13 = vld [vmem:[%s871_s11 + $0x58] sm:$0xff]  ;;  %v375_v18 = vld [vmem:[%s871_s11 + $0x60] sm:$0xff]  ;;  %p719_p13 = pneg %p718_p12 }
  0x1f   : > { %v395_v32 = vadd.f32 %v363_v14, %v331_v20  ;;  %v396_v33 = vadd.f32 %v364_v15, %v332_v21  ;;  %v397_v38 = vadd.f32 %v365_v22, %v333_v26  ;;  %v398_v39 = vadd.f32 %v366_v23, %v334_v27  ;;  %v376_v19 = vld [vmem:[%s871_s11 + $0x68] sm:$0xff]  ;;  %v377_v26 = vld [vmem:[%s871_s11 + $0x70] sm:$0xff]  ;;  %v378_v27 = vld [vmem:[%s871_s11 + $0x78] sm:$0xff] }
  0x20   : > { %v399_v45 = vadd.f32 %v367_v28, %v335_v34  ;;  %v400_v46 = vadd.f32 %v368_v29, %v336_v35  ;;  %v401_v50 = vadd.f32 %v369_v36, %v337_v40  ;;  %v402_v51 = vadd.f32 %v370_v37, %v338_v41  ;;  %v668_v37 = vld [vmem:[%s860_s6 + $0x48] sm:$0xff]  }
  0x21   : > { %v427_v43 = vmax.f32 %v395_v32, 0.0  ;;  %v428_v44 = vmax.f32 %v396_v33, 0.0  ;;  %v429_v48 = vmax.f32 %v397_v38, 0.0  ;;  %v430_v49 = vmax.f32 %v398_v39, 0.0  ;;  %v667_v32 = vld [vmem:[%s860_s6 + $0x40] sm:$0xff]  }
  0x22   : > { %v431_v53 = vmax.f32 %v399_v45, 0.0  ;;  %v432_v54 = vmax.f32 %v400_v46, 0.0  ;;  %v614_v55 = vunpack.c.l.bf16 %v663_v42  ;;  %v615_v56 = vunpack.c.h.bf16 %v663_v42  ;;  %v669_v42 = vld [vmem:[%s860_s6 + $0x50] sm:$0xff]  }
  0x23   : > { %459 = vst [vmem:[%s914_s22] sm:$0xff] %v427_v43  ;;  %460 = vst [vmem:[%s914_s22 + $0x8] sm:$0xff] %v428_v44  ;;  %v433_v58 = vmax.f32 %v401_v50, 0.0  ;;  %v434_v59 = vmax.f32 %v402_v51, 0.0  ;;  %v618_v60 = vunpack.c.l.bf16 %v664_v47  ;;  %v619_v61 = vunpack.c.h.bf16 %v664_v47  ;;  %v670_v47 = vld [vmem:[%s860_s6 + $0x58] sm:$0xff]  }
  0x24   : > { %461 = vst [vmem:[%s914_s22 + $0x10] sm:$0xff] %v429_v48  ;;  %462 = vst [vmem:[%s914_s22 + $0x18] sm:$0xff] %v430_v49  ;;  %v300_v62 = vmul.f32 %v614_v55, %v866_v1  ;;  %v301_v63 = vmul.f32 %v615_v56, %v866_v1  ;;  %v622_v0 = vunpack.c.l.bf16 %v665_v52  ;;  %v623_v2 = vunpack.c.h.bf16 %v665_v52  ;;  %v379_v56 = vld [vmem:[%s871_s11 + $0x80] sm:$0xff] }
  0x25   : > { %463 = vst [vmem:[%s914_s22 + $0x20] sm:$0xff] %v431_v53  ;;  %464 = vst [vmem:[%s914_s22 + $0x28] sm:$0xff] %v432_v54  ;;  %v302_v6 = vmul.f32 %v618_v60, %v866_v1  ;;  %v303_v7 = vmul.f32 %v619_v61, %v866_v1  ;;  %v626_v8 = vunpack.c.l.bf16 %v666_v57  ;;  %v627_v9 = vunpack.c.h.bf16 %v666_v57  ;;  %v380_v57 = vld [vmem:[%s871_s11 + $0x88] sm:$0xff] }
  0x26   : > { %465 = vst [vmem:[%s914_s22 + $0x30] sm:$0xff] %v433_v58  ;;  %466 = vst [vmem:[%s914_s22 + $0x38] sm:$0xff] %v434_v59  ;;  %v339_v10 = vadd.f32 %v878_v5, %v300_v62  ;;  %v340_v11 = vadd.f32 %v878_v5, %v301_v63  ;;  %v304_v14 = vmul.f32 %v622_v0, %v866_v1  ;;  %v630_v45 = vunpack.c.l.bf16 %v667_v32  ;;  %v381_v0 = vld [vmem:[%s871_s11 + $0x90] sm:$0xff] }
  0x27   : > { %v305_v15 = vmul.f32 %v623_v2, %v866_v1  ;;  %v341_v16 = vadd.f32 %v878_v5, %v302_v6  ;;  %v342_v17 = vadd.f32 %v878_v5, %v303_v7  ;;  %v306_v20 = vmul.f32 %v626_v8, %v866_v1  ;;  %v382_v2 = vld [vmem:[%s871_s11 + $0x98] sm:$0xff]  ;;  %v383_v8 = vld [vmem:[%s871_s11 + $0xa0] sm:$0xff] }
  0x28   : > { %v307_v21 = vmul.f32 %v627_v9, %v866_v1  ;;  %v403_v22 = vadd.f32 %v371_v3, %v339_v10  ;;  %v404_v23 = vadd.f32 %v372_v4, %v340_v11  ;;  %v343_v24 = vadd.f32 %v878_v5, %v304_v14  ;;  %v384_v9 = vld [vmem:[%s871_s11 + $0xa8] sm:$0xff] }
  0x29   : > { %v344_v25 = vadd.f32 %v878_v5, %v305_v15  ;;  %v405_v28 = vadd.f32 %v373_v12, %v341_v16  ;;  %v406_v29 = vadd.f32 %v374_v13, %v342_v17  ;;  %v345_v30 = vadd.f32 %v878_v5, %v306_v20  ;;  %v385_v16 = vld [vmem:[%s871_s11 + $0xb0] sm:$0xff]  ;;  %v386_v17 = vld [vmem:[%s871_s11 + $0xb8] sm:$0xff] }
  0x2a   : > { %v346_v31 = vadd.f32 %v878_v5, %v307_v21  ;;  %v435_v33 = vmax.f32 %v403_v22, 0.0  ;;  %v436_v34 = vmax.f32 %v404_v23, 0.0  ;;  %v407_v35 = vadd.f32 %v375_v18, %v343_v24  ;;  %v671_v22 = vld [vmem:[%s860_s6 + $0x60] sm:$0xff]  }
  0x2b   : > { %v408_v36 = vadd.f32 %v376_v19, %v344_v25  ;;  %v437_v38 = vmax.f32 %v405_v28, 0.0  ;;  %v438_v39 = vmax.f32 %v406_v29, 0.0  ;;  %v409_v40 = vadd.f32 %v377_v26, %v345_v30 }
  0x2c   : > { %v410_v41 = vadd.f32 %v378_v27, %v346_v31  ;;  %467 = vst [vmem:[%s914_s22 + $0x40] sm:$0xff] %v435_v33  ;;  %468 = vst [vmem:[%s914_s22 + $0x48] sm:$0xff] %v436_v34  ;;  %v439_v43 = vmax.f32 %v407_v35, 0.0  ;;  %v631_v46 = vunpack.c.h.bf16 %v667_v32  ;;  %v634_v50 = vunpack.c.l.bf16 %v668_v37  ;;  %v672_v27 = vld [vmem:[%s860_s6 + $0x68] sm:$0xff]   ;;  %v673_v32 = vld [vmem:[%s860_s6 + $0x70] sm:$0xff]  }
  0x2d   : > { %v440_v44 = vmax.f32 %v408_v36, 0.0  ;;  %469 = vst [vmem:[%s914_s22 + $0x50] sm:$0xff] %v437_v38  ;;  %470 = vst [vmem:[%s914_s22 + $0x58] sm:$0xff] %v438_v39  ;;  %v441_v48 = vmax.f32 %v409_v40, 0.0  ;;  %v635_v51 = vunpack.c.h.bf16 %v668_v37  ;;  %v308_v52 = vmul.f32 %v630_v45, %v866_v1  ;;  %v674_v37 = vld [vmem:[%s860_s6 + $0x78] sm:$0xff]   ;;  %s780_s6 = smov [#allocation2]  }
  0x2e   : > { %v442_v49 = vmax.f32 %v410_v41, 0.0  ;;  %471 = vst [vmem:[%s914_s22 + $0x60] sm:$0xff] %v439_v43  ;;  %v309_v53 = vmul.f32 %v631_v46, %v866_v1  ;;  %v638_v54 = vunpack.c.l.bf16 %v669_v42  ;;  %v639_v55 = vunpack.c.h.bf16 %v669_v42  ;;  %v387_v46 = vld [vmem:[%s871_s11 + $0xc0] sm:$0xff]  ;;  %s720_s7 = sshll.u32 %s780_s6, 4  ;;  %s721_s7 = int_to_ptr.vmem [resolvable:$false] %s720_s7 }
  0x2f   : > { %472 = vst [vmem:[%s914_s22 + $0x68] sm:$0xff] %v440_v44  ;;  %473 = vst [vmem:[%s914_s22 + $0x70] sm:$0xff] %v441_v48  ;;  %v310_v58 = vmul.f32 %v634_v50, %v866_v1  ;;  %v311_v59 = vmul.f32 %v635_v51, %v866_v1  ;;  %v642_v60 = vunpack.c.l.bf16 %v670_v47  ;;  %v643_v61 = vunpack.c.h.bf16 %v670_v47  ;;  %v388_v47 = vld [vmem:[%s871_s11 + $0xc8] sm:$0xff]  ;;  %s722_s8 = scalar_lea.vmem %s721_s7, 8192  ;;  %p723_p0 = scmp.lt.s32.totalorder %s1030_s27, %s721_s7 }
  0x30   : > { %474 = vst [vmem:[%s914_s22 + $0x78] sm:$0xff] %v442_v49  ;;  %v347_v62 = vadd.f32 %v878_v5, %v308_v52  ;;  %v348_v63 = vadd.f32 %v878_v5, %v309_v53  ;;  %v312_v3 = vmul.f32 %v638_v54, %v866_v1  ;;  %v313_v4 = vmul.f32 %v639_v55, %v866_v1  ;;  %v389_v54 = vld [vmem:[%s871_s11 + $0xd0] sm:$0xff]  ;;  %v390_v55 = vld [vmem:[%s871_s11 + $0xd8] sm:$0xff]  ;;  %p724_p1 = scmp.lt.s32.totalorder %s722_s8, %s716_s5 }
  0x31   : > { %v349_v6 = vadd.f32 %v878_v5, %v310_v58  ;;  %v350_v7 = vadd.f32 %v878_v5, %v311_v59  ;;  %v314_v10 = vmul.f32 %v642_v60, %v866_v1  ;;  %v315_v11 = vmul.f32 %v643_v61, %v866_v1  ;;  %v391_v60 = vld [vmem:[%s871_s11 + $0xe0] sm:$0xff]  ;;  %v392_v61 = vld [vmem:[%s871_s11 + $0xe8] sm:$0xff] }
  0x32   : > { %v411_v12 = vadd.f32 %v379_v56, %v347_v62  ;;  %v412_v13 = vadd.f32 %v380_v57, %v348_v63  ;;  %v351_v14 = vadd.f32 %v878_v5, %v312_v3  ;;  %v352_v15 = vadd.f32 %v878_v5, %v313_v4  ;;  %p725_p2 = por %p724_p1, %p723_p0 }
  0x33   : > { %v413_v18 = vadd.f32 %v381_v0, %v349_v6  ;;  %v414_v19 = vadd.f32 %v382_v2, %v350_v7  ;;  %v353_v20 = vadd.f32 %v878_v5, %v314_v10  ;;  %v354_v21 = vadd.f32 %v878_v5, %v315_v11  ;;  %v393_v6 = vld [vmem:[%s871_s11 + $0xf0] sm:$0xff]  ;;  %v394_v7 = vld [vmem:[%s871_s11 + $0xf8] sm:$0xff] }
  0x34   : > { %v443_v23 = vmax.f32 %v411_v12, 0.0  ;;  %v444_v24 = vmax.f32 %v412_v13, 0.0  ;;  %v415_v25 = vadd.f32 %v383_v8, %v351_v14  ;;  %v416_v26 = vadd.f32 %v384_v9, %v352_v15  ;;  %p726_p3 = pnand %p725_p2, %p719_p13 }
  0x35   : > { %v445_v28 = vmax.f32 %v413_v18, 0.0  ;;  %v446_v29 = vmax.f32 %v414_v19, 0.0  ;;  %v417_v30 = vadd.f32 %v385_v16, %v353_v20  ;;  %v418_v31 = vadd.f32 %v386_v17, %v354_v21 }
  0x36   : > { %475 = vst [vmem:[%s914_s22 + $0x80] sm:$0xff] %v443_v23  ;;  %476 = vst [vmem:[%s914_s22 + $0x88] sm:$0xff] %v444_v24  ;;  %v447_v33 = vmax.f32 %v415_v25, 0.0  ;;  %v448_v34 = vmax.f32 %v416_v26, 0.0  ;;  %v646_v35 = vunpack.c.l.bf16 %v671_v22  ;;  %v647_v36 = vunpack.c.h.bf16 %v671_v22 }
  0x37   : > { %477 = vst [vmem:[%s914_s22 + $0x90] sm:$0xff] %v445_v28  ;;  %478 = vst [vmem:[%s914_s22 + $0x98] sm:$0xff] %v446_v29  ;;  %v449_v38 = vmax.f32 %v417_v30, 0.0  ;;  %v450_v39 = vmax.f32 %v418_v31, 0.0  ;;  %v650_v40 = vunpack.c.l.bf16 %v672_v27  ;;  %v651_v41 = vunpack.c.h.bf16 %v672_v27 }
  0x38   : > { %479 = vst [vmem:[%s914_s22 + $0xa0] sm:$0xff] %v447_v33  ;;  %480 = vst [vmem:[%s914_s22 + $0xa8] sm:$0xff] %v448_v34  ;;  %v316_v42 = vmul.f32 %v646_v35, %v866_v1  ;;  %v317_v43 = vmul.f32 %v647_v36, %v866_v1  ;;  %v654_v44 = vunpack.c.l.bf16 %v673_v32  ;;  %v655_v45 = vunpack.c.h.bf16 %v673_v32 }
  0x39   : > { %481 = vst [vmem:[%s914_s22 + $0xb0] sm:$0xff] %v449_v38  ;;  %482 = vst [vmem:[%s914_s22 + $0xb8] sm:$0xff] %v450_v39  ;;  %v318_v48 = vmul.f32 %v650_v40, %v866_v1  ;;  %v319_v49 = vmul.f32 %v651_v41, %v866_v1  ;;  %v658_v50 = vunpack.c.l.bf16 %v674_v37  ;;  %v659_v51 = vunpack.c.h.bf16 %v674_v37 }
  0x3a   : > { %v355_v52 = vadd.f32 %v878_v5, %v316_v42  ;;  %v356_v53 = vadd.f32 %v878_v5, %v317_v43  ;;  %v320_v56 = vmul.f32 %v654_v44, %v866_v1  ;;  %v321_v57 = vmul.f32 %v655_v45, %v866_v1 }
  0x3b   : > { %v357_v58 = vadd.f32 %v878_v5, %v318_v48  ;;  %v358_v59 = vadd.f32 %v878_v5, %v319_v49  ;;  %v322_v62 = vmul.f32 %v658_v50, %v866_v1  ;;  %v323_v63 = vmul.f32 %v659_v51, %v866_v1 }
  0x3c   : > { %v419_v0 = vadd.f32 %v387_v46, %v355_v52  ;;  %v420_v2 = vadd.f32 %v388_v47, %v356_v53  ;;  %v359_v3 = vadd.f32 %v878_v5, %v320_v56  ;;  %v360_v4 = vadd.f32 %v878_v5, %v321_v57 }
  0x3d   : > { %v421_v8 = vadd.f32 %v389_v54, %v357_v58  ;;  %v422_v9 = vadd.f32 %v390_v55, %v358_v59  ;;  %v361_v10 = vadd.f32 %v878_v5, %v322_v62  ;;  %v362_v11 = vadd.f32 %v878_v5, %v323_v63 }
  0x3e   : > { %v451_v1 = vmax.f32 %v419_v0, 0.0  ;;  %v452_v12 = vmax.f32 %v420_v2, 0.0  ;;  %v423_v13 = vadd.f32 %v391_v60, %v359_v3  ;;  %v424_v14 = vadd.f32 %v392_v61, %v360_v4 }
  0x3f   : > { %v453_v15 = vmax.f32 %v421_v8, 0.0  ;;  %v454_v16 = vmax.f32 %v422_v9, 0.0  ;;  %v425_v17 = vadd.f32 %v393_v6, %v361_v10  ;;  %v426_v18 = vadd.f32 %v394_v7, %v362_v11 }
  0x40   : > { %483 = vst [vmem:[%s914_s22 + $0xc0] sm:$0xff] %v451_v1  ;;  %484 = vst [vmem:[%s914_s22 + $0xc8] sm:$0xff] %v452_v12  ;;  %v455_v5 = vmax.f32 %v423_v13, 0.0  ;;  %v456_v19 = vmax.f32 %v424_v14, 0.0 }
  0x41   : > { %485 = vst [vmem:[%s914_s22 + $0xd0] sm:$0xff] %v453_v15  ;;  %486 = vst [vmem:[%s914_s22 + $0xd8] sm:$0xff] %v454_v16  ;;  %v457_v20 = vmax.f32 %v425_v17, 0.0  ;;  %v458_v21 = vmax.f32 %v426_v18, 0.0 }
  0x42   : > { %487 = vst [vmem:[%s914_s22 + $0xe0] sm:$0xff] %v455_v5  ;;  %488 = vst [vmem:[%s914_s22 + $0xe8] sm:$0xff] %v456_v19 }
  0x43   : > { %489 = vst [vmem:[%s914_s22 + $0xf0] sm:$0xff] %v457_v20  ;;  %490 = vst [vmem:[%s914_s22 + $0xf8] sm:$0xff] %v458_v21 }
  0x44   : > { %729 = shalt.err (!%p726_p3)
}
  0x45   : > { %s730_s9 = scalar_lea.hbm %s1028_s29, 4096  ;;  %s734_s12 = scalar_lea.hbm %s1085_s4, 8192 }
  0x46   : > { %p731_p4 = scmp.ne.s32.totalorder %s1028_s29, %s730_s9  ;;  %p735_p9 = scmp.lt.u32.totalorder %s1028_s29, %s1085_s4 }
  0x47   : > { %p736_p10 = scmp.lt.u32.totalorder %s734_s12, %s730_s9  ;;  %p738_p12 = scmp.lt.u32.totalorder %s730_s9, %s1028_s29 }
  0x48   : > { %p732_p7 = pnand %p731_p4, %p846_p5 }
  0x49   : > { %p737_p11 = por %p736_p10, %p735_p9 }
  0x4a   : > { %p733_p8 = pneg %p732_p7 }
  0x4b   : > { %p739_p13 = por %p738_p12, %p737_p11 }
  0x4d   : > { %p740_p0 = pnand %p739_p13, %p733_p8 }
  0x4f   : > { %743 = shalt.err (!%p740_p0)
}
  0x50   : > { %s781_s20 = smov 128   ;;  %s782_s22 = smov 8  }
  0x51   : > { %675 = dma.vmem_to_hbm [thread:$0]  (%p846_p5), %s1030_s27, 4096, %s1028_s29, %s1040_s30, %s781_s20, %s781_s20, %s782_s22  }
  0x52 PF: > { %p681_p1 = scmp.ge.s32.totalorder %s778_s18, 2  ;;  %s520_s23 = sand.u32 1, %s766_s15  }
  0x53   : > { %s521_s19 = scalar_lea.sflag [#allocation3], %s520_s23 }
  0x54   : > { %p678_p2 = pnand %p681_p1, %p850_p6 }
  0x56   : > { %761 = dma.done.wait (!%p678_p2), %s521_s19, 4096  }
  0x57   : > { %763 = vsyncadd (!%p678_p2), %s521_s19, 4294963200  ;;  %p14_p3 = scmp.ge.s32.totalorder %s833_s21, 4   ;;  %s1088_s15 = smov %s770_s16 }
  0x58   : > { %s1089_s16 = smov %s774_s17  ;;  %s1090_s17 = smov %s844_s24 }
  0x59   : > { %s1091_s18 = smov %s833_s21  ;;  %16 = sbr.rel (!%p14_p3) target bundleno = 3 (0x3), region = 74 }
  0x60   :  { %526 = vsyncpa [#allocation3], 1 }
  0x61   :  { %528 = vsyncpa [#allocation3 + $0x1], 1 }

// kernel: bottleneck_forward.6
= control target key start
LH: loop header
LB: loop body
LE: loop exit
PB: predicated region body
PF: predicated region fallthrough
CT: control target
= control target key end

     0   :  { %s1444_s18 = smov 0   ;;  %s1675_s0 = inlined_call_operand.vmem [shape: bf16[512,128], index: 0, kind: input, shape index: {}]   ;;  %s1676_s1 = inlined_call_operand.vmem [shape: f32[1,128], index: 1, kind: input, shape index: {}]   ;;  %s1677_s2 = inlined_call_operand.vmem [shape: f32[1,128], index: 2, kind: input, shape index: {}]   ;;  %s1678_s3 = inlined_call_operand.vmem [shape: bf16[128,128], index: 3, kind: input, shape index: {}]   ;;  %s1679_s4 = inlined_call_operand.vmem [shape: bf16[512,128], index: 4, kind: output, shape index: {0}]   ;;  %s1680_s5 = inlined_call_operand.vmem [shape: f32[2,2,128], index: 5, kind: output, shape index: {1}]  }
   0x1 LB: > { %s1450_s19 = sadd.s32 4294967295, %s1412_s18   ;;  %p1046_p0 = scmp.ge.s32.totalorder %s1412_s18, 1  ;;  %s1412_s18 = sphi %s1444_s18, %s16_s18  }
   0x2   : > { %p191_p1 = scmp.lt.s32.totalorder %s1412_s18, 3 }
   0x4   : > { %p192_p2 = pnand %p1046_p0, %p191_p1 }
   0x5   : > { %v1398_v0 = vld [vmem:[%s1678_s3] sm:$0xff] (!%p192_p2)   ;;  %s1047_s22 = sshll.u32 (!%p192_p2), %s1450_s19, 5  ;;  %v1399_v1 = vld [vmem:[%s1678_s3 + $0x8] sm:$0xff] (!%p192_p2)   ;;  %v1400_v2 = vld [vmem:[%s1678_s3 + $0x10] sm:$0xff] (!%p192_p2)   ;;  %p235_p4 = scmp.lt.s32.totalorder (!%p192_p2), %s1450_s19, 1 }
   0x6   : > { %195 = sbr.rel (%p192_p2) target bundleno = 336 (0x150), region = 36  ;;  %p224_p3 = scmp.lt.s32.totalorder (!%p192_p2), %s1047_s22, 63  ;;  %1326 = vmatprep.subr.bf16.mxu0 (!%p192_p2), %v1398_v0  ;;  %1374 = vmatprep.subr.bf16.mxu1 (!%p192_p2), %v1398_v0  ;;  %v1401_v3 = vld [vmem:[%s1678_s3 + $0x18] sm:$0xff] (!%p192_p2)   ;;  %v1481_v5 = vld [vmem:[%s1676_s1] ss:$0 sm:$0xff] (!%p192_p2)  ;;  %v1403_v34 = vld [vmem:[%s1678_s3 + $0x28] sm:$0xff] (!%p192_p2)  }
   0x7   : > { %1327 = vmatpush3.bf16.msra.mxu0 (!%p192_p2), %v1398_v0  ;;  %1382 = vmatpush3.bf16.msra.mxu1 (!%p192_p2), %v1398_v0  ;;  %v1489_v11 = vld [vmem:[%s1677_s2] ss:$0 sm:$0xff] (!%p192_p2)  ;;  %v1404_v49 = vld [vmem:[%s1678_s3 + $0x30] sm:$0xff] (!%p192_p2)   ;;  %v1405_v63 = vld [vmem:[%s1678_s3 + $0x38] sm:$0xff] (!%p192_p2)  }
   0x8   : > { %1328 = vmatprep.subr.bf16.mxu0 (!%p192_p2), %v1399_v1  ;;  %1375 = vmatprep.subr.bf16.mxu1 (!%p192_p2), %v1399_v1  ;;  %v1402_v20 = vld [vmem:[%s1678_s3 + $0x20] sm:$0xff] (!%p192_p2)  }
   0xb   : > { %1329 = vmatpush3.bf16.msra.mxu0 (!%p192_p2), %v1399_v1  ;;  %1383 = vmatpush3.bf16.msra.mxu1 (!%p192_p2), %v1399_v1 }
   0xc   : > { %1330 = vmatprep.subr.bf16.mxu0 (!%p192_p2), %v1400_v2  ;;  %1376 = vmatprep.subr.bf16.mxu1 (!%p192_p2), %v1400_v2 }
   0xd   : > { %s1682_s22 = smov (!%p224_p3, %s1047_s22), 63  ;;  %s1684_s19 = smov (!%p235_p4, %s1450_s19), 1 }
   0xe   : > { %s1048_s27 = sshll.u32 %s1682_s22, 2  ;;  %s1051_s22 = sshll.u32 %s1684_s19, 1 }
   0xf   : > { %s1472_s30 = scalar_lea.vmem %s1675_s0, %s1048_s27  ;;  %1331 = vmatpush3.bf16.msra.mxu0 %v1400_v2  ;;  %1384 = vmatpush3.bf16.msra.mxu1 %v1400_v2  ;;  %s1614_s25 = scalar_lea.vmem %s1679_s4, %s1048_s27 }
  0x10   : > { %v1129_v4 = vld [vmem:[%s1472_s30] sm:$0xff]   ;;  %v1272_v8 = vld [vmem:[%s1472_s30 + $0x8] sm:$0xff]   ;;  %v1273_v9 = vld [vmem:[%s1472_s30 + $0x10] sm:$0xff]   ;;  %1332 = vmatprep.subr.bf16.mxu0 %v1401_v3  ;;  %1377 = vmatprep.subr.bf16.mxu1 %v1401_v3  ;;  %s238_s28 = scalar_lea.vmem %s1680_s5, %s1051_s22 }
  0x11   : > { %v1130_v6 = vunpack.c.l.bf16 %v1129_v4  ;;  %v1131_v7 = vunpack.c.h.bf16 %v1129_v4  ;;  %v1274_v10 = vld [vmem:[%s1472_s30 + $0x18] sm:$0xff]   ;;  %v1134_v12 = vunpack.c.l.bf16 %v1272_v8  ;;  %v1135_v13 = vunpack.c.h.bf16 %v1272_v8  ;;  %v1275_v29 = vld [vmem:[%s1472_s30 + $0x20] sm:$0xff]   ;;  %v1276_v33 = vld [vmem:[%s1472_s30 + $0x28] sm:$0xff]  }
  0x12   : > { %v1138_v14 = vunpack.c.l.bf16 %v1273_v9  ;;  %v1139_v15 = vunpack.c.h.bf16 %v1273_v9  ;;  %v1142_v18 = vunpack.c.l.bf16 %v1274_v10  ;;  %v1143_v19 = vunpack.c.h.bf16 %v1274_v10  ;;  %v1277_v42 = vld [vmem:[%s1472_s30 + $0x30] sm:$0xff]   ;;  %v1518_v48 = vld [vmem:[%s1472_s30 + $0x38] sm:$0xff]   ;;  %v1279_v60 = vld [vmem:[%s1472_s30 + $0x40] sm:$0xff]  }
  0x13   : > { %v311_v16 = vmul.f32 %v1130_v6, %v1481_v5  ;;  %v312_v17 = vmul.f32 %v1131_v7, %v1481_v5  ;;  %v313_v21 = vmul.f32 %v1134_v12, %v1481_v5  ;;  %v314_v22 = vmul.f32 %v1135_v13, %v1481_v5  ;;  %1333 = vmatpush3.bf16.msra.mxu0 %v1401_v3  ;;  %v1281_v9 = vld [vmem:[%s1472_s30 + $0x50] sm:$0xff]  }
  0x14   : > { %v315_v23 = vmul.f32 %v1138_v14, %v1481_v5  ;;  %v316_v24 = vmul.f32 %v1139_v15, %v1481_v5  ;;  %v317_v27 = vmul.f32 %v1142_v18, %v1481_v5  ;;  %v318_v28 = vmul.f32 %v1143_v19, %v1481_v5  ;;  %1385 = vmatpush3.bf16.msra.mxu1 %v1401_v3  ;;  %v1280_v3 = vld [vmem:[%s1472_s30 + $0x48] sm:$0xff]   ;;  %v1282_v19 = vld [vmem:[%s1472_s30 + $0x58] sm:$0xff]  }
  0x15   : > { %v350_v25 = vadd.f32 %v1489_v11, %v311_v16  ;;  %v351_v26 = vadd.f32 %v1489_v11, %v312_v17  ;;  %v352_v32 = vadd.f32 %v1489_v11, %v313_v21  ;;  %1334 = vmatprep.subr.bf16.mxu0 %v1402_v20  ;;  %v353_v35 = vadd.f32 %v1489_v11, %v314_v22 }
  0x16   : > { %v354_v36 = vadd.f32 %v1489_v11, %v315_v23  ;;  %v355_v37 = vadd.f32 %v1489_v11, %v316_v24  ;;  %1378 = vmatprep.subr.bf16.mxu1 %v1402_v20  ;;  %v356_v39 = vadd.f32 %v1489_v11, %v317_v27  ;;  %v357_v40 = vadd.f32 %v1489_v11, %v318_v28 }
  0x17   : > { %v382_v30 = vmax.f32 %v350_v25, 0.0  ;;  %v383_v31 = vmax.f32 %v351_v26, 0.0  ;;  %v1146_v41 = vunpack.c.l.bf16 %v1275_v29  ;;  %v1147_v43 = vunpack.c.h.bf16 %v1275_v29  ;;  %1335 = vmatpush3.bf16.msra.mxu0 %v1402_v20 }
  0x18   : > { %v1150_v44 = vunpack.c.l.bf16 %v1276_v33  ;;  %v384_v45 = vmax.f32 %v352_v32, 0.0  ;;  %v1151_v47 = vunpack.c.h.bf16 %v1276_v33  ;;  %1336 = vmatprep.subr.bf16.mxu0 %v1403_v34  ;;  %v385_v50 = vmax.f32 %v353_v35, 0.0  ;;  %1386 = vmatpush3.bf16.msra.mxu1 %v1402_v20  ;;  %v1283_v32 = vld [vmem:[%s1472_s30 + $0x60] sm:$0xff]  }
  0x19   : > { %v414_v38 = vpack.c.bf16 %v383_v31, %v382_v30  ;;  %v319_v46 = vmul.f32 %v1146_v41, %v1481_v5  ;;  %v386_v51 = vmax.f32 %v354_v36, 0.0  ;;  %v387_v52 = vmax.f32 %v355_v37, 0.0  ;;  %1379 = vmatprep.subr.bf16.mxu1 %v1403_v34 }
  0x1a   : > { %v1154_v53 = vunpack.c.l.bf16 %v1277_v42  ;;  %v388_v54 = vmax.f32 %v356_v39, 0.0  ;;  %v389_v55 = vmax.f32 %v357_v40, 0.0  ;;  %v320_v56 = vmul.f32 %v1147_v43, %v1481_v5 }
  0x1b   : > { %1342 = vmatprep.mubr.bf16.mxu0 %v414_v38  ;;  %v321_v57 = vmul.f32 %v1150_v44, %v1481_v5  ;;  %v1155_v58 = vunpack.c.h.bf16 %v1277_v42  ;;  %v1158_v59 = vunpack.c.l.bf16 %v1518_v48  ;;  %1337 = vmatpush3.bf16.msra.mxu0 %v1403_v34  ;;  %v1528_v61 = vadd.f32 %v1489_v11, %v319_v46 }
  0x1c   : > { %v322_v62 = vmul.f32 %v1151_v47, %v1481_v5  ;;  %1338 = vmatprep.subr.bf16.mxu0 %v1404_v49  ;;  %v415_v0 = vpack.c.bf16 %v385_v50, %v384_v45  ;;  %v416_v1 = vpack.c.bf16 %v387_v52, %v386_v51  ;;  %1387 = vmatpush3.bf16.msra.mxu1 %v1403_v34  ;;  %v1159_v7 = vunpack.c.h.bf16 %v1518_v48  ;;  %v1284_v45 = vld [vmem:[%s1472_s30 + $0x68] sm:$0xff]  }
  0x1d   : > { %v323_v2 = vmul.f32 %v1154_v53, %v1481_v5  ;;  %v1536_v4 = vpack.c.bf16 %v389_v55, %v388_v54  ;;  %v1539_v6 = vadd.f32 %v1489_v11, %v320_v56  ;;  %1380 = vmatprep.subr.bf16.mxu1 %v1404_v49  ;;  %v1162_v8 = vunpack.c.l.bf16 %v1279_v60  ;;  %v1285_v55 = vld [vmem:[%s1472_s30 + $0x70] sm:$0xff]  }
  0x1e   : > { %v1544_v10 = vadd.f32 %v1489_v11, %v321_v57  ;;  %v1547_v12 = vmul.f32 %v1155_v58, %v1481_v5  ;;  %v1550_v13 = vmul.f32 %v1158_v59, %v1481_v5  ;;  %v1163_v14 = vunpack.c.h.bf16 %v1279_v60 }
  0x1f   : > { %1339 = vmatpush3.bf16.msra.mxu0 %v1404_v49  ;;  %v390_v15 = vmax.f32 %v1528_v61, 0.0  ;;  %v1554_v16 = vadd.f32 %v1489_v11, %v322_v62  ;;  %v327_v17 = vmul.f32 %v1162_v8, %v1481_v5  ;;  %v1166_v18 = vunpack.c.l.bf16 %v1280_v3 }
  0x20   : > { %1340 = vmatprep.subr.bf16.mxu0 %v1405_v63  ;;  %1388 = vmatpush3.bf16.msra.mxu1 %v1404_v49  ;;  %v1559_v20 = vadd.f32 %v1489_v11, %v323_v2  ;;  %v328_v21 = vmul.f32 %v1163_v14, %v1481_v5  ;;  %v1167_v22 = vunpack.c.h.bf16 %v1280_v3  ;;  %v1170_v23 = vunpack.c.l.bf16 %v1281_v9 }
  0x21   : > { %v391_v24 = vmax.f32 %v1539_v6, 0.0  ;;  %1381 = vmatprep.subr.bf16.mxu1 %v1405_v63  ;;  %v366_v25 = vadd.f32 %v1489_v11, %v327_v17  ;;  %v329_v26 = vmul.f32 %v1166_v18, %v1481_v5  ;;  %v1171_v27 = vunpack.c.h.bf16 %v1281_v9  ;;  %v1286_v17 = vld [vmem:[%s1472_s30 + $0x78] sm:$0xff]  }
  0x22   : > { %v367_v28 = vadd.f32 %v1489_v11, %v328_v21  ;;  %v330_v29 = vmul.f32 %v1167_v22, %v1481_v5  ;;  %v331_v30 = vmul.f32 %v1170_v23, %v1481_v5  ;;  %v1174_v31 = vunpack.c.l.bf16 %v1282_v19 }
  0x23   : > { %1341 = vmatpush3.bf16.msra.mxu0 %v1405_v63  ;;  %v398_v33 = vmax.f32 %v366_v25, 0.0  ;;  %v368_v34 = vadd.f32 %v1489_v11, %v329_v26  ;;  %v332_v35 = vmul.f32 %v1171_v27, %v1481_v5  ;;  %v1175_v36 = vunpack.c.h.bf16 %v1282_v19 }
  0x24   : > { %1389 = vmatpush3.bf16.msra.mxu1 %v1405_v63  ;;  %v399_v37 = vmax.f32 %v367_v28, 0.0  ;;  %v369_v38 = vadd.f32 %v1489_v11, %v330_v29  ;;  %v370_v39 = vadd.f32 %v1489_v11, %v331_v30  ;;  %v333_v40 = vmul.f32 %v1174_v31, %v1481_v5 }
  0x25   : > { %v400_v41 = vmax.f32 %v368_v34, 0.0  ;;  %v371_v42 = vadd.f32 %v1489_v11, %v332_v35  ;;  %v334_v43 = vmul.f32 %v1175_v36, %v1481_v5  ;;  %v1178_v44 = vunpack.c.l.bf16 %v1283_v32 }
  0x26   : > { %1343 = vmatmul.mubr.bf16.vlgmr.msra.gmra.mrb[0].mxu0 %v415_v0  ;;  %v422_v46 = vpack.c.bf16 %v399_v37, %v398_v33  ;;  %v401_v47 = vmax.f32 %v369_v38, 0.0  ;;  %v402_v49 = vmax.f32 %v370_v39, 0.0  ;;  %v372_v50 = vadd.f32 %v1489_v11, %v333_v40 }
  0x27   : > { %1346 = vmatprep.mubr.bf16.mxu0 %v416_v1  ;;  %v403_v51 = vmax.f32 %v371_v42, 0.0  ;;  %v373_v52 = vadd.f32 %v1489_v11, %v334_v43  ;;  %v1179_v53 = vunpack.c.h.bf16 %v1283_v32  ;;  %v335_v54 = vmul.f32 %v1178_v44, %v1481_v5 }
  0x28   : > { %1358 = vmatprep.mubr.bf16.mxu1 %v422_v46  ;;  %v423_v56 = vpack.c.bf16 %v401_v47, %v400_v41  ;;  %v404_v57 = vmax.f32 %v372_v50, 0.0  ;;  %v1182_v58 = vunpack.c.l.bf16 %v1284_v45  ;;  %v1183_v59 = vunpack.c.h.bf16 %v1284_v45 }
  0x29   : > { %v424_v60 = vpack.c.bf16 %v403_v51, %v402_v49  ;;  %v405_v61 = vmax.f32 %v373_v52, 0.0  ;;  %v336_v62 = vmul.f32 %v1179_v53, %v1481_v5  ;;  %v374_v63 = vadd.f32 %v1489_v11, %v335_v54 }
  0x2a   : > { %1359 = vmatmul.mubr.bf16.vlgmr.msra.gmra.mrb[0].mxu1 %v423_v56  ;;  %v337_v0 = vmul.f32 %v1182_v58, %v1481_v5  ;;  %v338_v1 = vmul.f32 %v1183_v59, %v1481_v5  ;;  %v1186_v2 = vunpack.c.l.bf16 %v1285_v55  ;;  %v1187_v3 = vunpack.c.h.bf16 %v1285_v55 }
  0x2b   : > { %v418_v6 = vpack.c.bf16 %v391_v24, %v390_v15  ;;  %v363_v8 = vadd.f32 %v1489_v11, %v1547_v12  ;;  %1362 = vmatprep.mubr.bf16.mxu1 %v424_v60  ;;  %v375_v9 = vadd.f32 %v1489_v11, %v336_v62  ;;  %v406_v14 = vmax.f32 %v374_v63, 0.0 }
  0x2c   : > { %v392_v18 = vmax.f32 %v1544_v10, 0.0  ;;  %v326_v19 = vmul.f32 %v1159_v7, %v1481_v5  ;;  %v339_v21 = vmul.f32 %v1186_v2, %v1481_v5  ;;  %v340_v22 = vmul.f32 %v1187_v3, %v1481_v5 }
  0x2d   : > { %v393_v15 = vmax.f32 %v1554_v16, 0.0  ;;  %v394_v23 = vmax.f32 %v1559_v20, 0.0  ;;  %v425_v12 = vpack.c.bf16 %v405_v61, %v404_v57  ;;  %v407_v24 = vmax.f32 %v375_v9, 0.0 }
  0x2e   : > { %1347 = vmatmul.mubr.bf16.gmra.mrb[4].mxu0 %v1536_v4  ;;  %v376_v25 = vadd.f32 %v1489_v11, %v337_v0  ;;  %v377_v10 = vadd.f32 %v1489_v11, %v338_v1  ;;  %v1190_v26 = vunpack.c.l.bf16 %v1286_v17  ;;  %v1191_v27 = vunpack.c.h.bf16 %v1286_v17 }
  0x2f   : > { %1350 = vmatprep.mubr.bf16.mxu0 %v418_v6  ;;  %v395_v48 = vmax.f32 %v363_v8, 0.0  ;;  %v426_v7 = vpack.c.bf16 %v407_v24, %v406_v14  ;;  %v378_v28 = vadd.f32 %v1489_v11, %v339_v21  ;;  %v379_v29 = vadd.f32 %v1489_v11, %v340_v22 }
  0x30   : > { %v419_v16 = vpack.c.bf16 %v393_v15, %v392_v18  ;;  %v364_v20 = vadd.f32 %v1489_v11, %v1550_v13  ;;  %v365_v30 = vadd.f32 %v1489_v11, %v326_v19  ;;  %v408_v4 = vmax.f32 %v376_v25, 0.0 }
  0x31   : > { %v409_v31 = vmax.f32 %v377_v10, 0.0  ;;  %v341_v32 = vmul.f32 %v1190_v26, %v1481_v5  ;;  %v342_v33 = vmul.f32 %v1191_v27, %v1481_v5  ;;  %v420_v34 = vpack.c.bf16 %v395_v48, %v394_v23 }
  0x32   : > { %1363 = vmatmul.mubr.bf16.gmra.mrb[4].mxu1 %v425_v12  ;;  %v410_v35 = vmax.f32 %v378_v28, 0.0  ;;  %v411_v36 = vmax.f32 %v379_v29, 0.0  ;;  %v396_v37 = vmax.f32 %v364_v20, 0.0  ;;  %v397_v38 = vmax.f32 %v365_v30, 0.0 }
  0x33   : > { %1366 = vmatprep.mubr.bf16.mxu1 %v426_v7  ;;  %v427_v39 = vpack.c.bf16 %v409_v31, %v408_v4  ;;  %v380_v13 = vadd.f32 %v1489_v11, %v341_v32  ;;  %v381_v40 = vadd.f32 %v1489_v11, %v342_v33 }
  0x34   : > { %v428_v41 = vpack.c.bf16 %v411_v36, %v410_v35  ;;  %v421_v42 = vpack.c.bf16 %v397_v38, %v396_v37 }
  0x35   : > { %v412_v43 = vmax.f32 %v380_v13, 0.0  ;;  %v413_v44 = vmax.f32 %v381_v40, 0.0 }
  0x36   : > { %1351 = vmatmul.mubr.bf16.gmra.mrb[8].mxu0 %v419_v16 }
  0x37   : > { %1354 = vmatprep.mubr.bf16.mxu0 %v420_v34  ;;  %v429_v5 = vpack.c.bf16 %v413_v44, %v412_v43 }
  0x3a   : > { %1367 = vmatmul.mubr.bf16.gmra.mrb[8].mxu1 %v427_v39 }
  0x3b   : > { %1370 = vmatprep.mubr.bf16.mxu1 %v428_v41 }
  0x3e   : > { %1355 = vmatmul.mubr.bf16.gmra.mrb[12].mxu0 %v421_v42 }
  0x42   : > { %1371 = vmatmul.mubr.bf16.gmra.mrb[12].mxu1 %v429_v5 }
  0xf9   : > { %v1344_v45 = vpop.f32.mrb[0].mxu0 }
  0xfa   : > { %v528_v46 = vpop.f32.mrb[1].mxu0 }
  0xfb   : > { %v1345_v11 = vpop.f32.mrb[2].mxu0 }
  0xfc   : > { %v656_v47 = vpack.c.bf16 %v1345_v11, %v1344_v45  ;;  %v531_v49 = vpop.f32.mrb[3].mxu0 }
  0xfd   : > { %v655_v50 = vpack.c.bf16 %v531_v49, %v528_v46  ;;  %v1360_v51 = vpop.f32.mrb[0].mxu1 }
  0xfe   : > { %1287 = vst [vmem:[%s1614_s25 + $0x8] sm:$0xff] %v656_v47   ;;  %v592_v52 = vpop.f32.mrb[1].mxu1  ;;  %v673_v53 = vunpack.c.l.bf16 %v656_v47  ;;  %v674_v57 = vunpack.c.h.bf16 %v656_v47 }
  0xff   : > { %v671_v54 = vunpack.c.l.bf16 %v655_v50  ;;  %v672_v55 = vunpack.c.h.bf16 %v655_v50  ;;  %1196 = vst [vmem:[%s1614_s25] sm:$0xff] %v655_v50   ;;  %v1361_v56 = vpop.f32.mrb[2].mxu1 }
 0x100   : > { %v1618_v58 = vpack.c.bf16 %v1361_v56, %v1360_v51  ;;  %v595_v59 = vpop.f32.mrb[3].mxu1  ;;  %v887_v2 = vmul.f32 %v673_v53, %v673_v53  ;;  %v888_v17 = vmul.f32 %v674_v57, %v674_v57 }
 0x101   : > { %v847_v60 = vadd.f32 %v672_v55, %v671_v54  ;;  %v885_v61 = vmul.f32 %v671_v54, %v671_v54  ;;  %v886_v62 = vmul.f32 %v672_v55, %v672_v55  ;;  %v1348_v63 = vpop.f32.mrb[4].mxu0  ;;  %v1620_v0 = vpack.c.bf16 %v595_v59, %v592_v52 }
 0x102   : > { %v544_v1 = vpop.f32.mrb[5].mxu0  ;;  %1295 = vst [vmem:[%s1614_s25 + $0x48] sm:$0xff] %v1618_v58  }
 0x103   : > { %v848_v3 = vadd.f32 %v847_v60, %v673_v53  ;;  %v917_v6 = vadd.f32 %v886_v62, %v885_v61  ;;  %v1349_v8 = vpop.f32.mrb[6].mxu0  ;;  %1294 = vst [vmem:[%s1614_s25 + $0x40] sm:$0xff] %v1620_v0  }
 0x104   : > { %v658_v9 = vpack.c.bf16 %v1349_v8, %v1348_v63  ;;  %v547_v14 = vpop.f32.mrb[7].mxu0 }
 0x105   : > { %v918_v18 = vadd.f32 %v917_v6, %v887_v2  ;;  %v657_v19 = vpack.c.bf16 %v547_v14, %v544_v1  ;;  %v849_v21 = vadd.f32 %v848_v3, %v674_v57  ;;  %v1364_v22 = vpop.f32.mrb[4].mxu1 }
 0x106   : > { %1289 = vst [vmem:[%s1614_s25 + $0x18] sm:$0xff] %v658_v9   ;;  %v608_v15 = vpop.f32.mrb[5].mxu1  ;;  %v677_v27 = vunpack.c.l.bf16 %v658_v9  ;;  %v678_v16 = vunpack.c.h.bf16 %v658_v9 }
 0x107   : > { %v675_v23 = vunpack.c.l.bf16 %v657_v19  ;;  %v676_v12 = vunpack.c.h.bf16 %v657_v19  ;;  %1288 = vst [vmem:[%s1614_s25 + $0x10] sm:$0xff] %v657_v19   ;;  %v919_v24 = vadd.f32 %v918_v18, %v888_v17  ;;  %v1365_v25 = vpop.f32.mrb[6].mxu1 }
 0x108   : > { %v1628_v10 = vpack.c.bf16 %v1365_v25, %v1364_v22  ;;  %v611_v26 = vpop.f32.mrb[7].mxu1  ;;  %v891_v35 = vmul.f32 %v677_v27, %v677_v27  ;;  %v892_v13 = vmul.f32 %v678_v16, %v678_v16 }
 0x109   : > { %v850_v48 = vadd.f32 %v849_v21, %v675_v23  ;;  %v889_v7 = vmul.f32 %v675_v23, %v675_v23  ;;  %v1352_v28 = vpop.f32.mrb[8].mxu0  ;;  %v1630_v29 = vpack.c.bf16 %v611_v26, %v608_v15  ;;  %v890_v4 = vmul.f32 %v676_v12, %v676_v12 }
 0x10a   : > { %v560_v20 = vpop.f32.mrb[9].mxu0  ;;  %1297 = vst [vmem:[%s1614_s25 + $0x58] sm:$0xff] %v1628_v10  }
 0x10b   : > { %v851_v30 = vadd.f32 %v850_v48, %v676_v12  ;;  %v920_v31 = vadd.f32 %v919_v24, %v889_v7  ;;  %v1353_v32 = vpop.f32.mrb[10].mxu0  ;;  %1296 = vst [vmem:[%s1614_s25 + $0x50] sm:$0xff] %v1630_v29  }
 0x10c   : > { %v660_v33 = vpack.c.bf16 %v1353_v32, %v1352_v28  ;;  %v563_v34 = vpop.f32.mrb[11].mxu0  ;;  %v688_v32 = vunpack.c.h.bf16 %v1620_v0 }
 0x10d   : > { %v852_v36 = vadd.f32 %v851_v30, %v677_v27  ;;  %v921_v37 = vadd.f32 %v920_v31, %v890_v4  ;;  %v659_v38 = vpack.c.bf16 %v563_v34, %v560_v20  ;;  %v1368_v39 = vpop.f32.mrb[8].mxu1  ;;  %v687_v30 = vunpack.c.l.bf16 %v1620_v0 }
 0x10e   : > { %1291 = vst [vmem:[%s1614_s25 + $0x28] sm:$0xff] %v660_v33   ;;  %v624_v40 = vpop.f32.mrb[9].mxu1  ;;  %v681_v11 = vunpack.c.l.bf16 %v660_v33  ;;  %v682_v52 = vunpack.c.h.bf16 %v660_v33  ;;  %v689_v34 = vunpack.c.l.bf16 %v1618_v58  ;;  %v692_v0 = vunpack.c.h.bf16 %v1630_v29 }
 0x10f   : > { %v922_v41 = vadd.f32 %v921_v37, %v891_v35  ;;  %v679_v42 = vunpack.c.l.bf16 %v659_v38  ;;  %v680_v43 = vunpack.c.h.bf16 %v659_v38  ;;  %1290 = vst [vmem:[%s1614_s25 + $0x20] sm:$0xff] %v659_v38   ;;  %v853_v44 = vadd.f32 %v852_v36, %v678_v16  ;;  %v1369_v5 = vpop.f32.mrb[10].mxu1 }
 0x110   : > { %v1638_v45 = vpack.c.bf16 %v1369_v5, %v1368_v39  ;;  %v627_v46 = vpop.f32.mrb[11].mxu1  ;;  %v895_v62 = vmul.f32 %v681_v11, %v681_v11  ;;  %v896_v6 = vmul.f32 %v682_v52, %v682_v52  ;;  %v901_v36 = vmul.f32 %v687_v30, %v687_v30 }
 0x111   : > { %v854_v47 = vadd.f32 %v853_v44, %v679_v42  ;;  %v893_v49 = vmul.f32 %v679_v42, %v679_v42  ;;  %v923_v50 = vadd.f32 %v922_v41, %v892_v13  ;;  %v1356_v51 = vpop.f32.mrb[12].mxu0  ;;  %v1642_v54 = vpack.c.bf16 %v627_v46, %v624_v40 }
 0x112   : > { %v576_v53 = vpop.f32.mrb[13].mxu0  ;;  %1299 = vst [vmem:[%s1614_s25 + $0x68] sm:$0xff] %v1638_v45   ;;  %v894_v56 = vmul.f32 %v680_v43, %v680_v43  ;;  %v690_v38 = vunpack.c.h.bf16 %v1618_v58  ;;  %v902_v13 = vmul.f32 %v688_v32, %v688_v32  ;;  %v903_v41 = vmul.f32 %v689_v34, %v689_v34 }
 0x113   : > { %v855_v55 = vadd.f32 %v854_v47, %v680_v43  ;;  %v924_v57 = vadd.f32 %v923_v50, %v893_v49  ;;  %v1357_v59 = vpop.f32.mrb[14].mxu0  ;;  %1298 = vst [vmem:[%s1614_s25 + $0x60] sm:$0xff] %v1642_v54   ;;  %v691_v44 = vunpack.c.l.bf16 %v1630_v29  ;;  %v693_v47 = vunpack.c.l.bf16 %v1628_v10 }
 0x114   : > { %v662_v60 = vpack.c.bf16 %v1357_v59, %v1356_v51  ;;  %v579_v61 = vpop.f32.mrb[15].mxu0  ;;  %v904_v5 = vmul.f32 %v690_v38, %v690_v38  ;;  %v694_v58 = vunpack.c.h.bf16 %v1628_v10  ;;  %v696_v29 = vunpack.c.h.bf16 %v1642_v54 }
 0x115   : > { %v856_v63 = vadd.f32 %v855_v55, %v681_v11  ;;  %v925_v1 = vadd.f32 %v924_v57, %v894_v56  ;;  %v661_v2 = vpack.c.bf16 %v579_v61, %v576_v53  ;;  %v1372_v3 = vpop.f32.mrb[12].mxu1  ;;  %v905_v50 = vmul.f32 %v691_v44, %v691_v44 }
 0x116   : > { %1293 = vst [vmem:[%s1614_s25 + $0x38] sm:$0xff] %v662_v60   ;;  %v640_v8 = vpop.f32.mrb[13].mxu1  ;;  %v685_v15 = vunpack.c.l.bf16 %v662_v60  ;;  %v686_v26 = vunpack.c.h.bf16 %v662_v60  ;;  %v906_v53 = vmul.f32 %v692_v0, %v692_v0  ;;  %v907_v56 = vmul.f32 %v693_v47, %v693_v47 }
 0x117   : > { %v926_v9 = vadd.f32 %v925_v1, %v895_v62  ;;  %v683_v14 = vunpack.c.l.bf16 %v661_v2  ;;  %v684_v17 = vunpack.c.h.bf16 %v661_v2  ;;  %1292 = vst [vmem:[%s1614_s25 + $0x30] sm:$0xff] %v661_v2   ;;  %v857_v18 = vadd.f32 %v856_v63, %v682_v52  ;;  %v1373_v19 = vpop.f32.mrb[14].mxu1 }
 0x118   : > { %v1648_v21 = vpack.c.bf16 %v1373_v19, %v1372_v3  ;;  %v643_v22 = vpop.f32.mrb[15].mxu1  ;;  %v899_v28 = vmul.f32 %v685_v15, %v685_v15  ;;  %v900_v4 = vmul.f32 %v686_v26, %v686_v26  ;;  %v695_v60 = vunpack.c.l.bf16 %v1642_v54 }
 0x119   : > { %v858_v23 = vadd.f32 %v857_v18, %v683_v14  ;;  %v897_v12 = vmul.f32 %v683_v14, %v683_v14  ;;  %v927_v24 = vadd.f32 %v926_v9, %v896_v6  ;;  %v669_v25 = vpack.c.bf16 %v643_v22, %v640_v8 }
 0x11a   : > { %1301 = vst [vmem:[%s1614_s25 + $0x78] sm:$0xff] %v1648_v21   ;;  %v898_v48 = vmul.f32 %v684_v17, %v684_v17  ;;  %v908_v61 = vmul.f32 %v694_v58, %v694_v58  ;;  %v697_v1 = vunpack.c.l.bf16 %v1638_v45  ;;  %v909_v3 = vmul.f32 %v695_v60, %v695_v60 }
 0x11b   : > { %v859_v27 = vadd.f32 %v858_v23, %v684_v17  ;;  %v928_v7 = vadd.f32 %v927_v24, %v897_v12  ;;  %1300 = vst [vmem:[%s1614_s25 + $0x70] sm:$0xff] %v669_v25   ;;  %v698_v10 = vunpack.c.h.bf16 %v1638_v45  ;;  %v910_v9 = vmul.f32 %v696_v29, %v696_v29 }
 0x11c   : > { %v911_v17 = vmul.f32 %v697_v1, %v697_v1  ;;  %v699_v22 = vunpack.c.l.bf16 %v669_v25  ;;  %v700_v12 = vunpack.c.h.bf16 %v669_v25  ;;  %v701_v24 = vunpack.c.l.bf16 %v1648_v21 }
 0x11d   : > { %v860_v16 = vadd.f32 %v859_v27, %v685_v15  ;;  %v929_v20 = vadd.f32 %v928_v7, %v898_v48  ;;  %v912_v15 = vmul.f32 %v698_v10, %v698_v10  ;;  %v702_v45 = vunpack.c.h.bf16 %v1648_v21 }
 0x11e   : > { %v913_v27 = vmul.f32 %v699_v22, %v699_v22 }
 0x11f   : > { %v930_v31 = vadd.f32 %v929_v20, %v899_v28  ;;  %v861_v33 = vadd.f32 %v860_v16, %v686_v26  ;;  %v914_v28 = vmul.f32 %v700_v12, %v700_v12  ;;  %v915_v20 = vmul.f32 %v701_v24, %v701_v24 }
 0x121   : > { %v862_v35 = vadd.f32 %v861_v33, %v687_v30  ;;  %v931_v37 = vadd.f32 %v930_v31, %v900_v4  ;;  %v916_v31 = vmul.f32 %v702_v45, %v702_v45 }
 0x123   : > { %v863_v39 = vadd.f32 %v862_v35, %v688_v32  ;;  %v932_v40 = vadd.f32 %v931_v37, %v901_v36 }
 0x125   : > { %v864_v42 = vadd.f32 %v863_v39, %v689_v34  ;;  %v933_v43 = vadd.f32 %v932_v40, %v902_v13 }
 0x127   : > { %v934_v46 = vadd.f32 %v933_v43, %v903_v41  ;;  %v865_v11 = vadd.f32 %v864_v42, %v690_v38 }
 0x129   : > { %v866_v49 = vadd.f32 %v865_v11, %v691_v44  ;;  %v935_v51 = vadd.f32 %v934_v46, %v904_v5 }
 0x12b   : > { %v867_v52 = vadd.f32 %v866_v49, %v692_v0  ;;  %v936_v55 = vadd.f32 %v935_v51, %v905_v50 }
 0x12d   : > { %v868_v57 = vadd.f32 %v867_v52, %v693_v47  ;;  %v937_v59 = vadd.f32 %v936_v55, %v906_v53 }
 0x12f   : > { %v938_v62 = vadd.f32 %v937_v59, %v907_v56  ;;  %v869_v63 = vadd.f32 %v868_v57, %v694_v58 }
 0x131   : > { %v870_v2 = vadd.f32 %v869_v63, %v695_v60  ;;  %v939_v6 = vadd.f32 %v938_v62, %v908_v61 }
 0x133   : > { %v871_v8 = vadd.f32 %v870_v2, %v696_v29  ;;  %v940_v14 = vadd.f32 %v939_v6, %v909_v3 }
 0x135   : > { %v872_v18 = vadd.f32 %v871_v8, %v697_v1  ;;  %v941_v19 = vadd.f32 %v940_v14, %v910_v9 }
 0x137   : > { %v942_v23 = vadd.f32 %v941_v19, %v911_v17  ;;  %v873_v54 = vadd.f32 %v872_v18, %v698_v10 }
 0x139   : > { %v874_v26 = vadd.f32 %v873_v54, %v699_v22  ;;  %v943_v48 = vadd.f32 %v942_v23, %v912_v15 }
 0x13b   : > { %v875_v7 = vadd.f32 %v874_v26, %v700_v12  ;;  %v944_v16 = vadd.f32 %v943_v48, %v913_v27 }
 0x13d   : > { %v876_v30 = vadd.f32 %v875_v7, %v701_v24  ;;  %v945_v4 = vadd.f32 %v944_v16, %v914_v28 }
 0x13f   : > { %v877_v32 = vadd.f32 %v876_v30, %v702_v45  ;;  %v946_v33 = vadd.f32 %v945_v4, %v915_v20 }
 0x141   : > { %v878_v25 = vrot.slane %v877_v32, 4  ;;  %v947_v34 = vadd.f32 %v946_v33, %v916_v31 }
 0x143   : > { %v879_v35 = vadd.f32 %v878_v25, %v877_v32  ;;  %v948_v36 = vrot.slane %v947_v34, 4 }
 0x145   : > { %v880_v37 = vrot.slane %v879_v35, 2  ;;  %v949_v38 = vadd.f32 %v948_v36, %v947_v34 }
 0x147   : > { %v881_v39 = vadd.f32 %v880_v37, %v879_v35  ;;  %v950_v21 = vrot.slane %v949_v38, 2 }
 0x149   : > { %v882_v13 = vrot.slane %v881_v39, 1  ;;  %v951_v40 = vadd.f32 %v950_v21, %v949_v38 }
 0x14b   : > { %v883_v41 = vadd.f32 %v882_v13, %v881_v39  ;;  %v952_v42 = vrot.slane %v951_v40, 1 }
 0x14d   : > { %884 = vst [vmem:[%s238_s28] sm:$0x1] %v883_v41  ;;  %v953_v43 = vadd.f32 %v952_v42, %v951_v40 }
 0x14f   : > { %954 = vst [vmem:[%s238_s28 + $0x1] sm:$0x1] %v953_v43 }
 0x150 PF: > { %s16_s18 = sadd.s32 1, %s1412_s18  }
 0x151   : > { %p13_p5 = scmp.ge.s32.totalorder %s16_s18, 4  }
 0x153   :  { %15 = sbr.rel (!%p13_p5) target bundleno = 1 (0x1), region = 78 }

// kernel: bottleneck_forward.5
= control target key start
LH: loop header
LB: loop body
LE: loop exit
PB: predicated region body
PF: predicated region fallthrough
CT: control target
= control target key end

     0   :  { %s8075_s18 = smov 0   ;;  %s9924_s0 = inlined_call_operand.vmem [shape: bf16[2,16,16,128], index: 0, kind: input, shape index: {}]   ;;  %s9925_s1 = inlined_call_operand.vmem [shape: f32[1,128], index: 1, kind: input, shape index: {}]   ;;  %s9926_s2 = inlined_call_operand.vmem [shape: f32[1,128], index: 2, kind: input, shape index: {}]   ;;  %s9927_s3 = inlined_call_operand.vmem [shape: bf16[9,128,128], index: 3, kind: input, shape index: {}]   ;;  %s9928_s4 = inlined_call_operand.vmem [shape: bf16[2,16,16,128], index: 4, kind: output, shape index: {0}]   ;;  %s9929_s5 = inlined_call_operand.vmem [shape: f32[2,2,128], index: 5, kind: output, shape index: {1}]  }
   0x1 LB: > { %s6196_s19 = sadd.s32 4294967295, %s8042_s18   ;;  %p6200_p0 = scmp.ge.s32.totalorder %s8042_s18, 1  ;;  %s8042_s18 = sphi %s8075_s18, %s16_s18  }
   0x2   : > { %p190_p1 = scmp.lt.s32.totalorder %s8042_s18, 3 }
   0x4   : > { %p191_p2 = pnand %p6200_p0, %p190_p1 }
   0x6   : > { %194 = sbr.rel (%p191_p2) target bundleno = 719 (0x2cf), region = 36 }
   0xd   : > { %v7835_v0 = vld [vmem:[%s9927_s3 + $0x40] sm:$0xff]   ;;  %v8044_v2 = vmov 0   ;;  %v7837_v3 = vld [vmem:[%s9927_s3 + $0x48] sm:$0xff]   ;;  %v7839_v5 = vld [vmem:[%s9927_s3 + $0x50] sm:$0xff]   ;;  %p222_p3 = scmp.lt.s32.totalorder %s6196_s19, 1  ;;  %vm885_vm3 = vcmask 1043456  }
   0xe   : > { %v7836_v1 = vld [vmem:[%s9927_s3 + $0x100] sm:$0xff]   ;;  %427 = vst [vmem:[#allocation2] sm:$0xf] %v8044_v2  ;;  %428 = vst [vmem:[#allocation2 + $0x4] sm:$0xf] %v8044_v2  ;;  %7122 = vmatprep.subr.bf16.mxu1 %v7835_v0  ;;  %v7838_v4 = vld [vmem:[%s9927_s3 + $0x108] sm:$0xff]  }
   0xf   : > { %429 = vst [vmem:[#allocation2 + $0x8] sm:$0x1] %v8044_v2  ;;  %430 = vst [vmem:[#allocation2 + $0xc] sm:$0xf] %v8044_v2  ;;  %7314 = vmatprep.subr.bf16.mxu0 %v7836_v1  ;;  %7123 = vmatpush3.bf16.msra.mxu1 %v7835_v0  ;;  %v7840_v6 = vld [vmem:[%s9927_s3 + $0x110] sm:$0xff]   ;;  %v7841_v7 = vld [vmem:[%s9927_s3 + $0x58] sm:$0xff]  }
  0x10   : > { %431 = vst [vmem:[#allocation2 + $0x10] sm:$0xf] %v8044_v2  ;;  %432 = vst [vmem:[#allocation2 + $0x14] sm:$0x1] %v8044_v2  ;;  %7315 = vmatpush3.bf16.msra.mxu0 %v7836_v1  ;;  %7124 = vmatprep.subr.bf16.mxu1 %v7837_v3  ;;  %v7842_v8 = vld [vmem:[%s9927_s3 + $0x118] sm:$0xff]   ;;  %s10010_s19 = smov (!%p222_p3, %s6196_s19), 1 }
  0x11   : > { %433 = vst [vmem:[#allocation2 + $0x18] sm:$0xf] %v8044_v2  ;;  %434 = vst [vmem:[#allocation2 + $0x1c] sm:$0xf] %v8044_v2  ;;  %7316 = vmatprep.subr.bf16.mxu0 %v7838_v4  ;;  %v7843_v9 = vld [vmem:[%s9927_s3 + $0x60] sm:$0xff]   ;;  %s6666_s15 = sshll.u32 %s10010_s19, 7 }
  0x12   : > { %435 = vst [vmem:[#allocation2 + $0x20] sm:$0x1] %v8044_v2  ;;  %436 = vst [vmem:[#allocation2 + $0x24] sm:$0xf] %v8044_v2  ;;  %v7844_v10 = vld [vmem:[%s9927_s3 + $0x120] sm:$0xff]   ;;  %v7845_v11 = vld [vmem:[%s9927_s3 + $0x68] sm:$0xff]   ;;  %s8128_s22 = scalar_lea.vmem %s9924_s0, %s6666_s15  ;;  %s9895_s26 = scalar_lea.vmem %s9928_s4, %s6666_s15 }
  0x13   : > { %437 = vst [vmem:[#allocation2 + $0x28] sm:$0xf] %v8044_v2  ;;  %438 = vst [vmem:[#allocation2 + $0x2c] sm:$0x1] %v8044_v2  ;;  %7125 = vmatpush3.bf16.msra.mxu1 %v7837_v3  ;;  %v7846_v15 = vld [vmem:[%s9927_s3 + $0x128] sm:$0xff]   ;;  %v6733_v24 = vld [vmem:[%s8128_s22] sm:$0xff]  }
  0x14   : > { %439 = vst [vmem:[#allocation2 + $0x30] sm:$0xf] %v8044_v2  ;;  %440 = vst [vmem:[#allocation2 + $0x34] sm:$0xf] %v8044_v2  ;;  %7317 = vmatpush3.bf16.msra.mxu0 %v7838_v4  ;;  %7126 = vmatprep.subr.bf16.mxu1 %v7839_v5  ;;  %vm1066_vm0 = vsmask.f32 3328  ;;  %v6734_v28 = vunpack.c.l.bf16 %v6733_v24  ;;  %v6735_v32 = vunpack.c.h.bf16 %v6733_v24 }
  0x15   : > { %441 = vst [vmem:[#allocation2 + $0x38] sm:$0x1] %v8044_v2  ;;  %442 = vst [vmem:[#allocation2 + $0x3c] sm:$0xf] %v8044_v2  ;;  %7318 = vmatprep.subr.bf16.mxu0 %v7840_v6  ;;  %v1002_v12 = vld [vmem:[#allocation2] sm:$0xf] }
  0x16   : > { %443 = vst [vmem:[#allocation2 + $0x40] sm:$0xf] %v8044_v2  ;;  %444 = vst [vmem:[#allocation2 + $0x44] sm:$0x1] %v8044_v2  ;;  %v1003_v13 = vld [vmem:[#allocation2 + $0x4] sm:$0xf] }
  0x17   : > { %445 = vst [vmem:[#allocation2 + $0x48] sm:$0xf] %v8044_v2  ;;  %446 = vst [vmem:[#allocation2 + $0x4c] sm:$0xf] %v8044_v2  ;;  %7127 = vmatpush3.bf16.msra.mxu1 %v7839_v5  ;;  %v1050_v14 = vld [vmem:[#allocation2 + $0x8] sm:$0x1] }
  0x18   : > { %447 = vst [vmem:[#allocation2 + $0x50] sm:$0x1] %v8044_v2  ;;  %448 = vst [vmem:[#allocation2 + $0x54] sm:$0xf] %v8044_v2  ;;  %7319 = vmatpush3.bf16.msra.mxu0 %v7840_v6  ;;  %7128 = vmatprep.subr.bf16.mxu1 %v7841_v7  ;;  %v1070_v16 = vshrl.u32 %v1002_v12, 16  ;;  %v1073_v17 = vshll.u32 %v1002_v12, 16 }
  0x19   : > { %449 = vst [vmem:[#allocation2 + $0x58] sm:$0xf] %v8044_v2  ;;  %450 = vst [vmem:[#allocation2 + $0x5c] sm:$0x1] %v8044_v2  ;;  %7320 = vmatprep.subr.bf16.mxu0 %v7842_v8  ;;  %vm1067_vm1 = vsmask.f32 7440 }
  0x1a   : > { %451 = vst [vmem:[#allocation2 + $0x60] sm:$0xf] %v8044_v2  ;;  %452 = vst [vmem:[#allocation2 + $0x64] sm:$0xf] %v8044_v2  ;;  %v1079_v18 = vshll.u32 %v1003_v13, 16  ;;  %v1083_v19 = vshrl.u32 %v1003_v13, 16 }
  0x1b   : > { %453 = vst [vmem:[#allocation2 + $0x68] sm:$0x1] %v8044_v2  ;;  %454 = vst [vmem:[#allocation2 + $0x6c] sm:$0xf] %v8044_v2  ;;  %7129 = vmatpush3.bf16.msra.mxu1 %v7841_v7  ;;  %v1089_v20 = vshll.u32 %v1050_v14, 16  ;;  %v1072_v21 = vrot.slane %v1070_v16, 4 }
  0x1c   : > { %455 = vst [vmem:[#allocation2 + $0x70] sm:$0xf] %v8044_v2  ;;  %456 = vst [vmem:[#allocation2 + $0x74] sm:$0x1] %v8044_v2  ;;  %7321 = vmatpush3.bf16.msra.mxu0 %v7842_v8  ;;  %7130 = vmatprep.subr.bf16.mxu1 %v7843_v9  ;;  %v1075_v22 = vrot.slane %v1073_v17, 5  ;;  %v7847_v25 = vld [vmem:[%s9927_s3 + $0x70] sm:$0xff]  }
  0x1d   : > { %457 = vst [vmem:[#allocation2 + $0x78] sm:$0xf] %v8044_v2  ;;  %458 = vst [vmem:[#allocation2 + $0x7c] sm:$0xf] %v8044_v2  ;;  %7322 = vmatprep.subr.bf16.mxu0 %v7844_v10  ;;  %v8136_v23 = vld [vmem:[%s9925_s1] ss:$0 sm:$0xff] }
  0x1e   : > { %459 = vst [vmem:[#allocation2 + $0x80] sm:$0x1] %v8044_v2  ;;  %460 = vst [vmem:[#allocation2 + $0x84] sm:$0xf] %v8044_v2  ;;  %v1081_v26 = vrot.slane %v1079_v18, 5  ;;  %v1085_v27 = vrot.slane %v1083_v19, 4  ;;  %v1076_v30 = vor.u32 %v1075_v22, %v1072_v21  ;;  %v309_v36 = vmul.f32 %v6734_v28, %v8136_v23 }
  0x1f   : > { %461 = vst [vmem:[#allocation2 + $0x88] sm:$0xf] %v8044_v2  ;;  %462 = vst [vmem:[#allocation2 + $0x8c] sm:$0x1] %v8044_v2  ;;  %7131 = vmatpush3.bf16.msra.mxu1 %v7843_v9  ;;  %v7848_v29 = vld [vmem:[%s9927_s3 + $0x130] sm:$0xff]   ;;  %v1091_v35 = vrot.slane %v1089_v20, 5  ;;  %v310_v38 = vmul.f32 %v6735_v32, %v8136_v23 }
  0x20   : > { %463 = vst [vmem:[#allocation2 + $0x90] sm:$0xf] %v8044_v2  ;;  %464 = vst [vmem:[#allocation2 + $0x94] sm:$0xf] %v8044_v2  ;;  %7323 = vmatpush3.bf16.msra.mxu0 %v7844_v10  ;;  %7132 = vmatprep.subr.bf16.mxu1 %v7845_v11  ;;  %v8148_v31 = vld [vmem:[%s9926_s2] ss:$0 sm:$0xff]  ;;  %v1086_v34 = vor.u32 %v1085_v27, %v1081_v26 }
  0x21   : > { %465 = vst [vmem:[#allocation2 + $0x98] sm:$0x1] %v8044_v2  ;;  %466 = vst [vmem:[#allocation2 + $0x9c] sm:$0xf] %v8044_v2  ;;  %7324 = vmatprep.subr.bf16.mxu0 %v7846_v15  ;;  %v1077_v37 = vrot.slane %v1076_v30, 4  ;;  %v7849_v39 = vld [vmem:[%s9927_s3 + $0x78] sm:$0xff]   ;;  %v347_v41 = vadd.f32 %v8148_v31, %v309_v36  ;;  %v348_v45 = vadd.f32 %v8148_v31, %v310_v38 }
  0x22   : > { %467 = vst [vmem:[#allocation2 + $0xa0] sm:$0xf] %v8044_v2  ;;  %468 = vst [vmem:[#allocation2 + $0xa4] sm:$0x1] %v8044_v2  ;;  %v1087_v40 = vrot.slane %v1086_v34, 4  ;;  %vm892_vm4 = vcmask 1040384  }
  0x23   : > { %469 = vst [vmem:[#allocation2 + $0xa8] sm:$0xf] %v8044_v2  ;;  %470 = vst [vmem:[#allocation2 + $0xac] sm:$0xf] %v8044_v2  ;;  %7133 = vmatpush3.bf16.msra.mxu1 %v7845_v11  ;;  %v6876_v42 = vld [vmem:[%s8128_s22 + $0x8] sm:$0xff]   ;;  %v7850_v43 = vld [vmem:[%s9927_s3 + $0x138] sm:$0xff]  }
  0x24   : > { %471 = vst [vmem:[#allocation2 + $0xb0] sm:$0x1] %v8044_v2  ;;  %472 = vst [vmem:[#allocation2 + $0xb4] sm:$0xf] %v8044_v2  ;;  %7325 = vmatpush3.bf16.msra.mxu0 %v7846_v15  ;;  %7134 = vmatprep.subr.bf16.mxu1 %v7847_v25  ;;  %v6738_v46 = vunpack.c.l.bf16 %v6876_v42  ;;  %v6739_v47 = vunpack.c.h.bf16 %v6876_v42  ;;  %v379_v49 = vmax.f32 %v347_v41, 0.0  ;;  %v6877_v50 = vld [vmem:[%s8128_s22 + $0x10] sm:$0xff]  }
  0x25   : > { %473 = vst [vmem:[#allocation2 + $0xb8] sm:$0xf] %v8044_v2  ;;  %474 = vst [vmem:[#allocation2 + $0xbc] sm:$0x1] %v8044_v2  ;;  %7326 = vmatprep.subr.bf16.mxu0 %v7848_v29  ;;  %vm561_vm5 = vsmask.f32 256  ;;  %v6742_v57 = vunpack.c.l.bf16 %v6877_v50  ;;  %v6743_v58 = vunpack.c.h.bf16 %v6877_v50 }
  0x26   : > { %475 = vst [vmem:[#allocation2 + $0xc0] sm:$0xf] %v8044_v2  ;;  %476 = vst [vmem:[#allocation2 + $0xc4] sm:$0xf] %v8044_v2  ;;  %vm562_vm6 = vsmask.f32 4368  ;;  %v311_v54 = vmul.f32 %v6738_v46, %v8136_v23  ;;  %v312_v55 = vmul.f32 %v6739_v47, %v8136_v23  ;;  %v6668_v56 = vpack.c.bf16 %v379_v49, %v379_v49 }
  0x27   : > { %477 = vst [vmem:[#allocation2 + $0xc8] sm:$0x1] %v8044_v2  ;;  %478 = vst [vmem:[#allocation2 + $0xcc] sm:$0xf] %v8044_v2  ;;  %7135 = vmatpush3.bf16.msra.mxu1 %v7847_v25  ;;  %v380_v52 = vmax.f32 %v348_v45, 0.0  ;;  %v8175_v53 = vld [vmem:[%s9927_s3] sm:$0xff]   ;;  %v314_v3 = vmul.f32 %v6743_v58, %v8136_v23 }
  0x28   : > { %479 = vst [vmem:[#allocation2 + $0xd0] sm:$0xf] %v8044_v2  ;;  %480 = vst [vmem:[#allocation2 + $0xd4] sm:$0x1] %v8044_v2  ;;  %7327 = vmatpush3.bf16.msra.mxu0 %v7848_v29  ;;  %7136 = vmatprep.subr.bf16.mxu1 %v7849_v39  ;;  %vm886_vm7 = vsmask.f32 7938  ;;  %v349_v61 = vadd.f32 %v8148_v31, %v311_v54  ;;  %v350_v62 = vadd.f32 %v8148_v31, %v312_v55 }
  0x29   : > { %vm8152_vm2 = vmor %vm1066_vm0, %vm1067_vm1  ;;  %7328 = vmatprep.subr.bf16.mxu0 %v7850_v43  ;;  %v6669_v59 = vpack.c.bf16 %v380_v52, %v380_v52  ;;  %v8182_v60 = vld [vmem:[%s9927_s3 + $0x140] sm:$0xff]   ;;  %v6878_v63 = vld [vmem:[%s8128_s22 + $0x18] sm:$0xff]   ;;  %v565_v0 = vshrl.u32 %v6668_v56, 16  ;;  %v568_v1 = vshll.u32 %v6668_v56, 16  ;;  %v313_v2 = vmul.f32 %v6742_v57, %v8136_v23  ;;  %s6205_s15 = sshll.u32 %s10010_s19, 1 }
  0x2a   : > { %v1082_v44 = vsel %vm8152_vm2, %v1077_v37, %v1081_v26  ;;  %v1092_v48 = vsel %vm8152_vm2, %v1087_v40, %v1091_v35  ;;  %v381_v6 = vmax.f32 %v349_v61, 0.0  ;;  %v382_v7 = vmax.f32 %v350_v62, 0.0  ;;  %vm8191_vm8 = vmor %vm561_vm5, %vm562_vm6  ;;  %v888_v10 = vld [vmem:[#allocation2 + $0xc] sm:$0xf]  ;;  %v894_v16 = vld [vmem:[#allocation2 + $0x14] sm:$0x1]  ;;  %s235_s29 = scalar_lea.vmem %s9929_s5, %s6205_s15 }
  0x2b   : > { %v6256_v51 = vcombine.low %v1082_v44, %v1092_v48  ;;  %7137 = vmatpush3.bf16.msra.mxu1 %v7849_v39  ;;  %v573_v4 = vshrl.u32 %v6669_v59, 16  ;;  %v576_v5 = vshll.u32 %v6669_v59, 16  ;;  %v567_v9 = vrot.slane %v565_v0, 7  ;;  %vm8200_vm9 = vmand %vm885_vm3, %vm886_vm7  ;;  %v897_v39 = vld [vmem:[#allocation2 + $0x18] sm:$0xf]  ;;  %v8219_v45 = vld [vmem:[%s8128_s22 + $0x20] sm:$0xff]  }
  0x2c   : > { %7329 = vmatpush3.bf16.msra.mxu0 %v7850_v43  ;;  %7170 = vmatprep.subr.bf16.mxu1 %v8175_v53  ;;  %v351_v11 = vadd.f32 %v8148_v31, %v313_v2  ;;  %v352_v12 = vadd.f32 %v8148_v31, %v314_v3  ;;  %v6746_v13 = vunpack.c.l.bf16 %v6878_v63  ;;  %v6670_v17 = vpack.c.bf16 %v381_v6, %v381_v6  ;;  %vm8207_vm10 = vmand %vm892_vm4, %vm561_vm5  ;;  %v901_v48 = vld [vmem:[#allocation2 + $0x20] sm:$0x1]  ;;  %v904_v55 = vld [vmem:[#allocation2 + $0x24] sm:$0xf] }
  0x2d   : > { %7138 = vmatprep.mubr.bf16.mxu1 %v6256_v51  ;;  %v575_v14 = vrot.slane %v573_v4, 7  ;;  %7362 = vmatprep.subr.bf16.mxu0 %v8182_v60  ;;  %v6671_v18 = vpack.c.bf16 %v382_v7, %v382_v7  ;;  %v6747_v19 = vunpack.c.h.bf16 %v6878_v63  ;;  %v570_v20 = vor.u32 %v568_v1, %v567_v9  ;;  %v908_v2 = vld [vmem:[#allocation2 + $0x2c] sm:$0x1] }
  0x2e   : > { %v571_v21 = vrot.slane %v567_v9, 4  ;;  %v383_v24 = vmax.f32 %v351_v11, 0.0  ;;  %v384_v25 = vmax.f32 %v352_v12, 0.0  ;;  %v582_v28 = vshrl.u32 %v6670_v17, 16  ;;  %v7895_v22 = vld [vmem:[%s9927_s3 + $0xa8] sm:$0xff]  }
  0x2f   : > { %v578_v26 = vor.u32 %v576_v5, %v575_v14  ;;  %v580_v27 = vrot.slane %v575_v14, 4  ;;  %v585_v29 = vshll.u32 %v6670_v17, 16  ;;  %v889_v30 = vsel %vm8200_vm9, %v570_v20, %v888_v10 }
  0x30   : > { %v590_v32 = vshrl.u32 %v6671_v18, 16  ;;  %v593_v34 = vshll.u32 %v6671_v18, 16  ;;  %v6672_v35 = vpack.c.bf16 %v383_v24, %v383_v24  ;;  %890 = vst [vmem:[#allocation2 + $0xc] sm:$0xf] %v889_v30  ;;  %v584_v38 = vrot.slane %v582_v28, 7 }
  0x31   : > { %v579_v36 = vsel %vm8191_vm8, %v571_v21, %v578_v26  ;;  %v895_v37 = vsel %vm8207_vm10, %v580_v27, %v894_v16  ;;  %v6673_v40 = vpack.c.bf16 %v384_v25, %v384_v25  ;;  %v315_v44 = vmul.f32 %v6746_v13, %v8136_v23 }
  0x32   : > { %891 = vst [vmem:[#allocation2 + $0x10] sm:$0xf] %v579_v36  ;;  %896 = vst [vmem:[#allocation2 + $0x14] sm:$0x1] %v895_v37  ;;  %v592_v41 = vrot.slane %v590_v32, 7  ;;  %v599_v42 = vshrl.u32 %v6672_v35, 16  ;;  %v587_v46 = vor.u32 %v585_v29, %v584_v38  ;;  %v316_v56 = vmul.f32 %v6747_v19, %v8136_v23 }
  0x33   : > { %v602_v43 = vshll.u32 %v6672_v35, 16  ;;  %v588_v47 = vrot.slane %v584_v38, 4  ;;  %v607_v49 = vshrl.u32 %v6673_v40, 16  ;;  %v610_v50 = vshll.u32 %v6673_v40, 16 }
  0x34   : > { %v595_v51 = vor.u32 %v593_v34, %v592_v41  ;;  %v597_v52 = vrot.slane %v592_v41, 4  ;;  %v601_v54 = vrot.slane %v599_v42, 7  ;;  %v898_v57 = vsel %vm8200_vm9, %v587_v46, %v897_v39 }
  0x35   : > { %v609_v58 = vrot.slane %v607_v49, 7  ;;  %v8225_v59 = vadd.f32 %v8148_v31, %v315_v44  ;;  %v6750_v61 = vunpack.c.l.bf16 %v8219_v45  ;;  %899 = vst [vmem:[#allocation2 + $0x18] sm:$0xf] %v898_v57  ;;  %v8236_v10 = vadd.f32 %v8148_v31, %v316_v56 }
  0x36   : > { %v596_v62 = vsel %vm8191_vm8, %v588_v47, %v595_v51  ;;  %v902_v63 = vsel %vm8207_vm10, %v597_v52, %v901_v48  ;;  %v604_v0 = vor.u32 %v602_v43, %v601_v54  ;;  %v605_v1 = vrot.slane %v601_v54, 4 }
  0x37   : > { %900 = vst [vmem:[#allocation2 + $0x1c] sm:$0xf] %v596_v62  ;;  %903 = vst [vmem:[#allocation2 + $0x20] sm:$0x1] %v902_v63  ;;  %v612_v3 = vor.u32 %v610_v50, %v609_v58  ;;  %v614_v4 = vrot.slane %v609_v58, 4  ;;  %v385_v5 = vmax.f32 %v8225_v59, 0.0  ;;  %v6751_v11 = vunpack.c.h.bf16 %v8219_v45 }
  0x38   : > { %v1004_v6 = vld [vmem:[#allocation2 + $0xc] sm:$0xf]  ;;  %v905_v9 = vsel %vm8200_vm9, %v604_v0, %v904_v55  ;;  %v8244_v25 = vmul.f32 %v6750_v61, %v8136_v23  ;;  %vm2096_vm11 = vcmask 1042432   ;;  %vm2097_vm12 = vcmask 1046532  }
  0x39   : > { %v2919_v7 = vld [vmem:[#allocation2 + $0xc] sm:$0xf]  ;;  %v1005_v12 = vld [vmem:[#allocation2 + $0x10] sm:$0xf]  ;;  %v1051_v13 = vld [vmem:[#allocation2 + $0x14] sm:$0x1]  ;;  %v613_v17 = vsel %vm8191_vm8, %v605_v1, %v612_v3  ;;  %v909_v18 = vsel %vm8207_vm10, %v614_v4, %v908_v2 }
  0x3a   : > { %v1094_v14 = vshrl.u32 %v1004_v6, 16  ;;  %v1097_v16 = vshll.u32 %v1004_v6, 16  ;;  %906 = vst [vmem:[#allocation2 + $0x24] sm:$0xf] %v905_v9  ;;  %v1103_v19 = vshll.u32 %v1005_v12, 16  ;;  %v1107_v20 = vshrl.u32 %v1005_v12, 16  ;;  %vm8564_vm13 = vmor %vm2096_vm11, %vm2097_vm12 }
  0x3b   : > { %v1113_v21 = vshll.u32 %v1051_v13, 16  ;;  %v2920_v24 = vld [vmem:[#allocation2 + $0x10] sm:$0xf]  ;;  %907 = vst [vmem:[#allocation2 + $0x28] sm:$0xf] %v613_v17  ;;  %v2968_v29 = vshrl.u32 %v2919_v7, 16 }
  0x3c   : > { %910 = vst [vmem:[#allocation2 + $0x2c] sm:$0x1] %v909_v18  ;;  %v1096_v26 = vrot.slane %v1094_v14, 4  ;;  %v1099_v27 = vrot.slane %v1097_v16, 5  ;;  %v8246_v28 = vld [vmem:[#allocation2 + $0x14] sm:$0x1] }
  0x3d   : > { %v2971_v30 = vshll.u32 %v2919_v7, 16  ;;  %v1105_v32 = vrot.slane %v1103_v19, 5  ;;  %v1109_v34 = vrot.slane %v1107_v20, 4  ;;  %v1115_v35 = vrot.slane %v1113_v21, 5  ;;  %v2922_v41 = vld [vmem:[#allocation2 + $0x18] sm:$0xf] }
  0x3e   : > { %v2977_v36 = vshll.u32 %v2920_v24, 16  ;;  %v1100_v37 = vor.u32 %v1099_v27, %v1096_v26  ;;  %v2970_v38 = vrot.slane %v2968_v29, 4  ;;  %v2981_v40 = vshrl.u32 %v2920_v24, 16  ;;  %v8250_v47 = vld [vmem:[#allocation2 + $0x1c] sm:$0xf]  ;;  %v8258_v0 = vld [vmem:[%s8128_s22 + $0x28] sm:$0xff]  }
  0x3f   : > { %v2973_v39 = vrot.slane %v2971_v30, 5  ;;  %v1110_v42 = vor.u32 %v1109_v34, %v1105_v32  ;;  %v2987_v44 = vshll.u32 %v8246_v28, 16  ;;  %v3742_v46 = vrot.slane %v8246_v28, 5  ;;  %v8252_v55 = vld [vmem:[#allocation2 + $0x20] sm:$0x1]  ;;  %v7854_v14 = vld [vmem:[%s9927_s3 + $0x8] sm:$0xff]  }
  0x40   : > { %v2979_v43 = vrot.slane %v2977_v36, 5  ;;  %v1101_v48 = vrot.slane %v1100_v37, 4  ;;  %v2983_v50 = vrot.slane %v2981_v40, 4  ;;  %v2992_v51 = vshrl.u32 %v2922_v41, 16  ;;  %v1006_v6 = vld [vmem:[#allocation2 + $0x18] sm:$0xf] }
  0x41   : > { %v2974_v49 = vor.u32 %v2973_v39, %v2970_v38  ;;  %v1111_v52 = vrot.slane %v1110_v42, 4  ;;  %v2989_v54 = vrot.slane %v2987_v44, 5  ;;  %v2995_v56 = vshll.u32 %v2922_v41, 16  ;;  %v1007_v19 = vld [vmem:[#allocation2 + $0x1c] sm:$0xf]  ;;  %v7857_v38 = vld [vmem:[%s9927_s3 + $0x10] sm:$0xff]  }
  0x42   : > { %v3001_v57 = vshll.u32 %v8250_v47, 16  ;;  %v1106_v58 = vsel %vm8152_vm2, %v1101_v48, %v1105_v32  ;;  %v2984_v62 = vor.u32 %v2983_v50, %v2979_v43  ;;  %v2994_v63 = vrot.slane %v2992_v51, 4  ;;  %v1052_v20 = vld [vmem:[#allocation2 + $0x20] sm:$0x1]  ;;  %v1008_v30 = vld [vmem:[#allocation2 + $0x24] sm:$0xf] }
  0x43   : > { %v2975_v61 = vrot.slane %v2974_v49, 4  ;;  %v1116_v1 = vsel %vm8152_vm2, %v1111_v52, %v1115_v35  ;;  %v2997_v2 = vrot.slane %v2995_v56, 5  ;;  %v3005_v4 = vshrl.u32 %v8250_v47, 16  ;;  %v1009_v37 = vld [vmem:[#allocation2 + $0x28] sm:$0xf] }
  0x44   : > { %v3003_v3 = vrot.slane %v3001_v57, 5  ;;  %v6257_v7 = vcombine.low %v1106_v58, %v1116_v1  ;;  %v2985_v12 = vrot.slane %v2984_v62, 4  ;;  %v3011_v13 = vshll.u32 %v8252_v55, 16  ;;  %v2925_v44 = vld [vmem:[#allocation2 + $0x24] sm:$0xf]  ;;  %v7853_v51 = vld [vmem:[%s9927_s3 + $0x148] sm:$0xff]  }
  0x45   : > { %v2980_v9 = vsel %vm8152_vm2, %v2975_v61, %v2979_v43  ;;  %v2998_v16 = vor.u32 %v2997_v2, %v2994_v63  ;;  %v3007_v17 = vrot.slane %v3005_v4, 4  ;;  %v3746_v18 = vrot.slane %v8250_v47, 5  ;;  %v1053_v43 = vld [vmem:[#allocation2 + $0x2c] sm:$0x1]  ;;  %v2926_v1 = vld [vmem:[#allocation2 + $0x28] sm:$0xf] }
  0x46   : > { %v6754_v21 = vunpack.c.l.bf16 %v8258_v0  ;;  %7139 = vmatmul.mubr.bf16.vlgmr.msra.gmra.mrb[0].mxu1 %v6257_v7  ;;  %v2990_v24 = vsel %vm8152_vm2, %v2985_v12, %v2989_v54  ;;  %v3749_v26 = vrot.slane %v8252_v55, 5  ;;  %v1118_v27 = vshrl.u32 %v1006_v6, 16  ;;  %v7860_v2 = vld [vmem:[%s9927_s3 + $0x18] sm:$0xff]  }
  0x47   : > { %v1121_v29 = vshll.u32 %v1006_v6, 16  ;;  %v6416_v32 = vcombine.low %v2980_v9, %v2990_v24  ;;  %7171 = vmatpush3.bf16.msra.mxu1 %v8175_v53  ;;  %v2999_v34 = vrot.slane %v2998_v16, 4  ;;  %v3008_v35 = vor.u32 %v3007_v17, %v3003_v3 }
  0x48   : > { %v3013_v36 = vrot.slane %v3011_v13, 5  ;;  %v1120_v39 = vrot.slane %v1118_v27, 4  ;;  %v1127_v41 = vshll.u32 %v1007_v19, 16  ;;  %v1131_v42 = vshrl.u32 %v1007_v19, 16  ;;  %7172 = vmatprep.subr.bf16.mxu1 %v7854_v14 }
  0x49   : > { %v1123_v40 = vrot.slane %v1121_v29, 5  ;;  %7330 = vmatprep.mubr.bf16.mxu0 %v6416_v32  ;;  %v3004_v48 = vsel %vm8152_vm2, %v2999_v34, %v3003_v3  ;;  %v3009_v53 = vrot.slane %v3008_v35, 4  ;;  %v1137_v49 = vshll.u32 %v1052_v20, 16 }
  0x4a   : > { %v1142_v50 = vshrl.u32 %v1008_v30, 16  ;;  %v1129_v54 = vrot.slane %v1127_v41, 5  ;;  %v1133_v56 = vrot.slane %v1131_v42, 4  ;;  %v1145_v57 = vshll.u32 %v1008_v30, 16 }
  0x4b   : > { %v1124_v52 = vor.u32 %v1123_v40, %v1120_v39  ;;  %v3014_v58 = vsel %vm8152_vm2, %v3009_v53, %v3013_v36  ;;  %v1139_v61 = vrot.slane %v1137_v49, 5  ;;  %v1151_v63 = vshll.u32 %v1009_v37, 16  ;;  %7173 = vmatpush3.bf16.msra.mxu1 %v7854_v14  ;;  %v2927_v14 = vld [vmem:[#allocation2 + $0x2c] sm:$0x1]  ;;  %v7855_v39 = vld [vmem:[%s9927_s3 + $0x150] sm:$0xff]  }
  0x4c   : > { %v1144_v62 = vrot.slane %v1142_v50, 4  ;;  %v6417_v3 = vcombine.low %v3004_v48, %v3014_v58  ;;  %v1134_v6 = vor.u32 %v1133_v56, %v1129_v54  ;;  %v1147_v7 = vrot.slane %v1145_v57, 5  ;;  %7174 = vmatprep.subr.bf16.mxu1 %v7857_v38 }
  0x4d   : > { %v1125_v4 = vrot.slane %v1124_v52, 4  ;;  %v1153_v9 = vrot.slane %v1151_v63, 5  ;;  %v1155_v12 = vshrl.u32 %v1009_v37, 16  ;;  %v1161_v13 = vshll.u32 %v1053_v43, 16 }
  0x4e   : > { %v3016_v16 = vshrl.u32 %v2925_v44, 16  ;;  %7331 = vmatmul.mubr.bf16.vlgmr.msra.gmra.mrb[0].mxu0 %v6417_v3  ;;  %v1135_v19 = vrot.slane %v1134_v6, 4  ;;  %v1148_v20 = vor.u32 %v1147_v7, %v1144_v62  ;;  %v3019_v24 = vshll.u32 %v2925_v44, 16  ;;  %v915_v6 = vld [vmem:[#allocation2 + $0x38] sm:$0x1] }
  0x4f   : > { %v1130_v17 = vsel %vm8152_vm2, %v1125_v4, %v1129_v54  ;;  %7363 = vmatpush3.bf16.msra.mxu0 %v8182_v60  ;;  %v1157_v27 = vrot.slane %v1155_v12, 4  ;;  %v1163_v29 = vrot.slane %v1161_v13, 5  ;;  %v3025_v32 = vshll.u32 %v2926_v1, 16  ;;  %7175 = vmatpush3.bf16.msra.mxu1 %v7857_v38  ;;  %v7863_v60 = vld [vmem:[%s9927_s3 + $0x20] sm:$0xff]  }
  0x50   : > { %v3018_v30 = vrot.slane %v3016_v16, 4  ;;  %7364 = vmatprep.subr.bf16.mxu0 %v7853_v51  ;;  %v1140_v34 = vsel %vm8152_vm2, %v1135_v19, %v1139_v61  ;;  %v1149_v35 = vrot.slane %v1148_v20, 4  ;;  %v3021_v36 = vrot.slane %v3019_v24, 5  ;;  %7176 = vmatprep.subr.bf16.mxu1 %v7860_v2  ;;  %v7858_v16 = vld [vmem:[%s9927_s3 + $0x160] sm:$0xff]  }
  0x51   : > { %v3029_v37 = vshrl.u32 %v2926_v1, 16  ;;  %v6258_v40 = vcombine.low %v1130_v17, %v1140_v34  ;;  %v1158_v41 = vor.u32 %v1157_v27, %v1153_v9  ;;  %v3027_v42 = vrot.slane %v3025_v32, 5 }
  0x52   : > { %v3035_v38 = vshll.u32 %v2927_v14, 16  ;;  %v1154_v43 = vsel %vm8152_vm2, %v1149_v35, %v1153_v9  ;;  %v3022_v44 = vor.u32 %v3021_v36, %v3018_v30  ;;  %v386_v53 = vmax.f32 %v8236_v10, 0.0  ;;  %v7856_v10 = vld [vmem:[%s9927_s3 + $0x158] sm:$0xff]   ;;  %v6881_v35 = vld [vmem:[%s8128_s22 + $0x30] sm:$0xff]  }
  0x53   : > { %v3031_v48 = vrot.slane %v3029_v37, 4  ;;  %7365 = vmatpush3.bf16.msra.mxu0 %v7853_v51  ;;  %7142 = vmatprep.mubr.bf16.mxu1 %v6258_v40  ;;  %v1159_v49 = vrot.slane %v1158_v41, 4  ;;  %v6674_v52 = vpack.c.bf16 %v385_v5, %v385_v5  ;;  %v318_v54 = vmul.f32 %v6751_v11, %v8136_v23  ;;  %v7865_v11 = vld [vmem:[%s9927_s3 + $0x28] sm:$0xff]  }
  0x54   : > { %v3037_v50 = vrot.slane %v3035_v38, 5  ;;  %v3023_v56 = vrot.slane %v3022_v44, 4  ;;  %7366 = vmatprep.subr.bf16.mxu0 %v7855_v39  ;;  %v6675_v58 = vpack.c.bf16 %v386_v53, %v386_v53  ;;  %v355_v51 = vadd.f32 %v8148_v31, %v8244_v25  ;;  %7177 = vmatpush3.bf16.msra.mxu1 %v7860_v2  ;;  %v911_v25 = vld [vmem:[#allocation2 + $0x30] sm:$0xf] }
  0x55   : > { %v3032_v57 = vor.u32 %v3031_v48, %v3027_v42  ;;  %v1164_v59 = vsel %vm8152_vm2, %v1159_v49, %v1163_v29  ;;  %v616_v5 = vshrl.u32 %v6674_v52, 16  ;;  %v619_v61 = vshll.u32 %v6674_v52, 16  ;;  %7178 = vmatprep.subr.bf16.mxu1 %v7863_v60  ;;  %v922_v48 = vld [vmem:[#allocation2 + $0x44] sm:$0x1] }
  0x56   : > { %v356_v45 = vadd.f32 %v8148_v31, %v318_v54  ;;  %v6259_v62 = vcombine.low %v1154_v43, %v1164_v59  ;;  %v3028_v63 = vsel %vm8152_vm2, %v3023_v56, %v3027_v42  ;;  %v624_v3 = vshrl.u32 %v6675_v58, 16  ;;  %v918_v43 = vld [vmem:[#allocation2 + $0x3c] sm:$0xf] }
  0x57   : > { %v3033_v1 = vrot.slane %v3032_v57, 4  ;;  %v618_v2 = vrot.slane %v616_v5, 7  ;;  %v627_v4 = vshll.u32 %v6675_v58, 16  ;;  %7367 = vmatpush3.bf16.msra.mxu0 %v7855_v39  ;;  %v387_v7 = vmax.f32 %v355_v51, 0.0  ;;  %v7859_v39 = vld [vmem:[%s9927_s3 + $0x168] sm:$0xff]   ;;  %v7861_v5 = vld [vmem:[%s9927_s3 + $0x170] sm:$0xff]  }
  0x58   : > { %v388_v9 = vmax.f32 %v356_v45, 0.0  ;;  %7143 = vmatmul.mubr.bf16.gmra.mrb[4].mxu1 %v6259_v62  ;;  %v626_v13 = vrot.slane %v624_v3, 7  ;;  %7368 = vmatprep.subr.bf16.mxu0 %v7856_v10  ;;  %v6755_v17 = vunpack.c.h.bf16 %v8258_v0  ;;  %v319_v19 = vmul.f32 %v6754_v21, %v8136_v23 }
  0x59   : > { %v3038_v12 = vsel %vm8152_vm2, %v3033_v1, %v3037_v50  ;;  %v621_v14 = vor.u32 %v619_v61, %v618_v2  ;;  %v622_v24 = vrot.slane %v618_v2, 4  ;;  %v6676_v27 = vpack.c.bf16 %v387_v7, %v387_v7  ;;  %7179 = vmatpush3.bf16.msra.mxu1 %v7863_v60  ;;  %v6882_v60 = vld [vmem:[%s8128_s22 + $0x38] sm:$0xff]  }
  0x5a   : > { %v6418_v20 = vcombine.low %v3028_v63, %v3038_v12  ;;  %v629_v29 = vor.u32 %v627_v4, %v626_v13  ;;  %v631_v30 = vrot.slane %v626_v13, 4  ;;  %v6677_v32 = vpack.c.bf16 %v388_v9, %v388_v9  ;;  %7180 = vmatprep.subr.bf16.mxu1 %v7865_v11  ;;  %v8352_v63 = vld [vmem:[%s8128_s22 + $0x40] sm:$0xff]   ;;  %v7862_v12 = vld [vmem:[%s9927_s3 + $0x178] sm:$0xff]   ;;  %v7867_v13 = vld [vmem:[%s9927_s3 + $0x30] sm:$0xff]  }
  0x5b   : > { %v320_v34 = vmul.f32 %v6755_v17, %v8136_v23  ;;  %v912_v36 = vsel %vm8200_vm9, %v621_v14, %v911_v25  ;;  %7369 = vmatpush3.bf16.msra.mxu0 %v7856_v10  ;;  %v633_v0 = vshrl.u32 %v6676_v27, 16  ;;  %v636_v21 = vshll.u32 %v6676_v27, 16 }
  0x5c   : > { %7334 = vmatprep.mubr.bf16.mxu0 %v6418_v20  ;;  %v357_v37 = vadd.f32 %v8148_v31, %v319_v19  ;;  %v630_v40 = vsel %vm8191_vm8, %v622_v24, %v629_v29  ;;  %913 = vst [vmem:[#allocation2 + $0x30] sm:$0xf] %v912_v36  ;;  %v916_v41 = vsel %vm8207_vm10, %v631_v30, %v915_v6  ;;  %v641_v42 = vshrl.u32 %v6677_v32, 16 }
  0x5d   : > { %v644_v38 = vshll.u32 %v6677_v32, 16  ;;  %7370 = vmatprep.subr.bf16.mxu0 %v7858_v16  ;;  %914 = vst [vmem:[#allocation2 + $0x34] sm:$0xf] %v630_v40  ;;  %917 = vst [vmem:[#allocation2 + $0x38] sm:$0x1] %v916_v41  ;;  %v635_v44 = vrot.slane %v633_v0, 7  ;;  %v358_v53 = vadd.f32 %v8148_v31, %v320_v34  ;;  %v6758_v50 = vunpack.c.l.bf16 %v6881_v35  ;;  %7181 = vmatpush3.bf16.msra.mxu1 %v7865_v11 }
  0x5e   : > { %v389_v49 = vmax.f32 %v357_v37, 0.0  ;;  %v643_v52 = vrot.slane %v641_v42, 7  ;;  %v6759_v54 = vunpack.c.h.bf16 %v6881_v35  ;;  %v6762_v56 = vunpack.c.l.bf16 %v6882_v60  ;;  %7182 = vmatprep.subr.bf16.mxu1 %v7867_v13 }
  0x5f   : > { %v6763_v57 = vunpack.c.h.bf16 %v6882_v60  ;;  %v638_v58 = vor.u32 %v636_v21, %v635_v44  ;;  %v639_v10 = vrot.slane %v635_v44, 4  ;;  %v390_v51 = vmax.f32 %v358_v53, 0.0  ;;  %7371 = vmatpush3.bf16.msra.mxu0 %v7858_v16 }
  0x60   : > { %v8344_v59 = vpack.c.bf16 %v389_v49, %v389_v49  ;;  %v646_v61 = vor.u32 %v644_v38, %v643_v52  ;;  %v648_v45 = vrot.slane %v643_v52, 4  ;;  %7372 = vmatprep.subr.bf16.mxu0 %v7859_v39  ;;  %v321_v11 = vmul.f32 %v6758_v50, %v8136_v23 }
  0x61   : > { %v322_v62 = vmul.f32 %v6759_v54, %v8136_v23  ;;  %v919_v1 = vsel %vm8200_vm9, %v638_v58, %v918_v43  ;;  %v8356_v3 = vpack.c.bf16 %v390_v51, %v390_v51  ;;  %v323_v14 = vmul.f32 %v6762_v56, %v8136_v23  ;;  %7183 = vmatpush3.bf16.msra.mxu1 %v7867_v13  ;;  %v8395_v54 = vld [vmem:[%s9927_s3 + $0x180] sm:$0xff]  }
  0x62   : > { %v650_v25 = vshrl.u32 %v8344_v59, 16  ;;  %v653_v2 = vshll.u32 %v8344_v59, 16  ;;  %v647_v4 = vsel %vm8191_vm8, %v639_v10, %v646_v61  ;;  %920 = vst [vmem:[#allocation2 + $0x3c] sm:$0xf] %v919_v1  ;;  %v923_v6 = vsel %vm8207_vm10, %v648_v45, %v922_v48 }
  0x63   : > { %v8365_v7 = vadd.f32 %v8148_v31, %v321_v11  ;;  %v8368_v9 = vadd.f32 %v8148_v31, %v322_v62  ;;  %v2928_v16 = vld [vmem:[#allocation2 + $0x30] sm:$0xf]  ;;  %921 = vst [vmem:[#allocation2 + $0x40] sm:$0xf] %v647_v4  ;;  %924 = vst [vmem:[#allocation2 + $0x44] sm:$0x1] %v923_v6  ;;  %7373 = vmatpush3.bf16.msra.mxu0 %v7859_v39  ;;  %v8381_v24 = vmul.f32 %v6763_v57, %v8136_v23 }
  0x64   : > { %v1010_v17 = vld [vmem:[#allocation2 + $0x30] sm:$0xf]  ;;  %v8376_v19 = vrot.slane %v650_v25, 7  ;;  %v658_v20 = vshrl.u32 %v8356_v3, 16  ;;  %v8383_v27 = vld [vmem:[#allocation2 + $0x34] sm:$0xf]  ;;  %7374 = vmatprep.subr.bf16.mxu0 %v7861_v5  ;;  %v6766_v34 = vunpack.c.l.bf16 %v8352_v63  ;;  %v6767_v35 = vunpack.c.h.bf16 %v8352_v63 }
  0x65   : > { %v8385_v29 = vld [vmem:[#allocation2 + $0x38] sm:$0x1]  ;;  %v3040_v30 = vshrl.u32 %v2928_v16, 16  ;;  %v3043_v32 = vshll.u32 %v2928_v16, 16  ;;  %v3049_v36 = vshll.u32 %v8383_v27, 16  ;;  %v3053_v0 = vshrl.u32 %v8383_v27, 16 }
  0x66   : > { %v3059_v21 = vshll.u32 %v8385_v29, 16  ;;  %v1011_v23 = vld [vmem:[#allocation2 + $0x34] sm:$0xf]  ;;  %v1166_v37 = vshrl.u32 %v1010_v17, 16  ;;  %v1054_v40 = vld [vmem:[#allocation2 + $0x38] sm:$0x1]  ;;  %v655_v10 = vor.u32 %v653_v2, %v8376_v19  ;;  %v8400_v11 = vadd.f32 %v8148_v31, %v323_v14 }
  0x67   : > { %v3042_v39 = vrot.slane %v3040_v30, 4  ;;  %v3045_v60 = vrot.slane %v3043_v32, 5  ;;  %v1169_v41 = vshll.u32 %v1010_v17, 16  ;;  %v1175_v42 = vshll.u32 %v1011_v23, 16  ;;  %7375 = vmatpush3.bf16.msra.mxu0 %v7861_v5 }
  0x68   : > { %v3051_v38 = vrot.slane %v3049_v36, 5  ;;  %v3055_v43 = vrot.slane %v3053_v0, 4  ;;  %v3061_v44 = vrot.slane %v3059_v21, 5  ;;  %v1168_v48 = vrot.slane %v1166_v37, 4  ;;  %7376 = vmatprep.subr.bf16.mxu0 %v7862_v12 }
  0x69   : > { %v3046_v53 = vor.u32 %v3045_v60, %v3042_v39  ;;  %v1171_v49 = vrot.slane %v1169_v41, 5  ;;  %v1177_v50 = vrot.slane %v1175_v42, 5  ;;  %v1179_v52 = vshrl.u32 %v1011_v23, 16  ;;  %v1012_v58 = vld [vmem:[#allocation2 + $0x3c] sm:$0xf] }
  0x6a   : > { %v3056_v56 = vor.u32 %v3055_v43, %v3051_v38  ;;  %v1185_v57 = vshll.u32 %v1054_v40, 16  ;;  %v656_v51 = vrot.slane %v8376_v19, 4  ;;  %v1013_v45 = vld [vmem:[#allocation2 + $0x40] sm:$0xf]  ;;  %v1190_v25 = vshrl.u32 %v1012_v58, 16 }
  0x6b   : > { %v3047_v59 = vrot.slane %v3046_v53, 4  ;;  %v1172_v61 = vor.u32 %v1171_v49, %v1168_v48  ;;  %v1181_v5 = vrot.slane %v1179_v52, 4  ;;  %v1193_v4 = vshll.u32 %v1012_v58, 16  ;;  %7377 = vmatpush3.bf16.msra.mxu0 %v7862_v12  ;;  %v1055_v2 = vld [vmem:[#allocation2 + $0x44] sm:$0x1] }
  0x6c   : > { %v3057_v62 = vrot.slane %v3056_v56, 4  ;;  %v1187_v1 = vrot.slane %v1185_v57, 5  ;;  %v1199_v17 = vshll.u32 %v1013_v45, 16  ;;  %v2931_v30 = vld [vmem:[#allocation2 + $0x3c] sm:$0xf]  ;;  %7410 = vmatprep.subr.bf16.mxu0 %v8395_v54  ;;  %v1192_v31 = vrot.slane %v1190_v25, 4 }
  0x6d   : > { %v3052_v6 = vsel %vm8152_vm2, %v3047_v59, %v3051_v38  ;;  %v1173_v13 = vrot.slane %v1172_v61, 4  ;;  %v1182_v16 = vor.u32 %v1181_v5, %v1177_v50  ;;  %v1195_v14 = vrot.slane %v1193_v4, 5  ;;  %v8407_v0 = vld [vmem:[#allocation2 + $0x40] sm:$0xf]  ;;  %v2933_v39 = vld [vmem:[#allocation2 + $0x44] sm:$0x1] }
  0x6e   : > { %v3062_v32 = vsel %vm8152_vm2, %v3057_v62, %v3061_v44  ;;  %v1203_v36 = vshrl.u32 %v1013_v45, 16  ;;  %v1201_v37 = vrot.slane %v1199_v17, 5  ;;  %v1209_v41 = vshll.u32 %v1055_v2, 16  ;;  %v925_v38 = vld [vmem:[#allocation2 + $0x48] sm:$0xf] }
  0x6f   : > { %v6419_v21 = vcombine.low %v3052_v6, %v3062_v32  ;;  %v1178_v12 = vsel %vm8152_vm2, %v1173_v13, %v1177_v50  ;;  %v1183_v23 = vrot.slane %v1182_v16, 4  ;;  %v1196_v60 = vor.u32 %v1195_v14, %v1192_v31  ;;  %v929_v5 = vld [vmem:[#allocation2 + $0x50] sm:$0x1]  ;;  %v8453_v19 = vld [vmem:[%s9925_s1] ss:$0 sm:$0xff] }
  0x70   : > { %v1205_v40 = vrot.slane %v1203_v36, 4  ;;  %v3064_v42 = vshrl.u32 %v2931_v30, 16  ;;  %v3067_v44 = vshll.u32 %v2931_v30, 16  ;;  %v3073_v48 = vshll.u32 %v8407_v0, 16 }
  0x71   : > { %7335 = vmatmul.mubr.bf16.gmra.mrb[4].mxu0 %v6419_v21  ;;  %v1188_v43 = vsel %vm8152_vm2, %v1183_v23, %v1187_v1  ;;  %v3077_v53 = vshrl.u32 %v8407_v0, 16  ;;  %v1197_v52 = vrot.slane %v1196_v60, 4  ;;  %v1211_v56 = vrot.slane %v1209_v41, 5 }
  0x72   : > { %v6260_v49 = vcombine.low %v1178_v12, %v1188_v43  ;;  %v1206_v50 = vor.u32 %v1205_v40, %v1201_v37  ;;  %v3066_v57 = vrot.slane %v3064_v42, 4  ;;  %v3069_v58 = vrot.slane %v3067_v44, 5 }
  0x73   : > { %v3075_v59 = vrot.slane %v3073_v48, 5  ;;  %v3079_v61 = vrot.slane %v3077_v53, 4  ;;  %v1202_v45 = vsel %vm8152_vm2, %v1197_v52, %v1201_v37  ;;  %v3083_v1 = vshll.u32 %v2933_v39, 16  ;;  %v8465_v52 = vld [vmem:[%s8128_s22 + $0x48] sm:$0xff]  }
  0x74   : > { %7146 = vmatprep.mubr.bf16.mxu1 %v6260_v49  ;;  %v1207_v62 = vrot.slane %v1206_v50, 4  ;;  %v660_v25 = vrot.slane %v658_v20, 7  ;;  %v3070_v4 = vor.u32 %v3069_v58, %v3066_v57  ;;  %v661_v13 = vshll.u32 %v8356_v3, 16 }
  0x75   : > { %v3080_v6 = vor.u32 %v3079_v61, %v3075_v59  ;;  %v926_v16 = vsel %vm8200_vm9, %v655_v10, %v925_v38  ;;  %v3085_v17 = vrot.slane %v3083_v1, 5  ;;  %v391_v32 = vmax.f32 %v8365_v7, 0.0  ;;  %v8431_v10 = vld [vmem:[%s9926_s2] ss:$0 sm:$0xff] }
  0x76   : > { %v1212_v2 = vsel %vm8152_vm2, %v1207_v62, %v1211_v56  ;;  %v665_v30 = vrot.slane %v660_v25, 4  ;;  %927 = vst [vmem:[#allocation2 + $0x48] sm:$0xf] %v926_v16  ;;  %v3071_v14 = vrot.slane %v3070_v4, 4  ;;  %v663_v21 = vor.u32 %v661_v13, %v660_v25  ;;  %v932_v62 = vld [vmem:[#allocation2 + $0x54] sm:$0xf] }
  0x77   : > { %v6261_v31 = vcombine.low %v1202_v45, %v1212_v2  ;;  %v3081_v36 = vrot.slane %v3080_v6, 4  ;;  %v392_v3 = vmax.f32 %v8368_v9, 0.0  ;;  %v6680_v12 = vpack.c.bf16 %v391_v32, %v391_v32 }
  0x78   : > { %v930_v20 = vsel %vm8207_vm10, %v665_v30, %v929_v5  ;;  %v362_v23 = vadd.f32 %v8431_v10, %v8381_v24  ;;  %v3076_v7 = vsel %vm8152_vm2, %v3071_v14, %v3075_v59  ;;  %v664_v9 = vsel %vm8191_vm8, %v656_v51, %v663_v21 }
  0x79   : > { %7147 = vmatmul.mubr.bf16.gmra.mrb[8].mxu1 %v6261_v31  ;;  %v3086_v37 = vsel %vm8152_vm2, %v3081_v36, %v3085_v17  ;;  %931 = vst [vmem:[#allocation2 + $0x50] sm:$0x1] %v930_v20  ;;  %v393_v39 = vmax.f32 %v8400_v11, 0.0  ;;  %v8446_v60 = vrot.slane %v3746_v18, 4  ;;  %928 = vst [vmem:[#allocation2 + $0x4c] sm:$0xf] %v664_v9  ;;  %v6681_v40 = vpack.c.bf16 %v392_v3, %v392_v3 }
  0x7a   : > { %v6420_v24 = vcombine.low %v3076_v7, %v3086_v37  ;;  %v667_v41 = vshrl.u32 %v6680_v12, 16  ;;  %v670_v42 = vshll.u32 %v6680_v12, 16  ;;  %v394_v38 = vmax.f32 %v362_v23, 0.0  ;;  %v7869_v11 = vld [vmem:[%s9927_s3 + $0x38] sm:$0xff]  }
  0x7b   : > { %v8448_v43 = vpack.c.bf16 %v393_v39, %v393_v39  ;;  %v325_v51 = vmul.f32 %v8453_v19, %v6766_v34  ;;  %v675_v48 = vshrl.u32 %v6681_v40, 16  ;;  %v678_v53 = vshll.u32 %v6681_v40, 16  ;;  %7184 = vmatprep.subr.bf16.mxu1 %v7869_v11  ;;  %v936_v40 = vld [vmem:[#allocation2 + $0x5c] sm:$0x1] }
  0x7c   : > { %7338 = vmatprep.mubr.bf16.mxu0 %v6420_v24  ;;  %v669_v44 = vrot.slane %v667_v41, 7  ;;  %v326_v49 = vmul.f32 %v8453_v19, %v6767_v35  ;;  %v8467_v57 = vpack.c.bf16 %v394_v38, %v394_v38  ;;  %7185 = vmatpush3.bf16.msra.mxu1 %v7869_v11  ;;  %v6770_v30 = vunpack.c.l.bf16 %v8465_v52  ;;  %v7873_v41 = vld [vmem:[%s9927_s3 + $0x80] sm:$0xff]  }
  0x7d   : > { %v2934_v50 = vld [vmem:[#allocation2 + $0x48] sm:$0xf]  ;;  %v684_v34 = vshrl.u32 %v8448_v43, 16  ;;  %v687_v58 = vshll.u32 %v8448_v43, 16  ;;  %v8472_v59 = vadd.f32 %v8431_v10, %v325_v51  ;;  %v677_v25 = vrot.slane %v675_v48, 7  ;;  %7218 = vmatprep.subr.bf16.mxu1 %v7873_v41 }
  0x7e   : > { %v1014_v56 = vld [vmem:[#allocation2 + $0x48] sm:$0xf]  ;;  %v3088_v61 = vshrl.u32 %v2934_v50, 16  ;;  %v3091_v5 = vshll.u32 %v2934_v50, 16  ;;  %v672_v35 = vor.u32 %v670_v42, %v669_v44  ;;  %v673_v1 = vrot.slane %v669_v44, 4 }
  0x7f   : > { %v1214_v45 = vshrl.u32 %v1014_v56, 16  ;;  %v1217_v63 = vshll.u32 %v1014_v56, 16  ;;  %v8474_v4 = vrot.slane %v684_v34, 7  ;;  %v8479_v17 = vadd.f32 %v8431_v10, %v326_v49  ;;  %v939_v11 = vld [vmem:[#allocation2 + $0x60] sm:$0xf] }
  0x80   : > { %v8476_v6 = vld [vmem:[#allocation2 + $0x50] sm:$0x1]  ;;  %v3090_v13 = vrot.slane %v3088_v61, 4  ;;  %v3093_v16 = vrot.slane %v3091_v5, 5  ;;  %v8482_v32 = vld [vmem:[#allocation2 + $0x4c] sm:$0xf]  ;;  %v680_v21 = vor.u32 %v678_v53, %v677_v25  ;;  %v933_v20 = vsel %vm8200_vm9, %v672_v35, %v932_v62 }
  0x81   : > { %v1056_v2 = vld [vmem:[#allocation2 + $0x50] sm:$0x1]  ;;  %v3107_v31 = vshll.u32 %v8476_v6, 16  ;;  %v1015_v14 = vld [vmem:[#allocation2 + $0x4c] sm:$0xf]  ;;  %v1216_v36 = vrot.slane %v1214_v45, 4  ;;  %v689_v45 = vor.u32 %v687_v58, %v8474_v4 }
  0x82   : > { %v3094_v3 = vor.u32 %v3093_v16, %v3090_v13  ;;  %v3097_v12 = vshll.u32 %v8482_v32, 16  ;;  %v3101_v23 = vshrl.u32 %v8482_v32, 16  ;;  %v1219_v7 = vrot.slane %v1217_v63, 5  ;;  %934 = vst [vmem:[#allocation2 + $0x54] sm:$0xf] %v933_v20 }
  0x83   : > { %v3109_v37 = vrot.slane %v3107_v31, 5  ;;  %v1223_v9 = vshll.u32 %v1015_v14, 16  ;;  %v1227_v39 = vshrl.u32 %v1015_v14, 16  ;;  %v1233_v24 = vshll.u32 %v1056_v2, 16  ;;  %v7976_v8 = vld [vmem:[#allocation2 + $0x48] sm:$0xf] }
  0x84   : > { %v3095_v42 = vrot.slane %v3094_v3, 4  ;;  %v3099_v38 = vrot.slane %v3097_v12, 5  ;;  %v3103_v43 = vrot.slane %v3101_v23, 4  ;;  %v1220_v51 = vor.u32 %v1219_v7, %v1216_v36 }
  0x85   : > { %v1225_v44 = vrot.slane %v1223_v9, 5  ;;  %v1229_v48 = vrot.slane %v1227_v39, 4  ;;  %v1235_v53 = vrot.slane %v1233_v24, 5  ;;  %v681_v49 = vsel %vm8191_vm8, %v673_v1, %v680_v21  ;;  %v943_v9 = vld [vmem:[#allocation2 + $0x68] sm:$0x1] }
  0x86   : > { %v3100_v50 = vsel %vm8152_vm2, %v3095_v42, %v3099_v38  ;;  %v3104_v56 = vor.u32 %v3103_v43, %v3099_v38  ;;  %v1221_v34 = vrot.slane %v1220_v51, 4  ;;  %v682_v61 = vrot.slane %v677_v25, 4  ;;  %935 = vst [vmem:[#allocation2 + $0x58] sm:$0xf] %v681_v49 }
  0x87   : > { %v1230_v5 = vor.u32 %v1229_v48, %v1225_v44  ;;  %v690_v63 = vrot.slane %v8474_v4, 4  ;;  %v692_v62 = vshrl.u32 %v8467_v57, 16  ;;  %v695_v16 = vshll.u32 %v8467_v57, 16 }
  0x88   : > { %v3105_v35 = vrot.slane %v3104_v56, 4  ;;  %v1226_v13 = vsel %vm8152_vm2, %v1221_v34, %v1225_v44  ;;  %v937_v1 = vsel %vm8207_vm10, %v682_v61, %v936_v40  ;;  %v940_v58 = vsel %vm8200_vm9, %v689_v45, %v939_v11 }
  0x89   : > { %v1231_v2 = vrot.slane %v1230_v5, 4  ;;  %938 = vst [vmem:[#allocation2 + $0x5c] sm:$0x1] %v937_v1  ;;  %v1016_v25 = vld [vmem:[#allocation2 + $0x54] sm:$0xf]  ;;  %v694_v14 = vrot.slane %v692_v62, 7  ;;  %v6771_v4 = vunpack.c.h.bf16 %v8465_v52  ;;  %v8518_v11 = vmul.f32 %v8453_v19, %v6770_v30 }
  0x8a   : > { %v2937_v31 = vld [vmem:[#allocation2 + $0x54] sm:$0xf]  ;;  %v3110_v36 = vsel %vm8152_vm2, %v3105_v35, %v3109_v37  ;;  %v1238_v21 = vshrl.u32 %v1016_v25, 16  ;;  %v1241_v20 = vshll.u32 %v1016_v25, 16  ;;  %941 = vst [vmem:[#allocation2 + $0x60] sm:$0xf] %v940_v58 }
  0x8b   : > { %v3112_v3 = vshrl.u32 %v2937_v31, 16  ;;  %v6421_v12 = vcombine.low %v3100_v50, %v3110_v36  ;;  %v1236_v57 = vsel %vm8152_vm2, %v1231_v2, %v1235_v53  ;;  %v3115_v23 = vshll.u32 %v2937_v31, 16 }
  0x8c   : > { %v697_v7 = vor.u32 %v695_v16, %v694_v14  ;;  %v6262_v39 = vcombine.low %v1226_v13, %v1236_v57  ;;  %v1240_v24 = vrot.slane %v1238_v21, 4  ;;  %v1243_v40 = vrot.slane %v1241_v20, 5 }
  0x8d   : > { %v3114_v41 = vrot.slane %v3112_v3, 4  ;;  %7339 = vmatmul.mubr.bf16.gmra.mrb[8].mxu0 %v6421_v12  ;;  %v1017_v42 = vld [vmem:[#allocation2 + $0x58] sm:$0xf]  ;;  %v3117_v37 = vrot.slane %v3115_v23, 5  ;;  %v699_v51 = vrot.slane %v694_v14, 4  ;;  %v395_v61 = vmax.f32 %v8472_v59, 0.0 }
  0x8e   : > { %v8511_v38 = vld [vmem:[#allocation2 + $0x58] sm:$0xf]  ;;  %v698_v43 = vsel %vm8191_vm8, %v690_v63, %v697_v7  ;;  %7150 = vmatprep.mubr.bf16.mxu1 %v6262_v39  ;;  %v1244_v44 = vor.u32 %v1243_v40, %v1240_v24  ;;  %v1247_v48 = vshll.u32 %v1017_v42, 16  ;;  %v1251_v53 = vshrl.u32 %v1017_v42, 16 }
  0x8f   : > { %v3121_v49 = vshll.u32 %v8511_v38, 16  ;;  %942 = vst [vmem:[#allocation2 + $0x64] sm:$0xf] %v698_v43  ;;  %v3118_v50 = vor.u32 %v3117_v37, %v3114_v41  ;;  %v3125_v56 = vshrl.u32 %v8511_v38, 16  ;;  %v944_v34 = vsel %vm8207_vm10, %v699_v51, %v943_v9 }
  0x90   : > { %v1057_v5 = vld [vmem:[#allocation2 + $0x5c] sm:$0x1]  ;;  %v1245_v45 = vrot.slane %v1244_v44, 4  ;;  %v1249_v63 = vrot.slane %v1247_v48, 5  ;;  %v1253_v30 = vrot.slane %v1251_v53, 4  ;;  %v396_v2 = vmax.f32 %v8479_v17, 0.0 }
  0x91   : > { %v3123_v62 = vrot.slane %v3121_v49, 5  ;;  %945 = vst [vmem:[#allocation2 + $0x68] sm:$0x1] %v944_v34  ;;  %v1257_v35 = vshll.u32 %v1057_v5, 16  ;;  %v8525_v13 = vld [vmem:[#allocation2 + $0x5c] sm:$0x1]  ;;  %v8531_v36 = vpack.c.bf16 %v395_v61, %v395_v61  ;;  %v8542_v42 = vmul.f32 %v8453_v19, %v6771_v4 }
  0x92   : > { %v3119_v1 = vrot.slane %v3118_v50, 4  ;;  %v3127_v16 = vrot.slane %v3125_v56, 4  ;;  %v1250_v25 = vsel %vm8152_vm2, %v1245_v45, %v1249_v63  ;;  %v1254_v31 = vor.u32 %v1253_v30, %v1249_v63  ;;  %v2940_v59 = vld [vmem:[#allocation2 + $0x60] sm:$0xf] }
  0x93   : > { %v3131_v14 = vshll.u32 %v8525_v13, 16  ;;  %v1018_v58 = vld [vmem:[#allocation2 + $0x60] sm:$0xf]  ;;  %v1259_v21 = vrot.slane %v1257_v35, 5  ;;  %v3136_v12 = vshrl.u32 %v2940_v59, 16  ;;  %v3139_v7 = vshll.u32 %v2940_v59, 16 }
  0x94   : > { %v3124_v20 = vsel %vm8152_vm2, %v3119_v1, %v3123_v62  ;;  %v3128_v3 = vor.u32 %v3127_v16, %v3123_v62  ;;  %v1255_v57 = vrot.slane %v1254_v31, 4  ;;  %v1262_v17 = vshrl.u32 %v1018_v58, 16 }
  0x95   : > { %v3133_v23 = vrot.slane %v3131_v14, 5  ;;  %v3138_v24 = vrot.slane %v3136_v12, 4  ;;  %v8537_v41 = vpack.c.bf16 %v396_v2, %v396_v2  ;;  %v3141_v43 = vrot.slane %v3139_v7, 5 }
  0x96   : > { %v3129_v9 = vrot.slane %v3128_v3, 4  ;;  %v8535_v39 = vld [vmem:[#allocation2 + $0x64] sm:$0xf]  ;;  %v1260_v37 = vsel %vm8152_vm2, %v1255_v57, %v1259_v21  ;;  %v1264_v56 = vrot.slane %v1262_v17, 4  ;;  %v1265_v52 = vshll.u32 %v1018_v58, 16 }
  0x97   : > { %v1019_v40 = vld [vmem:[#allocation2 + $0x64] sm:$0xf]  ;;  %v3145_v51 = vshll.u32 %v8535_v39, 16  ;;  %v3149_v44 = vshrl.u32 %v8535_v39, 16  ;;  %v6263_v48 = vcombine.low %v1250_v25, %v1260_v37  ;;  %v3142_v4 = vor.u32 %v3141_v43, %v3138_v24  ;;  %v3673_v58 = vld [vmem:[#allocation2 + $0xc] sm:$0xe] }
  0x98   : > { %v3134_v53 = vsel %vm8152_vm2, %v3129_v9, %v3133_v23  ;;  %v8550_v49 = vld [vmem:[#allocation2 + $0x68] sm:$0x1]  ;;  %v1267_v63 = vrot.slane %v1265_v52, 5  ;;  %v1271_v30 = vshll.u32 %v1019_v40, 16  ;;  %v1275_v62 = vshrl.u32 %v1019_v40, 16 }
  0x99   : > { %v1058_v50 = vld [vmem:[#allocation2 + $0x68] sm:$0x1]  ;;  %v6422_v34 = vcombine.low %v3124_v20, %v3134_v53  ;;  %v3147_v61 = vrot.slane %v3145_v51, 5  ;;  %v3151_v5 = vrot.slane %v3149_v44, 4  ;;  %7151 = vmatmul.mubr.bf16.gmra.mrb[12].mxu1 %v6263_v48  ;;  %v3155_v45 = vshll.u32 %v8550_v49, 16 }
  0x9a   : > { %v3143_v35 = vrot.slane %v3142_v4, 4  ;;  %v1281_v16 = vshll.u32 %v1058_v50, 16  ;;  %v701_v2 = vshrl.u32 %v8531_v36, 16  ;;  %v1268_v31 = vor.u32 %v1267_v63, %v1264_v56  ;;  %v3674_v21 = vld [vmem:[#allocation2 + $0x18] sm:$0xe] }
  0x9b   : > { %7342 = vmatprep.mubr.bf16.mxu0 %v6422_v34  ;;  %v3152_v1 = vor.u32 %v3151_v5, %v3147_v61  ;;  %v3157_v25 = vrot.slane %v3155_v45, 5  ;;  %v1273_v14 = vrot.slane %v1271_v30, 5  ;;  %v1277_v59 = vrot.slane %v1275_v62, 4  ;;  %v946_v23 = vld [vmem:[#allocation2 + $0x6c] sm:$0xf] }
  0x9c   : > { %v3148_v20 = vsel %vm8152_vm2, %v3143_v35, %v3147_v61  ;;  %v1283_v12 = vrot.slane %v1281_v16, 5  ;;  %v703_v57 = vrot.slane %v701_v2, 7  ;;  %v1269_v7 = vrot.slane %v1268_v31, 4  ;;  %v950_v50 = vld [vmem:[#allocation2 + $0x74] sm:$0x1] }
  0x9d   : > { %v3153_v3 = vrot.slane %v3152_v1, 4  ;;  %v1278_v17 = vor.u32 %v1277_v59, %v1273_v14  ;;  %v704_v9 = vshll.u32 %v8531_v36, 16  ;;  %v709_v24 = vshrl.u32 %v8537_v41, 16  ;;  %v6885_v36 = vld [vmem:[%s8128_s22 + $0x50] sm:$0xff]  }
  0x9e   : > { %v707_v37 = vrot.slane %v703_v57, 4  ;;  %v712_v43 = vshll.u32 %v8537_v41, 16  ;;  %v1274_v44 = vsel %vm8152_vm2, %v1269_v7, %v1273_v14  ;;  %v6440_v34 = vrot.slane %v3673_v58, 9  ;;  %v7957_v4 = vld [vmem:[#allocation2 + $0x10] sm:$0xf] }
  0x9f   : > { %v3158_v40 = vsel %vm8152_vm2, %v3153_v3, %v3157_v25  ;;  %v1279_v48 = vrot.slane %v1278_v17, 4  ;;  %v706_v53 = vor.u32 %v704_v9, %v703_v57  ;;  %v711_v52 = vrot.slane %v709_v24, 7  ;;  %v7958_v57 = vld [vmem:[#allocation2 + $0x28] sm:$0xf] }
  0xa0   : > { %v6423_v51 = vcombine.low %v3148_v20, %v3158_v40  ;;  %v3739_v61 = vrot.slane %v7957_v4, 5  ;;  %v6441_v5 = vrot.slane %v3674_v21, 9  ;;  %v3750_v63 = vsel %vm8564_vm13, %v8446_v60, %v3749_v26  ;;  %v3675_v60 = vld [vmem:[#allocation2 + $0x24] sm:$0xe]  ;;  %v7866_v21 = vld [vmem:[%s9927_s3 + $0x188] sm:$0xff]  }
  0xa1   : > { %v1284_v41 = vsel %vm8152_vm2, %v1279_v48, %v1283_v12  ;;  %v947_v45 = vsel %vm8200_vm9, %v706_v53, %v946_v23  ;;  %v365_v30 = vadd.f32 %v8431_v10, %v8518_v11  ;;  %v714_v35 = vor.u32 %v712_v43, %v711_v52 }
  0xa2   : > { %7343 = vmatmul.mubr.bf16.gmra.mrb[12].mxu0 %v6423_v51  ;;  %v6264_v62 = vcombine.low %v1274_v44, %v1284_v41  ;;  %v716_v1 = vrot.slane %v711_v52, 4  ;;  %948 = vst [vmem:[#allocation2 + $0x6c] sm:$0xf] %v947_v45  ;;  %v3740_v16 = vsel %vm8564_vm13, %v6440_v34, %v3739_v61  ;;  %v3741_v2 = vrot.slane %v3739_v61, 4  ;;  %v953_v45 = vld [vmem:[#allocation2 + $0x78] sm:$0xf] }
  0xa3   : > { %v3747_v55 = vsel %vm8564_vm13, %v6441_v5, %v3746_v18  ;;  %v366_v25 = vadd.f32 %v8431_v10, %v8542_v42  ;;  %v397_v26 = vmax.f32 %v365_v30, 0.0  ;;  %v715_v11 = vsel %vm8191_vm8, %v707_v37, %v714_v35  ;;  %v7959_v37 = vld [vmem:[#allocation2 + $0x2c] sm:$0x1]  ;;  %v7868_v30 = vld [vmem:[%s9927_s3 + $0x190] sm:$0xff]  }
  0xa4   : > { %7154 = vmatprep.mubr.bf16.mxu1 %v6264_v62  ;;  %v951_v31 = vsel %vm8207_vm10, %v716_v1, %v950_v50  ;;  %v6473_v14 = vcombine.low %v3747_v55, %v3750_v63  ;;  %v6774_v59 = vunpack.c.l.bf16 %v6885_v36  ;;  %949 = vst [vmem:[#allocation2 + $0x70] sm:$0xf] %v715_v11  ;;  %v3743_v47 = vsel %vm8564_vm13, %v3741_v2, %v3742_v46  ;;  %v957_v11 = vld [vmem:[#allocation2 + $0x80] sm:$0x1] }
  0xa5   : > { %952 = vst [vmem:[#allocation2 + $0x74] sm:$0x1] %v951_v31  ;;  %v398_v18 = vmax.f32 %v366_v25, 0.0  ;;  %v6686_v42 = vpack.c.bf16 %v397_v26, %v397_v26  ;;  %v6775_v58 = vunpack.c.h.bf16 %v6885_v36  ;;  %v6472_v20 = vcombine.low %v3740_v16, %v3743_v47 }
  0xa6   : > { %v329_v3 = vmul.f32 %v8453_v19, %v6774_v59  ;;  %v6442_v12 = vrot.slane %v3675_v60, 9  ;;  %v3753_v23 = vrot.slane %v7958_v57, 5  ;;  %v3756_v43 = vrot.slane %v7959_v37, 5 }
  0xa7   : > { %v6687_v7 = vpack.c.bf16 %v398_v18, %v398_v18  ;;  %v718_v17 = vshrl.u32 %v6686_v42, 16  ;;  %v721_v9 = vshll.u32 %v6686_v42, 16  ;;  %v330_v28 = vmul.f32 %v8453_v19, %v6775_v58  ;;  %7378 = vmatprep.mubr.bf16.mxu0 %v6472_v20  ;;  %v3676_v18 = vld [vmem:[#allocation2 + $0x30] sm:$0xe] }
  0xa8   : > { %v367_v46 = vadd.f32 %v8431_v10, %v329_v3  ;;  %v3754_v24 = vsel %vm8564_vm13, %v6442_v12, %v3753_v23  ;;  %v3755_v40 = vrot.slane %v3753_v23, 4  ;;  %v7870_v12 = vld [vmem:[%s9927_s3 + $0x198] sm:$0xff]  }
  0xa9   : > { %v1020_v51 = vld [vmem:[#allocation2 + $0x6c] sm:$0xf]  ;;  %v720_v44 = vrot.slane %v718_v17, 7  ;;  %v726_v48 = vshrl.u32 %v6687_v7, 16  ;;  %v729_v53 = vshll.u32 %v6687_v7, 16  ;;  %v368_v50 = vadd.f32 %v8431_v10, %v330_v28 }
  0xaa   : > { %7379 = vmatmul.mubr.bf16.vlgmr.msra.gmra.mrb[0].mxu0 %v6473_v14  ;;  %v1286_v36 = vshrl.u32 %v1020_v51, 16  ;;  %v1289_v52 = vshll.u32 %v1020_v51, 16  ;;  %v399_v34 = vmax.f32 %v367_v46, 0.0  ;;  %v3757_v4 = vsel %vm8564_vm13, %v3755_v40, %v3756_v43 }
  0xab   : > { %7411 = vmatpush3.bf16.msra.mxu0 %v8395_v54  ;;  %v723_v61 = vor.u32 %v721_v9, %v720_v44  ;;  %v724_v5 = vrot.slane %v720_v44, 4  ;;  %v728_v41 = vrot.slane %v726_v48, 7  ;;  %v400_v63 = vmax.f32 %v368_v50, 0.0  ;;  %v1021_v62 = vld [vmem:[#allocation2 + $0x70] sm:$0xf] }
  0xac   : > { %7412 = vmatprep.subr.bf16.mxu0 %v7866_v21  ;;  %v1059_v35 = vld [vmem:[#allocation2 + $0x74] sm:$0x1]  ;;  %v1288_v1 = vrot.slane %v1286_v36, 4  ;;  %v1291_v16 = vrot.slane %v1289_v52, 5  ;;  %v6688_v2 = vpack.c.bf16 %v399_v34, %v399_v34  ;;  %v6474_v54 = vcombine.low %v3754_v24, %v3757_v4  ;;  %v960_v24 = vld [vmem:[#allocation2 + $0x84] sm:$0xf] }
  0xad   : > { %v1295_v55 = vshll.u32 %v1021_v62, 16  ;;  %v1299_v25 = vshrl.u32 %v1021_v62, 16  ;;  %v1305_v26 = vshll.u32 %v1059_v35, 16  ;;  %v731_v60 = vor.u32 %v729_v53, %v728_v41  ;;  %v964_v50 = vld [vmem:[#allocation2 + $0x8c] sm:$0x1]  ;;  %v7874_v34 = vld [vmem:[%s9927_s3 + $0x1a0] sm:$0xff]  }
  0xae   : > { %v1292_v31 = vor.u32 %v1291_v16, %v1288_v1  ;;  %v733_v14 = vrot.slane %v728_v41, 4  ;;  %v954_v59 = vsel %vm8200_vm9, %v723_v61, %v953_v45  ;;  %v6689_v47 = vpack.c.bf16 %v400_v63, %v400_v63  ;;  %7382 = vmatprep.mubr.bf16.mxu0 %v6474_v54 }
  0xaf   : > { %7413 = vmatpush3.bf16.msra.mxu0 %v7866_v21  ;;  %v1297_v42 = vrot.slane %v1295_v55, 5  ;;  %v1301_v58 = vrot.slane %v1299_v25, 4  ;;  %v1307_v20 = vrot.slane %v1305_v26, 5  ;;  %v732_v3 = vsel %vm8191_vm8, %v724_v5, %v731_v60  ;;  %955 = vst [vmem:[#allocation2 + $0x78] sm:$0xf] %v954_v59  ;;  %v6886_v21 = vld [vmem:[%s8128_s22 + $0x58] sm:$0xff]  }
  0xb0   : > { %7414 = vmatprep.subr.bf16.mxu0 %v7868_v30  ;;  %v1293_v57 = vrot.slane %v1292_v31, 4  ;;  %956 = vst [vmem:[#allocation2 + $0x7c] sm:$0xf] %v732_v3  ;;  %v958_v23 = vsel %vm8207_vm10, %v733_v14, %v957_v11  ;;  %v735_v7 = vshrl.u32 %v6688_v2, 16  ;;  %v738_v17 = vshll.u32 %v6688_v2, 16  ;;  %v6887_v2 = vld [vmem:[%s8128_s22 + $0x60] sm:$0xff]  }
  0xb1   : > { %v1302_v9 = vor.u32 %v1301_v58, %v1297_v42  ;;  %959 = vst [vmem:[#allocation2 + $0x80] sm:$0x1] %v958_v23  ;;  %v743_v28 = vshrl.u32 %v6689_v47, 16  ;;  %v746_v46 = vshll.u32 %v6689_v47, 16  ;;  %v6443_v40 = vrot.slane %v3676_v18, 9 }
  0xb2   : > { %v1298_v37 = vsel %vm8152_vm2, %v1293_v57, %v1297_v42  ;;  %v737_v43 = vrot.slane %v735_v7, 7  ;;  %v3760_v51 = vrot.slane %v8383_v27, 5  ;;  %v3763_v44 = vrot.slane %v8385_v29, 5  ;;  %v8643_v11 = vld [vmem:[#allocation2 + $0x3c] sm:$0xe]  ;;  %v7878_v42 = vld [vmem:[%s9927_s3 + $0x1a8] sm:$0xff]  }
  0xb3   : > { %7415 = vmatpush3.bf16.msra.mxu0 %v7868_v30  ;;  %v1303_v48 = vrot.slane %v1302_v9, 4  ;;  %v745_v53 = vrot.slane %v743_v28, 7  ;;  %v6778_v36 = vunpack.c.l.bf16 %v6886_v21  ;;  %v6779_v52 = vunpack.c.h.bf16 %v6886_v21 }
  0xb4   : > { %7416 = vmatprep.subr.bf16.mxu0 %v7870_v12  ;;  %v740_v4 = vor.u32 %v738_v17, %v737_v43  ;;  %v741_v61 = vrot.slane %v737_v43, 4  ;;  %v3761_v5 = vsel %vm8564_vm13, %v6443_v40, %v3760_v51  ;;  %v3762_v27 = vrot.slane %v3760_v51, 4  ;;  %v7882_v51 = vld [vmem:[%s9927_s3 + $0x1b0] sm:$0xff]  }
  0xb5   : > { %v1308_v29 = vsel %vm8152_vm2, %v1303_v48, %v1307_v20  ;;  %v748_v41 = vor.u32 %v746_v46, %v745_v53  ;;  %v750_v45 = vrot.slane %v745_v53, 4  ;;  %v331_v63 = vmul.f32 %v8453_v19, %v6778_v36 }
  0xb6   : > { %v6265_v30 = vcombine.low %v1298_v37, %v1308_v29  ;;  %v1022_v62 = vld [vmem:[#allocation2 + $0x78] sm:$0xf]  ;;  %v961_v35 = vsel %vm8200_vm9, %v740_v4, %v960_v24  ;;  %v3764_v1 = vsel %vm8564_vm13, %v3762_v27, %v3763_v44  ;;  %v332_v16 = vmul.f32 %v8453_v19, %v6779_v52 }
  0xb7   : > { %7417 = vmatpush3.bf16.msra.mxu0 %v7870_v12  ;;  %v1023_v54 = vld [vmem:[#allocation2 + $0x7c] sm:$0xf]  ;;  %v1310_v55 = vshrl.u32 %v1022_v62, 16  ;;  %v1313_v25 = vshll.u32 %v1022_v62, 16  ;;  %v749_v26 = vsel %vm8191_vm8, %v741_v61, %v748_v41  ;;  %962 = vst [vmem:[#allocation2 + $0x84] sm:$0xf] %v961_v35  ;;  %v965_v60 = vsel %vm8207_vm10, %v750_v45, %v964_v50 }
  0xb8   : > { %7418 = vmatprep.subr.bf16.mxu0 %v7874_v34  ;;  %7155 = vmatmul.mubr.bf16.gmra.mrb[16].mxu1 %v6265_v30  ;;  %v1060_v31 = vld [vmem:[#allocation2 + $0x80] sm:$0x1]  ;;  %v1319_v14 = vshll.u32 %v1023_v54, 16  ;;  %v1323_v59 = vshrl.u32 %v1023_v54, 16  ;;  %963 = vst [vmem:[#allocation2 + $0x88] sm:$0xf] %v749_v26  ;;  %v6475_v47 = vcombine.low %v3761_v5, %v3764_v1  ;;  %v369_v18 = vadd.f32 %v8431_v10, %v331_v63 }
  0xb9   : > { %966 = vst [vmem:[#allocation2 + $0x8c] sm:$0x1] %v965_v60  ;;  %v1312_v58 = vrot.slane %v1310_v55, 4  ;;  %v1315_v20 = vrot.slane %v1313_v25, 5  ;;  %v1329_v3 = vshll.u32 %v1060_v31, 16  ;;  %v370_v12 = vadd.f32 %v8431_v10, %v332_v16  ;;  %v7886_v35 = vld [vmem:[%s9927_s3 + $0x1b8] sm:$0xff]  }
  0xba   : > { %v1321_v57 = vrot.slane %v1319_v14, 5  ;;  %v1325_v23 = vrot.slane %v1323_v59, 4  ;;  %7383 = vmatmul.mubr.bf16.gmra.mrb[4].mxu0 %v6475_v47  ;;  %v401_v7 = vmax.f32 %v369_v18, 0.0  ;;  %v6782_v17 = vunpack.c.l.bf16 %v6887_v2  ;;  %v967_v60 = vld [vmem:[#allocation2 + $0x90] sm:$0xf] }
  0xbb   : > { %v1316_v21 = vor.u32 %v1315_v20, %v1312_v58  ;;  %v1331_v9 = vrot.slane %v1329_v3, 5  ;;  %v402_v28 = vmax.f32 %v370_v12, 0.0  ;;  %v6783_v46 = vunpack.c.h.bf16 %v6887_v2  ;;  %7419 = vmatpush3.bf16.msra.mxu0 %v7874_v34  ;;  %v3678_v47 = vld [vmem:[#allocation2 + $0x48] sm:$0xe]  ;;  %v8677_v3 = vld [vmem:[%s9927_s3 + $0x1c0] sm:$0xff]  }
  0xbc   : > { %v1326_v24 = vor.u32 %v1325_v23, %v1321_v57  ;;  %v6690_v40 = vpack.c.bf16 %v401_v7, %v401_v7  ;;  %v333_v37 = vmul.f32 %v8453_v19, %v6782_v17  ;;  %v6444_v43 = vrot.slane %v8643_v11, 9  ;;  %7420 = vmatprep.subr.bf16.mxu0 %v7878_v42  ;;  %v971_v23 = vld [vmem:[#allocation2 + $0x98] sm:$0x1] }
  0xbd   : > { %v1317_v44 = vrot.slane %v1316_v21, 4  ;;  %v6691_v48 = vpack.c.bf16 %v402_v28, %v402_v28  ;;  %v334_v53 = vmul.f32 %v8453_v19, %v6783_v46  ;;  %v3767_v50 = vrot.slane %v8407_v0, 5 }
  0xbe   : > { %v1327_v36 = vrot.slane %v1326_v24, 4  ;;  %v8657_v52 = vld [vmem:[#allocation2 + $0x84] sm:$0xf]  ;;  %v752_v34 = vshrl.u32 %v6690_v40, 16  ;;  %v755_v4 = vshll.u32 %v6690_v40, 16  ;;  %v371_v61 = vadd.f32 %v8431_v10, %v333_v37 }
  0xbf   : > { %v1322_v5 = vsel %vm8152_vm2, %v1317_v44, %v1321_v57  ;;  %v8662_v27 = vld [vmem:[#allocation2 + $0x88] sm:$0xf]  ;;  %v1334_v41 = vshrl.u32 %v8657_v52, 16  ;;  %v1337_v45 = vshll.u32 %v8657_v52, 16  ;;  %v372_v19 = vadd.f32 %v8431_v10, %v334_v53  ;;  %7421 = vmatpush3.bf16.msra.mxu0 %v7878_v42  ;;  %v7960_v37 = vld [vmem:[#allocation2 + $0x44] sm:$0x1] }
  0xc0   : > { %v1061_v29 = vld [vmem:[#allocation2 + $0x8c] sm:$0x1]  ;;  %v1332_v0 = vsel %vm8152_vm2, %v1327_v36, %v1331_v9  ;;  %v1343_v63 = vshll.u32 %v8662_v27, 16  ;;  %v1347_v30 = vshrl.u32 %v8662_v27, 16  ;;  %7422 = vmatprep.subr.bf16.mxu0 %v7882_v51  ;;  %v754_v54 = vrot.slane %v752_v34, 7 }
  0xc1   : > { %v1353_v62 = vshll.u32 %v1061_v29, 16  ;;  %v6266_v1 = vcombine.low %v1322_v5, %v1332_v0  ;;  %v1336_v16 = vrot.slane %v1334_v41, 4  ;;  %v1339_v2 = vrot.slane %v1337_v45, 5  ;;  %v6888_v36 = vld [vmem:[%s8128_s22 + $0x68] sm:$0xff]   ;;  %v974_v29 = vld [vmem:[#allocation2 + $0x9c] sm:$0xf] }
  0xc2   : > { %v1345_v55 = vrot.slane %v1343_v63, 5  ;;  %v1349_v10 = vrot.slane %v1347_v30, 4  ;;  %v760_v26 = vshrl.u32 %v6691_v48, 16  ;;  %v757_v31 = vor.u32 %v755_v4, %v754_v54  ;;  %v978_v30 = vld [vmem:[#allocation2 + $0xa4] sm:$0x1] }
  0xc3   : > { %v1355_v25 = vrot.slane %v1353_v62, 5  ;;  %7158 = vmatprep.mubr.bf16.mxu1 %v6266_v1  ;;  %v1340_v11 = vor.u32 %v1339_v2, %v1336_v16  ;;  %v758_v14 = vrot.slane %v754_v54, 4  ;;  %v763_v59 = vshll.u32 %v6691_v48, 16  ;;  %7423 = vmatpush3.bf16.msra.mxu0 %v7882_v51 }
  0xc4   : > { %v1350_v18 = vor.u32 %v1349_v10, %v1345_v55  ;;  %v762_v42 = vrot.slane %v760_v26, 7  ;;  %v403_v58 = vmax.f32 %v371_v61, 0.0  ;;  %v404_v20 = vmax.f32 %v372_v19, 0.0  ;;  %7424 = vmatprep.subr.bf16.mxu0 %v7886_v35 }
  0xc5   : > { %v1341_v12 = vrot.slane %v1340_v11, 4  ;;  %v968_v57 = vsel %vm8200_vm9, %v757_v31, %v967_v60  ;;  %v3768_v7 = vsel %vm8564_vm13, %v6444_v43, %v3767_v50  ;;  %v3769_v17 = vrot.slane %v3767_v50, 4  ;;  %v6889_v11 = vld [vmem:[%s8128_s22 + $0x70] sm:$0xff]  }
  0xc6   : > { %v1351_v21 = vrot.slane %v1350_v18, 4  ;;  %v765_v9 = vor.u32 %v763_v59, %v762_v42  ;;  %v767_v28 = vrot.slane %v762_v42, 4  ;;  %969 = vst [vmem:[#allocation2 + $0x90] sm:$0xf] %v968_v57  ;;  %v6692_v46 = vpack.c.bf16 %v403_v58, %v403_v58 }
  0xc7   : > { %v1346_v24 = vsel %vm8152_vm2, %v1341_v12, %v1345_v55  ;;  %v6693_v40 = vpack.c.bf16 %v404_v20, %v404_v20  ;;  %v3770_v51 = vrot.slane %v7960_v37, 5  ;;  %v6445_v44 = vrot.slane %v3678_v47, 9  ;;  %7425 = vmatpush3.bf16.msra.mxu0 %v7886_v35  ;;  %v8722_v20 = vld [vmem:[%s9926_s2] ss:$0 sm:$0xff] }
  0xc8   : > { %v1356_v48 = vsel %vm8152_vm2, %v1351_v21, %v1355_v25  ;;  %v766_v43 = vsel %vm8191_vm8, %v758_v14, %v765_v9  ;;  %v972_v53 = vsel %vm8207_vm10, %v767_v28, %v971_v23  ;;  %v769_v50 = vshrl.u32 %v6692_v46, 16  ;;  %7458 = vmatprep.subr.bf16.mxu0 %v8677_v3 }
  0xc9   : > { %v6267_v34 = vcombine.low %v1346_v24, %v1356_v48  ;;  %970 = vst [vmem:[#allocation2 + $0x94] sm:$0xf] %v766_v43  ;;  %973 = vst [vmem:[#allocation2 + $0x98] sm:$0x1] %v972_v53  ;;  %v772_v4 = vshll.u32 %v6692_v46, 16  ;;  %v777_v61 = vshrl.u32 %v6693_v40, 16  ;;  %v3771_v45 = vsel %vm8564_vm13, %v3769_v17, %v3770_v51 }
  0xca   : > { %v780_v5 = vshll.u32 %v6693_v40, 16  ;;  %v771_v41 = vrot.slane %v769_v50, 7  ;;  %v3774_v19 = vrot.slane %v8482_v32, 5  ;;  %v3777_v0 = vrot.slane %v8476_v6, 5  ;;  %v8704_v6 = vld [vmem:[%s9925_s1] ss:$0 sm:$0xff] }
  0xcb   : > { %7159 = vmatmul.mubr.bf16.gmra.mrb[20].mxu1 %v6267_v34  ;;  %v779_v63 = vrot.slane %v777_v61, 7  ;;  %v6476_v62 = vcombine.low %v3768_v7, %v3771_v45  ;;  %v6786_v35 = vunpack.c.l.bf16 %v6888_v36  ;;  %v6787_v1 = vunpack.c.h.bf16 %v6888_v36  ;;  %v3679_v36 = vld [vmem:[#allocation2 + $0x54] sm:$0xe] }
  0xcc   : > { %v774_v16 = vor.u32 %v772_v4, %v771_v41  ;;  %v775_v2 = vrot.slane %v771_v41, 4  ;;  %v3775_v54 = vsel %vm8564_vm13, %v6445_v44, %v3774_v19  ;;  %v3776_v55 = vrot.slane %v3774_v19, 4 }
  0xcd   : > { %v8699_v10 = vld [vmem:[#allocation2 + $0x90] sm:$0xf]  ;;  %v782_v25 = vor.u32 %v780_v5, %v779_v63  ;;  %v784_v26 = vrot.slane %v779_v63, 4  ;;  %7386 = vmatprep.mubr.bf16.mxu0 %v6476_v62  ;;  %v335_v32 = vmul.f32 %v8704_v6, %v6786_v35  ;;  %v336_v60 = vmul.f32 %v8704_v6, %v6787_v1 }
  0xce   : > { %v1358_v31 = vshrl.u32 %v8699_v10, 16  ;;  %v1361_v14 = vshll.u32 %v8699_v10, 16  ;;  %v975_v59 = vsel %vm8200_vm9, %v774_v16, %v974_v29  ;;  %v3778_v47 = vsel %vm8564_vm13, %v3776_v55, %v3777_v0 }
  0xcf   : > { %v783_v18 = vsel %vm8191_vm8, %v775_v2, %v782_v25  ;;  %976 = vst [vmem:[#allocation2 + $0x9c] sm:$0xf] %v975_v59  ;;  %v979_v42 = vsel %vm8207_vm10, %v784_v26, %v978_v30  ;;  %v6477_v58 = vcombine.low %v3775_v54, %v3778_v47  ;;  %v373_v12 = vadd.f32 %v8722_v20, %v335_v32  ;;  %v981_v47 = vld [vmem:[#allocation2 + $0xa8] sm:$0xf] }
  0xd0   : > { %v8725_v57 = vld [vmem:[#allocation2 + $0x94] sm:$0xf]  ;;  %v1062_v23 = vld [vmem:[#allocation2 + $0x98] sm:$0x1]  ;;  %v1360_v7 = vrot.slane %v1358_v31, 4  ;;  %v1363_v17 = vrot.slane %v1361_v14, 5  ;;  %v374_v21 = vadd.f32 %v8722_v20, %v336_v60  ;;  %v6790_v9 = vunpack.c.l.bf16 %v6889_v11 }
  0xd1   : > { %977 = vst [vmem:[#allocation2 + $0xa0] sm:$0xf] %v783_v18  ;;  %980 = vst [vmem:[#allocation2 + $0xa4] sm:$0x1] %v979_v42  ;;  %v1367_v28 = vshll.u32 %v8725_v57, 16  ;;  %v1371_v46 = vshrl.u32 %v8725_v57, 16  ;;  %7387 = vmatmul.mubr.bf16.gmra.mrb[8].mxu0 %v6477_v58  ;;  %v6791_v44 = vunpack.c.h.bf16 %v6889_v11 }
  0xd2   : > { %v1377_v24 = vshll.u32 %v1062_v23, 16  ;;  %v405_v40 = vmax.f32 %v373_v12, 0.0  ;;  %v1364_v37 = vor.u32 %v1363_v17, %v1360_v7  ;;  %v406_v51 = vmax.f32 %v374_v21, 0.0 }
  0xd3   : > { %v337_v48 = vmul.f32 %v8704_v6, %v6790_v9  ;;  %v1369_v43 = vrot.slane %v1367_v28, 5  ;;  %v1373_v53 = vrot.slane %v1371_v46, 4  ;;  %v338_v61 = vmul.f32 %v8704_v6, %v6791_v44  ;;  %v985_v9 = vld [vmem:[#allocation2 + $0xb0] sm:$0x1] }
  0xd4   : > { %v6694_v50 = vpack.c.bf16 %v405_v40, %v405_v40  ;;  %v1365_v34 = vrot.slane %v1364_v37, 4  ;;  %v6695_v4 = vpack.c.bf16 %v406_v51, %v406_v51  ;;  %v1379_v29 = vrot.slane %v1377_v24, 5 }
  0xd5   : > { %v1374_v5 = vor.u32 %v1373_v53, %v1369_v43  ;;  %v375_v45 = vadd.f32 %v8722_v20, %v337_v48  ;;  %v6446_v62 = vrot.slane %v3679_v36, 9  ;;  %v376_v55 = vadd.f32 %v8722_v20, %v338_v61 }
  0xd6   : > { %v786_v41 = vshrl.u32 %v6694_v50, 16  ;;  %v8733_v19 = vld [vmem:[#allocation2 + $0x9c] sm:$0xf]  ;;  %v789_v0 = vshll.u32 %v6694_v50, 16  ;;  %v794_v63 = vshrl.u32 %v6695_v4, 16  ;;  %v797_v30 = vshll.u32 %v6695_v4, 16 }
  0xd7   : > { %v1370_v35 = vsel %vm8152_vm2, %v1365_v34, %v1369_v43  ;;  %v1375_v1 = vrot.slane %v1374_v5, 4  ;;  %v1382_v54 = vshrl.u32 %v8733_v19, 16  ;;  %v1385_v25 = vshll.u32 %v8733_v19, 16 }
  0xd8   : > { %v8737_v16 = vld [vmem:[#allocation2 + $0xa0] sm:$0xf]  ;;  %v1063_v2 = vld [vmem:[#allocation2 + $0xa4] sm:$0x1]  ;;  %v788_v14 = vrot.slane %v786_v41, 7  ;;  %v796_v59 = vrot.slane %v794_v63, 7 }
  0xd9   : > { %v1391_v26 = vshll.u32 %v8737_v16, 16  ;;  %v1395_v32 = vshrl.u32 %v8737_v16, 16  ;;  %v1401_v60 = vshll.u32 %v1063_v2, 16  ;;  %v1380_v11 = vsel %vm8152_vm2, %v1375_v1, %v1379_v29  ;;  %v3680_v29 = vld [vmem:[#allocation2 + $0x60] sm:$0xe] }
  0xda   : > { %v1384_v31 = vrot.slane %v1382_v54, 4  ;;  %v6268_v18 = vcombine.low %v1370_v35, %v1380_v11  ;;  %v1387_v42 = vrot.slane %v1385_v25, 5  ;;  %v791_v7 = vor.u32 %v789_v0, %v788_v14  ;;  %v2944_v63 = vld [vmem:[#allocation2 + $0x70] sm:$0xf] }
  0xdb   : > { %v1393_v58 = vrot.slane %v1391_v26, 5  ;;  %v1397_v12 = vrot.slane %v1395_v32, 4  ;;  %v1403_v23 = vrot.slane %v1401_v60, 5  ;;  %v792_v17 = vrot.slane %v788_v14, 4  ;;  %v992_v60 = vld [vmem:[#allocation2 + $0xbc] sm:$0x1] }
  0xdc   : > { %v799_v21 = vor.u32 %v797_v30, %v796_v59  ;;  %7162 = vmatprep.mubr.bf16.mxu1 %v6268_v18  ;;  %v1388_v28 = vor.u32 %v1387_v42, %v1384_v31  ;;  %v801_v24 = vrot.slane %v796_v59, 4  ;;  %v407_v40 = vmax.f32 %v375_v45, 0.0  ;;  %v2945_v18 = vld [vmem:[#allocation2 + $0x74] sm:$0x1] }
  0xdd   : > { %v1398_v46 = vor.u32 %v1397_v12, %v1393_v58  ;;  %v982_v51 = vsel %vm8200_vm9, %v791_v7, %v981_v47  ;;  %v408_v44 = vmax.f32 %v376_v55, 0.0  ;;  %v3781_v48 = vrot.slane %v8511_v38, 5  ;;  %v988_v55 = vld [vmem:[#allocation2 + $0xb4] sm:$0xf] }
  0xde   : > { %v800_v37 = vsel %vm8191_vm8, %v792_v17, %v799_v21  ;;  %v1389_v43 = vrot.slane %v1388_v28, 4  ;;  %983 = vst [vmem:[#allocation2 + $0xa8] sm:$0xf] %v982_v51  ;;  %v986_v50 = vsel %vm8207_vm10, %v801_v24, %v985_v9  ;;  %v6696_v36 = vpack.c.bf16 %v407_v40, %v407_v40 }
  0xdf   : > { %v1399_v53 = vrot.slane %v1398_v46, 4  ;;  %984 = vst [vmem:[#allocation2 + $0xac] sm:$0xf] %v800_v37  ;;  %987 = vst [vmem:[#allocation2 + $0xb0] sm:$0x1] %v986_v50  ;;  %v6697_v34 = vpack.c.bf16 %v408_v44, %v408_v44  ;;  %v3782_v4 = vsel %vm8564_vm13, %v6446_v62, %v3781_v48  ;;  %v3783_v61 = vrot.slane %v3781_v48, 4 }
  0xe0   : > { %v3784_v5 = vrot.slane %v8525_v13, 5  ;;  %v1394_v38 = vsel %vm8152_vm2, %v1389_v43, %v1393_v58  ;;  %v803_v45 = vshrl.u32 %v6696_v36, 16  ;;  %v806_v0 = vshll.u32 %v6696_v36, 16  ;;  %v3681_v62 = vld [vmem:[#allocation2 + $0x6c] sm:$0xe] }
  0xe1   : > { %v1404_v41 = vsel %vm8152_vm2, %v1399_v53, %v1403_v23  ;;  %v811_v35 = vshrl.u32 %v6697_v34, 16  ;;  %v814_v1 = vshll.u32 %v6697_v34, 16  ;;  %v6447_v25 = vrot.slane %v3680_v29, 9 }
  0xe2   : > { %v6269_v30 = vcombine.low %v1394_v38, %v1404_v41  ;;  %v3785_v2 = vsel %vm8564_vm13, %v3783_v61, %v3784_v5  ;;  %v805_v54 = vrot.slane %v803_v45, 7  ;;  %v3788_v26 = vrot.slane %v8535_v39, 5  ;;  %v8784_v41 = vld [vmem:[#allocation2 + $0x7c] sm:$0xf] }
  0xe3   : > { %v6478_v13 = vcombine.low %v3782_v4, %v3785_v2  ;;  %v813_v32 = vrot.slane %v811_v35, 7  ;;  %v3791_v11 = vrot.slane %v8550_v49, 5  ;;  %v3795_v31 = vrot.slane %v2944_v63, 5  ;;  %v3682_v4 = vld [vmem:[#allocation2 + $0x78] sm:$0xe] }
  0xe4   : > { %7163 = vmatmul.mubr.bf16.gmra.mrb[24].mxu1 %v6269_v30  ;;  %v808_v14 = vor.u32 %v806_v0, %v805_v54  ;;  %v809_v59 = vrot.slane %v805_v54, 4  ;;  %v3790_v47 = vrot.slane %v3788_v26, 4  ;;  %v6448_v42 = vrot.slane %v3681_v62, 9  ;;  %v8788_v0 = vld [vmem:[#allocation2 + $0x80] sm:$0x1] }
  0xe5   : > { %7390 = vmatprep.mubr.bf16.mxu0 %v6478_v13  ;;  %v8764_v58 = vld [vmem:[#allocation2 + $0xa8] sm:$0xf]  ;;  %v816_v23 = vor.u32 %v814_v1, %v813_v32  ;;  %v818_v7 = vrot.slane %v813_v32, 4  ;;  %v3789_v39 = vsel %vm8564_vm13, %v6447_v25, %v3788_v26  ;;  %v3797_v17 = vrot.slane %v3795_v31, 4  ;;  %v2951_v25 = vld [vmem:[#allocation2 + $0x8c] sm:$0x1] }
  0xe6   : > { %v8766_v12 = vld [vmem:[#allocation2 + $0xac] sm:$0xf]  ;;  %v1064_v21 = vld [vmem:[#allocation2 + $0xb0] sm:$0x1]  ;;  %v1406_v49 = vshrl.u32 %v8764_v58, 16  ;;  %v1409_v9 = vshll.u32 %v8764_v58, 16  ;;  %v989_v37 = vsel %vm8200_vm9, %v808_v14, %v988_v55  ;;  %v3792_v50 = vsel %vm8564_vm13, %v3790_v47, %v3791_v11 }
  0xe7   : > { %v1415_v28 = vshll.u32 %v8766_v12, 16  ;;  %v1419_v46 = vshrl.u32 %v8766_v12, 16  ;;  %v1425_v24 = vshll.u32 %v1064_v21, 16  ;;  %v817_v40 = vsel %vm8191_vm8, %v809_v59, %v816_v23  ;;  %990 = vst [vmem:[#allocation2 + $0xb4] sm:$0xf] %v989_v37 }
  0xe8   : > { %v993_v51 = vsel %vm8207_vm10, %v818_v7, %v992_v60  ;;  %v1408_v44 = vrot.slane %v1406_v49, 4  ;;  %v1411_v48 = vrot.slane %v1409_v9, 5  ;;  %991 = vst [vmem:[#allocation2 + $0xb8] sm:$0xf] %v817_v40  ;;  %v3796_v36 = vsel %vm8564_vm13, %v6448_v42, %v3795_v31  ;;  %v2950_v13 = vld [vmem:[#allocation2 + $0x88] sm:$0xf] }
  0xe9   : > { %v1417_v43 = vrot.slane %v1415_v28, 5  ;;  %v1421_v53 = vrot.slane %v1419_v46, 4  ;;  %994 = vst [vmem:[#allocation2 + $0xbc] sm:$0x1] %v993_v51  ;;  %v3798_v34 = vrot.slane %v2945_v18, 5  ;;  %v1427_v29 = vrot.slane %v1425_v24, 5 }
  0xea   : > { %v1412_v61 = vor.u32 %v1411_v48, %v1408_v44  ;;  %v6479_v38 = vcombine.low %v3789_v39, %v3792_v50  ;;  %v6449_v1 = vrot.slane %v3682_v4, 9  ;;  %v3802_v2 = vrot.slane %v8784_v41, 5  ;;  %v3683_v26 = vld [vmem:[#allocation2 + $0x84] sm:$0xe]  ;;  %v3684_v14 = vld [vmem:[#allocation2 + $0x90] sm:$0xe] }
  0xeb   : > { %v1422_v5 = vor.u32 %v1421_v53, %v1417_v43  ;;  %v3799_v45 = vsel %vm8564_vm13, %v3797_v17, %v3798_v34  ;;  %v3805_v55 = vrot.slane %v8788_v0, 5  ;;  %v2953_v23 = vld [vmem:[#allocation2 + $0x94] sm:$0xf]  ;;  %v2954_v7 = vld [vmem:[#allocation2 + $0x98] sm:$0x1]  ;;  %v6450_v49 = vrot.slane %v3683_v26, 9 }
  0xec   : > { %v1413_v63 = vrot.slane %v1412_v61, 4  ;;  %7391 = vmatmul.mubr.bf16.gmra.mrb[12].mxu0 %v6479_v38  ;;  %v6480_v35 = vcombine.low %v3796_v36, %v3799_v45  ;;  %v3803_v17 = vsel %vm8564_vm13, %v6449_v1, %v3802_v2  ;;  %v3804_v21 = vrot.slane %v3802_v2, 4  ;;  %v3685_v9 = vld [vmem:[#allocation2 + $0x9c] sm:$0xe]  ;;  %v2956_v37 = vld [vmem:[#allocation2 + $0xa0] sm:$0xf] }
  0xed   : > { %v1423_v30 = vrot.slane %v1422_v5, 4  ;;  %v3809_v48 = vrot.slane %v2950_v13, 5  ;;  %v6451_v34 = vrot.slane %v3684_v14, 9  ;;  %v2957_v4 = vld [vmem:[#allocation2 + $0xa4] sm:$0x1]  ;;  %v3819_v38 = vrot.slane %v2954_v7, 5 }
  0xee   : > { %v1418_v62 = vsel %vm8152_vm2, %v1413_v63, %v1417_v43  ;;  %7394 = vmatprep.mubr.bf16.mxu0 %v6480_v35  ;;  %v8796_v60 = vld [vmem:[#allocation2 + $0xb4] sm:$0xf]  ;;  %v3806_v44 = vsel %vm8564_vm13, %v3804_v21, %v3805_v55  ;;  %v3812_v43 = vrot.slane %v2951_v25, 5  ;;  %v3823_v35 = vrot.slane %v2956_v37, 5  ;;  %v2959_v55 = vld [vmem:[#allocation2 + $0xac] sm:$0xf] }
  0xef   : > { %v1428_v54 = vsel %vm8152_vm2, %v1423_v30, %v1427_v29  ;;  %v8798_v11 = vld [vmem:[#allocation2 + $0xb8] sm:$0xf]  ;;  %v1430_v59 = vshrl.u32 %v8796_v60, 16  ;;  %v1433_v47 = vshll.u32 %v8796_v60, 16  ;;  %v6481_v36 = vcombine.low %v3803_v17, %v3806_v44  ;;  %v7963_v26 = vld [vmem:[#allocation2] sm:$0xf] }
  0xf0   : > { %v6270_v32 = vcombine.low %v1418_v62, %v1428_v54  ;;  %v1065_v31 = vld [vmem:[#allocation2 + $0xbc] sm:$0x1]  ;;  %v1439_v18 = vshll.u32 %v8798_v11, 16  ;;  %v1443_v42 = vshrl.u32 %v8798_v11, 16  ;;  %v3810_v61 = vsel %vm8564_vm13, %v6450_v49, %v3809_v48  ;;  %v3687_v21 = vld [vmem:[#allocation2 + $0xb4] sm:$0xe] }
  0xf1   : > { %v1449_v39 = vshll.u32 %v1065_v31, 16  ;;  %v1432_v28 = vrot.slane %v1430_v59, 4  ;;  %v1435_v46 = vrot.slane %v1433_v47, 5  ;;  %v3811_v5 = vrot.slane %v3809_v48, 4  ;;  %v2960_v59 = vld [vmem:[#allocation2 + $0xb0] sm:$0x1] }
  0xf2   : > { %7166 = vmatprep.mubr.bf16.mxu1 %v6270_v32  ;;  %v1441_v24 = vrot.slane %v1439_v18, 5  ;;  %v1445_v40 = vrot.slane %v1443_v42, 4  ;;  %v3816_v29 = vrot.slane %v2953_v23, 5  ;;  %v6452_v30 = vrot.slane %v3685_v9, 9  ;;  %v8818_v32 = vld [vmem:[#allocation2 + $0x4] sm:$0xf] }
  0xf3   : > { %v1451_v51 = vrot.slane %v1449_v39, 5  ;;  %v1436_v53 = vor.u32 %v1435_v46, %v1432_v28  ;;  %v3813_v1 = vsel %vm8564_vm13, %v3811_v5, %v3812_v43  ;;  %v3826_v54 = vrot.slane %v2957_v4, 5  ;;  %v3686_v47 = vld [vmem:[#allocation2 + $0xa8] sm:$0xe]  ;;  %v2962_v18 = vld [vmem:[#allocation2 + $0xb8] sm:$0xf] }
  0xf4   : > { %v1446_v50 = vor.u32 %v1445_v40, %v1441_v24  ;;  %7395 = vmatmul.mubr.bf16.gmra.mrb[16].mxu0 %v6481_v36  ;;  %v3817_v2 = vsel %vm8564_vm13, %v6451_v34, %v3816_v29  ;;  %v3818_v62 = vrot.slane %v3816_v29, 4  ;;  %v6280_v31 = vcombine.low %v7963_v26, %v8818_v32  ;;  %v2963_v17 = vld [vmem:[#allocation2 + $0xbc] sm:$0x1]  ;;  %v7965_v34 = vld [vmem:[#allocation2 + $0xc] sm:$0xf] }
  0xf5   : > { %v1437_v45 = vrot.slane %v1436_v53, 4  ;;  %v6482_v14 = vcombine.low %v3810_v61, %v3813_v1  ;;  %v3824_v7 = vsel %vm8564_vm13, %v6452_v30, %v3823_v35  ;;  %v3825_v39 = vrot.slane %v3823_v35, 4  ;;  %v6890_v28 = vld [vmem:[%s8128_s22 + $0x78] sm:$0xff]   ;;  %v8828_v4 = vld [vmem:[#allocation2 + $0x10] sm:$0xf] }
  0xf6   : > { %v1447_v63 = vrot.slane %v1446_v50, 4  ;;  %v3820_v23 = vsel %vm8564_vm13, %v3818_v62, %v3819_v38  ;;  %v3830_v9 = vrot.slane %v2959_v55, 5  ;;  %v3833_v40 = vrot.slane %v2960_v59, 5  ;;  %v8837_v30 = vld [vmem:[#allocation2 + $0x1c] sm:$0xf]  ;;  %v7877_v62 = vld [vmem:[%s9927_s3 + $0x88] sm:$0xff]  }
  0xf7   : > { %v1442_v13 = vsel %vm8152_vm2, %v1437_v45, %v1441_v24  ;;  %7398 = vmatprep.mubr.bf16.mxu0 %v6482_v14  ;;  %v6483_v49 = vcombine.low %v3817_v2, %v3820_v23  ;;  %v3827_v46 = vsel %vm8564_vm13, %v3825_v39, %v3826_v54  ;;  %v6453_v24 = vrot.slane %v3686_v47, 9  ;;  %v7881_v14 = vld [vmem:[%s9927_s3 + $0x90] sm:$0xff]  }
  0xf8   : > { %v1452_v25 = vsel %vm8152_vm2, %v1447_v63, %v1451_v51  ;;  %v3837_v37 = vrot.slane %v2962_v18, 5  ;;  %v6484_v51 = vcombine.low %v3824_v7, %v3827_v46  ;;  %v3832_v44 = vrot.slane %v3830_v9, 4  ;;  %v7967_v63 = vld [vmem:[#allocation2 + $0x18] sm:$0xf]  ;;  %v7970_v18 = vld [vmem:[#allocation2 + $0x24] sm:$0xf] }
  0xf9   : > { %v6271_v42 = vcombine.low %v1442_v13, %v1452_v25  ;;  %v6454_v48 = vrot.slane %v3687_v21, 9  ;;  %v3840_v43 = vrot.slane %v2963_v17, 5  ;;  %v6794_v50 = vunpack.c.l.bf16 %v6890_v28  ;;  %v7972_v21 = vld [vmem:[#allocation2 + $0x30] sm:$0xf] }
  0xfa   : > { %v3839_v53 = vrot.slane %v3837_v37, 4  ;;  %v6795_v36 = vunpack.c.h.bf16 %v6890_v28  ;;  %v6281_v61 = vcombine.low %v7965_v34, %v8828_v4  ;;  %v3831_v5 = vsel %vm8564_vm13, %v6453_v24, %v3830_v9  ;;  %v7885_v28 = vld [vmem:[%s9927_s3 + $0x98] sm:$0xff]   ;;  %v7889_v34 = vld [vmem:[%s9927_s3 + $0xa0] sm:$0xff]  }
  0xfb   : > { %7167 = vmatmul.mubr.bf16.gmra.mrb[28].mxu1 %v6271_v42  ;;  %v3834_v29 = vsel %vm8564_vm13, %v3832_v44, %v3833_v40  ;;  %v339_v38 = vmul.f32 %v8704_v6, %v6794_v50  ;;  %v6282_v35 = vcombine.low %v7967_v63, %v8837_v30  ;;  %v3838_v1 = vsel %vm8564_vm13, %v6454_v48, %v3837_v37  ;;  %v995_v40 = vld [vmem:[#allocation2 + $0xc0] sm:$0xf]  ;;  %v999_v37 = vld [vmem:[#allocation2 + $0xc8] sm:$0x1] }
  0xfc   : > { %7186 = vmatprep.mubr.bf16.mxu1 %v6280_v31  ;;  %7399 = vmatmul.mubr.bf16.gmra.mrb[20].mxu0 %v6483_v49  ;;  %v340_v45 = vmul.f32 %v8704_v6, %v6795_v36  ;;  %v3841_v2 = vsel %vm8564_vm13, %v3839_v53, %v3840_v43  ;;  %v6485_v6 = vcombine.low %v3831_v5, %v3834_v29  ;;  %v7969_v31 = vld [vmem:[%s9927_s3 + $0x80] sm:$0xff]   ;;  %v8858_v49 = vld [vmem:[#allocation2 + $0x34] sm:$0xf] }
  0xfd   : > { %7402 = vmatprep.mubr.bf16.mxu0 %v6484_v51  ;;  %v377_v54 = vadd.f32 %v8722_v20, %v339_v38  ;;  %v6486_v13 = vcombine.low %v3838_v1, %v3841_v2  ;;  %v6284_v9 = vcombine.low %v7972_v21, %v8858_v49  ;;  %v8873_v5 = vld [vmem:[#allocation2 + $0x40] sm:$0xf]  ;;  %v8876_v38 = vld [vmem:[#allocation2 + $0x4c] sm:$0xf] }
  0xfe   : > { %v378_v55 = vadd.f32 %v8722_v20, %v340_v45  ;;  %v8855_v20 = vld [vmem:[#allocation2 + $0x28] sm:$0xf]  ;;  %v6286_v15 = vcombine.low %v7976_v8, %v8876_v38  ;;  %v7901_v45 = vld [vmem:[%s9927_s3 + $0xb0] sm:$0xff]   ;;  %v2048_v21 = vld [vmem:[#allocation2] sm:$0xe] }
  0xff   : > { %v409_v25 = vmax.f32 %v377_v54, 0.0  ;;  %v6283_v42 = vcombine.low %v7970_v18, %v8855_v20  ;;  %v7907_v18 = vld [vmem:[%s9927_s3 + $0xb8] sm:$0xff]   ;;  %v6304_v8 = vrot.slane %v2048_v21, 9  ;;  %v7897_v21 = vld [vmem:[%s9927_s3 + $0x1c8] sm:$0xff]  }
 0x100   : > { %v410_v26 = vmax.f32 %v378_v55, 0.0  ;;  %v7978_v55 = vld [vmem:[#allocation2 + $0x54] sm:$0xf] }
 0x101   : > { %v6698_v59 = vpack.c.bf16 %v409_v25, %v409_v25 }
 0x102   : > { %v6699_v47 = vpack.c.bf16 %v410_v26, %v410_v26 }
 0x103   : > { %7187 = vmatmul.mubr.bf16.vlgmr.msra.gmra.mrb[0].mxu1 %v6281_v61  ;;  %v820_v23 = vshrl.u32 %v6698_v59, 16  ;;  %v823_v7 = vshll.u32 %v6698_v59, 16  ;;  %v7974_v61 = vld [vmem:[#allocation2 + $0x3c] sm:$0xf] }
 0x104   : > { %7219 = vmatpush3.bf16.msra.mxu1 %v7969_v31  ;;  %7190 = vmatprep.mubr.bf16.mxu1 %v6282_v35  ;;  %v828_v39 = vshrl.u32 %v6699_v47, 16  ;;  %v831_v17 = vshll.u32 %v6699_v47, 16  ;;  %v6285_v29 = vcombine.low %v7974_v61, %v8873_v5  ;;  %v7980_v31 = vld [vmem:[#allocation2 + $0x60] sm:$0xf]  ;;  %v3193_v47 = vshll.u32 %v8784_v41, 16 }
 0x105   : > { %7220 = vmatprep.subr.bf16.mxu1 %v7877_v62  ;;  %7403 = vmatmul.mubr.bf16.gmra.mrb[24].mxu0 %v6485_v6  ;;  %v822_v46 = vrot.slane %v820_v23, 7  ;;  %v8885_v6 = vld [vmem:[#allocation2 + $0x58] sm:$0xf]  ;;  %v8920_v61 = vld [vmem:[#allocation2 + $0x7c] sm:$0xf] }
 0x106   : > { %7406 = vmatprep.mubr.bf16.mxu0 %v6486_v13  ;;  %v830_v24 = vrot.slane %v828_v39, 7  ;;  %v6287_v13 = vcombine.low %v7978_v55, %v8885_v6  ;;  %v7892_v55 = vld [vmem:[#allocation2 + $0x24] sm:$0xff]  }
 0x107   : > { %v825_v51 = vor.u32 %v823_v7, %v822_v46  ;;  %v826_v44 = vrot.slane %v822_v46, 4  ;;  %v3197_v7 = vshrl.u32 %v8784_v41, 16  ;;  %v2049_v46 = vld [vmem:[#allocation2 + $0xc] sm:$0xe]  ;;  %v8906_v41 = vrot.slane %v3193_v47, 5 }
 0x108   : > { %7221 = vmatpush3.bf16.msra.mxu1 %v7877_v62  ;;  %v833_v48 = vor.u32 %v831_v17, %v830_v24  ;;  %v835_v43 = vrot.slane %v830_v24, 4  ;;  %v7890_v17 = vld [vmem:[#allocation2 + $0x18] sm:$0xff]   ;;  %v2108_v24 = vrot.slane %v8828_v4, 5  ;;  %v2129_v4 = vrot.slane %v8858_v49, 5 }
 0x109   : > { %7222 = vmatprep.subr.bf16.mxu1 %v7881_v14  ;;  %v996_v50 = vsel %vm8200_vm9, %v825_v51, %v995_v40  ;;  %v2050_v40 = vld [vmem:[#allocation2 + $0x18] sm:$0xe] }
 0x10a   : > { %v834_v53 = vsel %vm8191_vm8, %v826_v44, %v833_v48  ;;  %v1000_v36 = vsel %vm8207_vm10, %v835_v43, %v999_v37  ;;  %997 = vst [vmem:[#allocation2 + $0xc0] sm:$0xf] %v996_v50  ;;  %v7983_v37 = vld [vmem:[#allocation2 + $0x14] sm:$0x1]  ;;  %v2115_v44 = vrot.slane %v8837_v30, 5  ;;  %v8911_v48 = vld [vmem:[%s9927_s3 + $0xc0] sm:$0xff]  }
 0x10b   : > { %7191 = vmatmul.mubr.bf16.gmra.mrb[4].mxu1 %v6283_v42  ;;  %998 = vst [vmem:[#allocation2 + $0xc4] sm:$0xf] %v834_v53  ;;  %1001 = vst [vmem:[#allocation2 + $0xc8] sm:$0x1] %v1000_v36  ;;  %v8897_v42 = vld [vmem:[#allocation2 + $0x8] sm:$0x1] }
 0x10c   : > { %7194 = vmatprep.mubr.bf16.mxu1 %v6284_v9  ;;  %7223 = vmatpush3.bf16.msra.mxu1 %v7881_v14  ;;  %v8890_v14 = vld [vmem:[#allocation2 + $0x64] sm:$0xf]  ;;  %v2104_v23 = vrot.slane %v8897_v42, 5  ;;  %v2111_v51 = vrot.slane %v7983_v37, 5  ;;  %v2122_v43 = vrot.slane %v8855_v20, 5  ;;  %v8915_v53 = vrot.slane %v3197_v7, 4 }
 0x10d   : > { %7224 = vmatprep.subr.bf16.mxu1 %v7885_v28  ;;  %v6288_v59 = vcombine.low %v7980_v31, %v8890_v14  ;;  %v7984_v50 = vld [vmem:[#allocation2 + $0x6c] sm:$0xf]  ;;  %v8917_v36 = vld [vmem:[#allocation2 + $0x70] sm:$0xf]  ;;  %v2110_v20 = vrot.slane %v2108_v24, 4  ;;  %v2117_v49 = vrot.slane %v2115_v44, 4 }
 0x10e   : > { %v6289_v30 = vcombine.low %v7984_v50, %v8917_v36  ;;  %v7990_v31 = vld [vmem:[#allocation2 + $0x38] sm:$0x1]  ;;  %v2054_v50 = vld [vmem:[#allocation2 + $0x48] sm:$0xe] }
 0x10f   : > { %v8954_v37 = vsel %vm8564_vm13, %v2110_v20, %v2111_v51 }
 0x110   : > { %7225 = vmatpush3.bf16.msra.mxu1 %v7885_v28  ;;  %v2101_v28 = vrot.slane %v8818_v32, 5  ;;  %v2051_v32 = vld [vmem:[#allocation2 + $0x24] sm:$0xe] }
 0x111   : > { %7226 = vmatprep.subr.bf16.mxu1 %v7889_v34  ;;  %v3688_v1 = vld [vmem:[#allocation2 + $0xc0] sm:$0xe] }
 0x112   : > { %v2965_v63 = vld [vmem:[#allocation2 + $0xc4] sm:$0xf]  ;;  %v2966_v35 = vld [vmem:[#allocation2 + $0xc8] sm:$0x1]  ;;  %v6455_v2 = vrot.slane %v3688_v1, 9 }
 0x113   : > { %7195 = vmatmul.mubr.bf16.gmra.mrb[8].mxu1 %v6285_v29  ;;  %v3844_v62 = vrot.slane %v2965_v63, 5  ;;  %v3847_v54 = vrot.slane %v2966_v35, 5  ;;  %v6306_v63 = vrot.slane %v2050_v40, 9  ;;  %v7988_v35 = vld [vmem:[#allocation2 + $0x20] sm:$0x1]  ;;  %v8940_v40 = vsel %vm8564_vm13, %v6304_v8, %v2101_v28  ;;  %v7903_v8 = vld [vmem:[%s9927_s3 + $0x1d0] sm:$0xff]  }
 0x114   : > { %7198 = vmatprep.mubr.bf16.mxu1 %v6286_v15  ;;  %7227 = vmatpush3.bf16.msra.mxu1 %v7889_v34  ;;  %v7986_v34 = vld [vmem:[#allocation2 + $0x78] sm:$0xf]  ;;  %v2052_v15 = vld [vmem:[#allocation2 + $0x30] sm:$0xe]  ;;  %v2118_v1 = vrot.slane %v7988_v35, 5 }
 0x115   : > { %7228 = vmatprep.subr.bf16.mxu1 %v7895_v22  ;;  %v3845_v25 = vsel %vm8564_vm13, %v6455_v2, %v3844_v62  ;;  %v3846_v26 = vrot.slane %v3844_v62, 4  ;;  %v6290_v29 = vcombine.low %v7986_v34, %v8920_v61  ;;  %v6307_v2 = vrot.slane %v2051_v32, 9  ;;  %v7989_v62 = vld [vmem:[#allocation2 + $0x2c] sm:$0x1]  ;;  %v2053_v32 = vld [vmem:[#allocation2 + $0x3c] sm:$0xe] }
 0x116   : > { %v7991_v35 = vld [vmem:[#allocation2 + $0x44] sm:$0x1] }
 0x117   : > { %v3848_v39 = vsel %vm8564_vm13, %v3846_v26, %v3847_v54  ;;  %v2125_v54 = vrot.slane %v7989_v62, 5  ;;  %v2131_v26 = vrot.slane %v2129_v4, 4  ;;  %v8966_v42 = vsel %vm8564_vm13, %v6307_v2, %v2122_v43  ;;  %v4562_v2 = vld [vmem:[#allocation2 + $0x28] sm:$0xf]  ;;  %v7898_v62 = vld [vmem:[#allocation2 + $0x3c] sm:$0xff]  }
 0x118   : > { %7229 = vmatpush3.bf16.msra.mxu1 %v7895_v22  ;;  %v6487_v9 = vcombine.low %v3845_v25, %v3848_v39  ;;  %v2103_v22 = vrot.slane %v2101_v28, 4  ;;  %v6308_v25 = vrot.slane %v2052_v15, 9  ;;  %v7896_v39 = vld [vmem:[#allocation2 + $0x30] sm:$0xff]   ;;  %v8958_v28 = vsel %vm8564_vm13, %v6306_v63, %v2115_v44  ;;  %v7994_v15 = vld [vmem:[#allocation2 + $0x68] sm:$0x1] }
 0x119   : > { %7230 = vmatprep.subr.bf16.mxu1 %v7901_v45  ;;  %v6309_v63 = vrot.slane %v2053_v32, 9  ;;  %v4640_v47 = vshll.u32 %v4562_v2, 16 }
 0x11a   : > { %7407 = vmatmul.mubr.bf16.gmra.mrb[28].mxu0 %v6487_v9  ;;  %v6293_v9 = vcombine.low %v8733_v19, %v8737_v16  ;;  %v8974_v51 = vsel %vm8564_vm13, %v6308_v25, %v2129_v4  ;;  %v8998_v25 = vld [vmem:[#allocation2 + $0x50] sm:$0x1]  ;;  %v7904_v4 = vld [vmem:[#allocation2 + $0x54] sm:$0xff]  }
 0x11b   : > { %7199 = vmatmul.mubr.bf16.gmra.mrb[12].mxu1 %v6287_v13  ;;  %7426 = vmatprep.mubr.bf16.mxu0 %v7890_v17  ;;  %v2124_v13 = vrot.slane %v2122_v43, 4  ;;  %v6292_v17 = vcombine.low %v8699_v10, %v8725_v57  ;;  %v4559_v10 = vld [vmem:[#allocation2 + $0x1c] sm:$0xf]  ;;  %v8950_v57 = vsel %vm8564_vm13, %v2103_v22, %v2104_v23  ;;  %v9954_v19 = vrot.slane %v8998_v25, 5 }
 0x11c   : > { %7202 = vmatprep.mubr.bf16.mxu1 %v6288_v59  ;;  %7231 = vmatpush3.bf16.msra.mxu1 %v7901_v45  ;;  %v6305_v45 = vrot.slane %v2049_v46, 9  ;;  %v2132_v59 = vrot.slane %v7990_v31, 5  ;;  %v4616_v34 = vshll.u32 %v4559_v10, 16  ;;  %v2055_v31 = vld [vmem:[#allocation2 + $0x54] sm:$0xe]  ;;  %v7908_v46 = vld [vmem:[#allocation2 + $0x60] sm:$0xff]  }
 0x11d   : > { %7232 = vmatprep.subr.bf16.mxu1 %v7907_v18  ;;  %v8970_v23 = vsel %vm8564_vm13, %v2124_v13, %v2125_v54  ;;  %v2143_v13 = vrot.slane %v8876_v38, 5  ;;  %v4644_v54 = vshrl.u32 %v4562_v2, 16  ;;  %v6311_v20 = vrot.slane %v2055_v31, 9 }
 0x11e   : > { %v8978_v44 = vsel %vm8564_vm13, %v2131_v26, %v2132_v59  ;;  %v7902_v59 = vld [vmem:[#allocation2 + $0x48] sm:$0xff]  }
 0x120   : > { %7233 = vmatpush3.bf16.msra.mxu1 %v7907_v18  ;;  %v6291_v18 = vcombine.low %v8657_v52, %v8662_v27  ;;  %v8944_v52 = vsel %vm8564_vm13, %v6305_v45, %v2108_v24  ;;  %v4558_v27 = vld [vmem:[#allocation2 + $0x18] sm:$0xf]  ;;  %v8962_v24 = vsel %vm8564_vm13, %v2117_v49, %v2118_v1  ;;  %v4561_v45 = vld [vmem:[#allocation2 + $0x24] sm:$0xf]  ;;  %v2136_v49 = vrot.slane %v8873_v5, 5 }
 0x121   : > { %7266 = vmatprep.subr.bf16.mxu1 %v8911_v48  ;;  %v4610_v43 = vshll.u32 %v4558_v27, 16  ;;  %v2139_v1 = vrot.slane %v7991_v35, 5  ;;  %v7909_v5 = vld [vmem:[%s9927_s3 + $0x1d8] sm:$0xff]   ;;  %v4631_v38 = vshrl.u32 %v4561_v45, 16  ;;  %v4634_v35 = vshll.u32 %v4561_v45, 16 }
 0x122   : > { %7427 = vmatmul.mubr.bf16.vlgmr.msra.gmra.mrb[0].mxu0 %v7892_v55  ;;  %v6310_v55 = vrot.slane %v2054_v50, 9  ;;  %v4560_v50 = vld [vmem:[#allocation2 + $0x20] sm:$0x1]  ;;  %v2138_v7 = vrot.slane %v2136_v49, 4  ;;  %v2164_v45 = vrot.slane %v8917_v36, 5  ;;  %v4646_v36 = vrot.slane %v4644_v54, 4 }
 0x123   : > { %7203 = vmatmul.mubr.bf16.gmra.mrb[16].mxu1 %v6289_v30  ;;  %7459 = vmatpush3.bf16.msra.mxu0 %v8677_v3  ;;  %v4607_v30 = vshrl.u32 %v4558_v27, 16  ;;  %v4612_v27 = vrot.slane %v4610_v43, 5  ;;  %v4633_v31 = vrot.slane %v4631_v38, 4  ;;  %v4636_v22 = vrot.slane %v4634_v35, 5 }
 0x124   : > { %7206 = vmatprep.mubr.bf16.mxu1 %v6290_v29  ;;  %7430 = vmatprep.mubr.bf16.mxu0 %v7896_v39  ;;  %v4620_v29 = vshrl.u32 %v4559_v10, 16  ;;  %v9004_v10 = vrot.slane %v4616_v34, 5  ;;  %v9013_v43 = vsel %vm8564_vm13, %v6310_v55, %v2143_v13  ;;  %v2056_v34 = vld [vmem:[#allocation2 + $0x60] sm:$0xe]  ;;  %v4626_v55 = vshll.u32 %v4560_v50, 16 }
 0x125   : > { %7460 = vmatprep.subr.bf16.mxu0 %v7897_v21  ;;  %v4609_v39 = vrot.slane %v4607_v30, 4  ;;  %v2150_v30 = vrot.slane %v8885_v6, 5  ;;  %v2057_v6 = vld [vmem:[#allocation2 + $0x6c] sm:$0xe]  ;;  %v6312_v3 = vrot.slane %v2056_v34, 9  ;;  %v4637_v34 = vor.u32 %v4636_v22, %v4633_v31 }
 0x126   : > { %v4622_v32 = vrot.slane %v4620_v29, 4  ;;  %v2157_v29 = vrot.slane %v8890_v14, 5  ;;  %v9021_v14 = vrot.slane %v4640_v47, 5  ;;  %v7995_v50 = vld [vmem:[#allocation2 + $0x74] sm:$0x1] }
 0x127   : > { %7461 = vmatpush3.bf16.msra.mxu0 %v7897_v21  ;;  %v9008_v21 = vsel %vm8564_vm13, %v6309_v63, %v2136_v49  ;;  %v7993_v63 = vld [vmem:[#allocation2 + $0x5c] sm:$0x1]  ;;  %v4613_v2 = vor.u32 %v4612_v27, %v4609_v39  ;;  %v6313_v27 = vrot.slane %v2057_v6, 9  ;;  %v2167_v26 = vrot.slane %v7995_v50, 5  ;;  %v7996_v6 = vld [vmem:[#allocation2 + $0x80] sm:$0x1] }
 0x128   : > { %7462 = vmatprep.subr.bf16.mxu0 %v7903_v8  ;;  %v2153_v49 = vrot.slane %v7993_v63, 5  ;;  %v2160_v63 = vrot.slane %v7994_v15, 5  ;;  %v2159_v39 = vrot.slane %v2157_v29, 4  ;;  %v9029_v47 = vsel %vm8564_vm13, %v6311_v20, %v2150_v30  ;;  %v7917_v15 = vld [vmem:[%s9927_s3 + $0x1e8] sm:$0xff]  }
 0x129   : > { %v4614_v54 = vrot.slane %v4613_v2, 4  ;;  %v4647_v20 = vor.u32 %v4646_v36, %v9021_v14  ;;  %v9056_v22 = vsel %vm8564_vm13, %v6312_v3, %v2157_v29  ;;  %v2174_v2 = vrot.slane %v7996_v6, 5  ;;  %v7916_v36 = vld [vmem:[#allocation2 + $0x90] sm:$0xff]  }
 0x12a   : > { %7431 = vmatmul.mubr.bf16.gmra.mrb[4].mxu0 %v7898_v62  ;;  %v4623_v62 = vor.u32 %v4622_v32, %v9004_v10  ;;  %v2166_v32 = vrot.slane %v2164_v45, 4 }
 0x12b   : > { %7207 = vmatmul.mubr.bf16.gmra.mrb[20].mxu1 %v6291_v18  ;;  %v2145_v18 = vrot.slane %v2143_v13, 4  ;;  %7434 = vmatprep.mubr.bf16.mxu0 %v7902_v59  ;;  %v4563_v13 = vld [vmem:[#allocation2 + $0x2c] sm:$0x1]  ;;  %v2152_v59 = vrot.slane %v2150_v30, 4  ;;  %v9953_v30 = vcombine.low %v8764_v58, %v8766_v12  ;;  %v9060_v58 = vsel %vm8564_vm13, %v2159_v39, %v2160_v63 }
 0x12c   : > { %7210 = vmatprep.mubr.bf16.mxu1 %v6292_v17  ;;  %7463 = vmatpush3.bf16.msra.mxu0 %v7903_v8  ;;  %v7913_v17 = vld [vmem:[%s9927_s3 + $0x1e0] sm:$0xff]   ;;  %v9025_v8 = vsel %vm8564_vm13, %v2138_v7, %v2139_v1  ;;  %v4650_v38 = vshll.u32 %v4563_v13, 16  ;;  %v2058_v7 = vld [vmem:[#allocation2 + $0x78] sm:$0xe]  ;;  %v2171_v1 = vrot.slane %v8920_v61, 5  ;;  %v4624_v35 = vrot.slane %v4623_v62, 4 }
 0x12d   : > { %7464 = vmatprep.subr.bf16.mxu0 %v7909_v5  ;;  %v9048_v16 = vsel %vm8564_vm13, %v2145_v18, %v9954_v19  ;;  %v9064_v12 = vsel %vm8564_vm13, %v6313_v27, %v2164_v45  ;;  %v9068_v25 = vsel %vm8564_vm13, %v2166_v32, %v2167_v26  ;;  %v6314_v18 = vrot.slane %v2058_v7, 9  ;;  %v4565_v62 = vld [vmem:[#allocation2 + $0x34] sm:$0xf]  ;;  %v7997_v13 = vld [vmem:[#allocation2 + $0x88] sm:$0xf]  ;;  %v7910_v39 = vld [vmem:[#allocation2 + $0x6c] sm:$0xff]  }
 0x12e   : > { %v9073_v3 = vrot.slane %v4650_v38, 5  ;;  %v2173_v29 = vrot.slane %v2171_v1, 4  ;;  %v7921_v26 = vld [vmem:[%s9927_s3 + $0x1f0] sm:$0xff]   ;;  %v2178_v31 = vrot.slane %v7997_v13, 5  ;;  %v4664_v50 = vshll.u32 %v4565_v62, 16  ;;  %v7912_v7 = vld [vmem:[#allocation2 + $0x78] sm:$0xff]  }
 0x12f   : > { %v4567_v38 = vld [vmem:[#allocation2 + $0x3c] sm:$0xf]  ;;  %v4568_v19 = vld [vmem:[#allocation2 + $0x40] sm:$0xf]  ;;  %v2060_v27 = vld [vmem:[#allocation2 + $0x90] sm:$0xe] }
 0x130   : > { %7465 = vmatpush3.bf16.msra.mxu0 %v7909_v5  ;;  %v4628_v5 = vrot.slane %v4626_v55, 5  ;;  %v2059_v55 = vld [vmem:[#allocation2 + $0x84] sm:$0xe]  ;;  %v4682_v13 = vshll.u32 %v4567_v38, 16 }
 0x131   : > { %7466 = vmatprep.subr.bf16.mxu0 %v7913_v17 }
 0x132   : > { %7435 = vmatmul.mubr.bf16.gmra.mrb[8].mxu0 %v7904_v4  ;;  %v4619_v4 = vsel %vm8152_vm2, %v4614_v54, %v9004_v10  ;;  %v4629_v45 = vsel %vm8152_vm2, %v4624_v35, %v4628_v5  ;;  %v4668_v54 = vshrl.u32 %v4565_v62, 16  ;;  %v7925_v35 = vld [vmem:[%s9927_s3 + $0x1f8] sm:$0xff]   ;;  %v9956_v62 = vcombine.low %v8940_v40, %v8950_v57  ;;  %v4569_v40 = vld [vmem:[#allocation2 + $0x44] sm:$0x1] }
 0x133   : > { %7211 = vmatmul.mubr.bf16.gmra.mrb[24].mxu1 %v6293_v9  ;;  %v9052_v9 = vsel %vm8564_vm13, %v2152_v59, %v2153_v49  ;;  %v4564_v49 = vld [vmem:[#allocation2 + $0x30] sm:$0xf]  ;;  %7438 = vmatprep.mubr.bf16.mxu0 %v7908_v46  ;;  %v4638_v46 = vrot.slane %v4637_v34, 4  ;;  %v9091_v5 = vcombine.low %v4619_v4, %v4629_v45  ;;  %v9095_v34 = vsel %vm8564_vm13, %v6314_v18, %v2171_v1  ;;  %v7998_v4 = vld [vmem:[#allocation2 + $0x8c] sm:$0x1] }
 0x134   : > { %7214 = vmatprep.mubr.bf16.mxu1 %v9953_v30  ;;  %7467 = vmatpush3.bf16.msra.mxu0 %v7913_v17  ;;  %v4648_v17 = vrot.slane %v4647_v20, 4  ;;  %v4655_v59 = vshrl.u32 %v4564_v49, 16  ;;  %v4658_v63 = vshll.u32 %v4564_v49, 16  ;;  %v9099_v20 = vsel %vm8564_vm13, %v2173_v29, %v2174_v2  ;;  %v4566_v29 = vld [vmem:[#allocation2 + $0x38] sm:$0x1] }
 0x135   : > { %7468 = vmatprep.subr.bf16.mxu0 %v7917_v15  ;;  %v6315_v30 = vrot.slane %v2059_v55, 9  ;;  %v9955_v49 = vcombine.low %v8796_v60, %v8798_v11  ;;  %v2180_v18 = vrot.slane %v2178_v31, 4  ;;  %v2181_v6 = vrot.slane %v7998_v4, 5  ;;  %v4570_v2 = vld [vmem:[#allocation2 + $0x48] sm:$0xf] }
 0x136   : > { %v4653_v1 = vsel %vm8152_vm2, %v4648_v17, %v9073_v3  ;;  %v4657_v60 = vrot.slane %v4655_v59, 4  ;;  %v4660_v45 = vrot.slane %v4658_v63, 5  ;;  %v4679_v55 = vshrl.u32 %v4567_v38, 16  ;;  %v9122_v63 = vld [vmem:[%s9927_s3 + $0x200] sm:$0xff]  }
 0x137   : > { %v4688_v3 = vshll.u32 %v4568_v19, 16  ;;  %v4692_v17 = vshrl.u32 %v4568_v19, 16  ;;  %v4674_v32 = vshll.u32 %v4566_v29, 16  ;;  %v4703_v57 = vshrl.u32 %v4570_v2, 16  ;;  %v7914_v38 = vld [vmem:[#allocation2 + $0x84] sm:$0xff]  }
 0x138   : > { %7469 = vmatpush3.bf16.msra.mxu0 %v7917_v15  ;;  %v4643_v15 = vsel %vm8152_vm2, %v4638_v46, %v9021_v14  ;;  %v9115_v14 = vrot.slane %v4664_v50, 5  ;;  %v4670_v46 = vrot.slane %v4668_v54, 4  ;;  %v4706_v59 = vshll.u32 %v4570_v2, 16 }
 0x139   : > { %7470 = vmatprep.subr.bf16.mxu0 %v7921_v26  ;;  %v4661_v19 = vor.u32 %v4660_v45, %v4657_v60  ;;  %v4681_v29 = vrot.slane %v4679_v55, 4  ;;  %v4684_v2 = vrot.slane %v4682_v13, 5  ;;  %v9140_v4 = vrot.slane %v4688_v3, 5  ;;  %v9152_v3 = vld [vmem:[#allocation2 + $0x58] sm:$0xf] }
 0x13a   : > { %7439 = vmatmul.mubr.bf16.gmra.mrb[12].mxu0 %v7910_v39  ;;  %v9126_v39 = vsel %vm8564_vm13, %v6315_v30, %v2178_v31  ;;  %v7915_v31 = vld [vmem:[%s9927_s3 + $0xc8] sm:$0xff]   ;;  %v4671_v30 = vor.u32 %v4670_v46, %v9115_v14  ;;  %v4705_v60 = vrot.slane %v4703_v57, 4  ;;  %v4708_v45 = vrot.slane %v4706_v59, 5  ;;  %9960 = vst [vmem:[#allocation5_spill] sm:$0xff] %v9152_v3 }
 0x13b   : > { %7215 = vmatmul.mubr.bf16.gmra.mrb[28].mxu1 %v9955_v49  ;;  %v9113_v49 = vld [vmem:[#allocation2 + $0x4c] sm:$0xf]  ;;  %7442 = vmatprep.mubr.bf16.mxu0 %v7912_v7  ;;  %v9134_v7 = vcombine.low %v4643_v15, %v4653_v1  ;;  %v9144_v1 = vrot.slane %v4674_v32, 5  ;;  %v9959_v55 = vcombine.low %v8944_v52, %v8954_v37  ;;  %v9961_v32 = vcombine.low %v8958_v28, %v8962_v24  ;;  %v7999_v37 = vld [vmem:[#allocation2 + $0x94] sm:$0xf] }
 0x13c   : > { %7234 = vmatprep.mubr.bf16.mxu1 %v9956_v62  ;;  %9957 = vst [vmem:[#allocation3_spill] sm:$0xff] %v9113_v49  ;;  %7471 = vmatpush3.bf16.msra.mxu0 %v7921_v26  ;;  %v9130_v26 = vsel %vm8564_vm13, %v2180_v18, %v2181_v6  ;;  %v4712_v50 = vshll.u32 %v9113_v49, 16  ;;  %v4716_v54 = vshrl.u32 %v9113_v49, 16  ;;  %v4573_v62 = vld [vmem:[#allocation2 + $0x54] sm:$0xf]  ;;  %v4694_v18 = vrot.slane %v4692_v17, 4 }
 0x13d   : > { %7472 = vmatprep.subr.bf16.mxu0 %v7925_v35  ;;  %9958 = vst [vmem:[#allocation4_spill] sm:$0xff] %v9130_v26  ;;  %v4698_v6 = vshll.u32 %v4569_v40, 16  ;;  %v4727_v17 = vshrl.u32 %v4573_v62, 16  ;;  %v9158_v40 = vrot.slane %v4661_v19, 4  ;;  %v4685_v57 = vor.u32 %v4684_v2, %v4681_v29  ;;  %v2061_v24 = vld [vmem:[#allocation2 + $0x9c] sm:$0xe] }
 0x13e   : > { %v9150_v13 = vrot.slane %v4712_v50, 5  ;;  %v4718_v46 = vrot.slane %v4716_v54, 4  ;;  %v6316_v52 = vrot.slane %v2060_v27, 9  ;;  %v2185_v59 = vrot.slane %v7999_v37, 5  ;;  %v7919_v50 = vld [vmem:[%s9927_s3 + $0xd0] sm:$0xff]  }
 0x13f   : > { %v9165_v54 = vrot.slane %v4671_v30, 4  ;;  %v9168_v28 = vrot.slane %v4698_v6, 5  ;;  %v8000_v19 = vld [vmem:[#allocation2 + $0xa0] sm:$0xf]  ;;  %v8001_v27 = vld [vmem:[#allocation2 + $0x98] sm:$0x1] }
 0x140   : > { %7473 = vmatpush3.bf16.msra.mxu0 %v7925_v35  ;;  %v4730_v35 = vshll.u32 %v4573_v62, 16  ;;  %v2192_v29 = vrot.slane %v8000_v19, 5  ;;  %v2188_v2 = vrot.slane %v8001_v27, 5  ;;  %v4709_v62 = vor.u32 %v4708_v45, %v4705_v60  ;;  %v7923_v6 = vld [vmem:[%s9927_s3 + $0xd8] sm:$0xff]  }
 0x141   : > { %7506 = vmatprep.subr.bf16.mxu0 %v9122_v63  ;;  %v4719_v37 = vor.u32 %v4718_v46, %v9150_v13  ;;  %v4729_v15 = vrot.slane %v4727_v17, 4  ;;  %v4686_v60 = vrot.slane %v4685_v57, 4  ;;  %v2187_v45 = vrot.slane %v2185_v59, 4  ;;  %v7920_v46 = vld [vmem:[#allocation2 + $0xa8] sm:$0xff]  }
 0x142   : > { %7443 = vmatmul.mubr.bf16.gmra.mrb[16].mxu0 %v7914_v38  ;;  %v4736_v38 = vshll.u32 %v9152_v3, 16  ;;  %v4732_v10 = vrot.slane %v4730_v35, 5  ;;  %v6317_v19 = vrot.slane %v2061_v24, 9  ;;  %v9183_v17 = vsel %vm8564_vm13, %v6316_v52, %v2185_v59  ;;  %v8002_v35 = vld [vmem:[#allocation2 + $0xa4] sm:$0x1] }
 0x143   : > { %7235 = vmatmul.mubr.bf16.vlgmr.msra.gmra.mrb[0].mxu1 %v9959_v55  ;;  %v9160_v55 = vld [vmem:[#allocation2 + $0x50] sm:$0x1]  ;;  %7446 = vmatprep.mubr.bf16.mxu0 %v7916_v36  ;;  %v4667_v36 = vsel %vm8152_vm2, %v9158_v40, %v9115_v14  ;;  %v2195_v61 = vrot.slane %v8002_v35, 5  ;;  %v2062_v14 = vld [vmem:[#allocation2 + $0xa8] sm:$0xe]  ;;  %v9963_v24 = vcombine.low %v8966_v42, %v8970_v23  ;;  %v4677_v52 = vsel %vm8152_vm2, %v9165_v54, %v9144_v1 }
 0x144   : > { %7267 = vmatpush3.bf16.msra.mxu1 %v8911_v48  ;;  %7238 = vmatprep.mubr.bf16.mxu1 %v9961_v32  ;;  %9962 = vst [vmem:[#allocation6_spill] sm:$0xff] %v9160_v55  ;;  %v4695_v48 = vor.u32 %v4694_v18, %v9140_v4  ;;  %v4740_v32 = vshrl.u32 %v9152_v3, 16  ;;  %v4722_v30 = vshll.u32 %v9160_v55, 16  ;;  %v7918_v18 = vld [vmem:[#allocation2 + $0x9c] sm:$0xff]   ;;  %v4710_v55 = vrot.slane %v4709_v62, 4 }
 0x145   : > { %7268 = vmatprep.subr.bf16.mxu1 %v7915_v31  ;;  %v9185_v3 = vld [vmem:[#allocation2 + $0x5c] sm:$0x1]  ;;  %v9187_v49 = vrot.slane %v4736_v38, 5  ;;  %v8003_v40 = vld [vmem:[#allocation2 + $0xac] sm:$0xf]  ;;  %v4720_v59 = vrot.slane %v4719_v37, 4  ;;  %v4733_v35 = vor.u32 %v4732_v10, %v4729_v15  ;;  %v4691_v42 = vsel %vm8152_vm2, %v4686_v60, %v9140_v4 }
 0x146   : > { %v4696_v27 = vrot.slane %v4695_v48, 4  ;;  %v4742_v26 = vrot.slane %v4740_v32, 4  ;;  %v2199_v57 = vrot.slane %v8003_v40, 5  ;;  %v4724_v48 = vrot.slane %v4722_v30, 5  ;;  %v2063_v30 = vld [vmem:[#allocation2 + $0xb4] sm:$0xe] }
 0x147   : > { %v9964_v62 = vshll.u32 %v8788_v0, 16  ;;  %v9966_v32 = vcombine.low %v8974_v51, %v8978_v44  ;;  %v9208_v23 = vsel %vm8564_vm13, %v2187_v45, %v2188_v2  ;;  %v9212_v10 = vsel %vm8564_vm13, %v6317_v19, %v2192_v29  ;;  %v4576_v0 = vld [vmem:[#allocation2 + $0x60] sm:$0xf]  ;;  %v8004_v2 = vld [vmem:[#allocation2 + $0xb0] sm:$0x1]  ;;  %v7922_v19 = vld [vmem:[#allocation2 + $0xb4] sm:$0xff]  }
 0x148   : > { %7269 = vmatpush3.bf16.msra.mxu1 %v7915_v31  ;;  %v2194_v31 = vrot.slane %v2192_v29, 4  ;;  %v7927_v51 = vld [vmem:[%s9927_s3 + $0xe0] sm:$0xff]   ;;  %v4701_v44 = vsel %vm8152_vm2, %v4696_v27, %v9168_v28  ;;  %v4746_v15 = vshll.u32 %v9185_v3, 16  ;;  %v6318_v1 = vrot.slane %v2062_v14, 9  ;;  %v7929_v28 = vld [vmem:[%s9927_s3 + $0xe8] sm:$0xff]  }
 0x149   : > { %7270 = vmatprep.subr.bf16.mxu1 %v7919_v50  ;;  %v9198_v38 = vrot.slane %v9964_v62, 5  ;;  %v4743_v54 = vor.u32 %v4742_v26, %v9187_v49  ;;  %v2201_v29 = vrot.slane %v2199_v57, 4  ;;  %v2202_v37 = vrot.slane %v8004_v2, 5  ;;  %v9245_v27 = vld [vmem:[#allocation2 + $0x68] sm:$0x1] }
 0x14a   : > { %7447 = vmatmul.mubr.bf16.gmra.mrb[20].mxu0 %v7918_v18  ;;  %v9222_v4 = vsel %vm8564_vm13, %v2194_v31, %v2195_v61  ;;  %v4725_v61 = vsel %vm8152_vm2, %v4720_v59, %v4724_v48  ;;  %v9234_v18 = vrot.slane %v4733_v35, 4  ;;  %v2206_v60 = vrot.slane %v8798_v11, 5  ;;  %v4579_v40 = vld [vmem:[#allocation2 + $0x6c] sm:$0xf]  ;;  %v8005_v62 = vld [vmem:[#allocation2 + $0xbc] sm:$0x1] }
 0x14b   : > { %7239 = vmatmul.mubr.bf16.gmra.mrb[4].mxu1 %v9963_v24  ;;  %9965 = vst [vmem:[#allocation7_spill] sm:$0xff] %v9198_v38  ;;  %9967 = vst [vmem:[#allocation8_spill] sm:$0xff] %v9222_v4  ;;  %7450 = vmatprep.mubr.bf16.mxu0 %v7920_v46  ;;  %v4751_v45 = vshrl.u32 %v4576_v0, 16  ;;  %v9239_v26 = vcombine.low %v4691_v42, %v4701_v44  ;;  %v9243_v46 = vld [vmem:[#allocation2 + $0x64] sm:$0xf]  ;;  %v4754_v31 = vshll.u32 %v4576_v0, 16 }
 0x14c   : > { %7242 = vmatprep.mubr.bf16.mxu1 %v9966_v32  ;;  %7271 = vmatpush3.bf16.msra.mxu1 %v7919_v50  ;;  %v4715_v50 = vsel %vm8152_vm2, %v4710_v55, %v9150_v13  ;;  %v9237_v13 = vcombine.low %v4667_v36, %v4677_v52  ;;  %v9249_v11 = vrot.slane %v4746_v15, 5  ;;  %v6319_v36 = vrot.slane %v2063_v30, 9  ;;  %v9255_v24 = vld [vmem:[#allocation2 + $0x70] sm:$0xf]  ;;  %v7924_v52 = vld [vmem:[#allocation2 + $0xc0] sm:$0xff]   ;;  %v7933_v55 = vld [vmem:[%s9927_s3 + $0xf8] sm:$0xff]  }
 0x14d   : > { %7272 = vmatprep.subr.bf16.mxu1 %v7923_v6  ;;  %9969 = vst [vmem:[#allocation10_spill] sm:$0xff] %v9255_v24  ;;  %v9257_v59 = vcombine.low %v4715_v50, %v4725_v61  ;;  %v9259_v48 = vrot.slane %v4743_v54, 4  ;;  %v9263_v35 = vsel %vm8564_vm13, %v2201_v29, %v2202_v37  ;;  %v2209_v32 = vrot.slane %v8005_v62, 5  ;;  %v4582_v42 = vld [vmem:[#allocation2 + $0x78] sm:$0xf]  ;;  %v7931_v37 = vld [vmem:[%s9927_s3 + $0xf0] sm:$0xff]  }
 0x14e   : > { %9970 = vst [vmem:[#allocation11_spill] sm:$0xff] %v9263_v35  ;;  %v2208_v44 = vrot.slane %v2206_v60, 4  ;;  %v4753_v15 = vrot.slane %v4751_v45, 4  ;;  %v9273_v50 = vld [vmem:[#allocation2 + $0x7c] sm:$0xf]  ;;  %v9973_v54 = vcombine.low %v9013_v43, %v9048_v16  ;;  %v4756_v29 = vrot.slane %v4754_v31, 5 }
 0x14f   : > { %9972 = vst [vmem:[#allocation12_spill] sm:$0xff] %v9273_v50  ;;  %v4775_v2 = vshrl.u32 %v4579_v40, 16  ;;  %v4778_v61 = vshll.u32 %v4579_v40, 16  ;;  %v4784_v43 = vshll.u32 %v9255_v24, 16  ;;  %v4788_v16 = vshrl.u32 %v9255_v24, 16 }
 0x150   : > { %7273 = vmatpush3.bf16.msra.mxu1 %v7923_v6  ;;  %v9253_v6 = vsel %vm8564_vm13, %v6318_v1, %v2199_v57  ;;  %v9971_v57 = vcombine.low %v9008_v21, %v9025_v8  ;;  %v4760_v1 = vshll.u32 %v9243_v46, 16  ;;  %v4764_v21 = vshrl.u32 %v9243_v46, 16  ;;  %v9305_v14 = vld [vmem:[#allocation2 + $0x88] sm:$0xf]  ;;  %v9315_v35 = vld [vmem:[#allocation2 + $0x94] sm:$0xf] }
 0x151   : > { %7274 = vmatprep.subr.bf16.mxu1 %v7927_v51  ;;  %9968 = vst [vmem:[#allocation9_spill] sm:$0xff] %v9253_v6  ;;  %v4770_v8 = vshll.u32 %v9245_v27, 16  ;;  %v4799_v45 = vshrl.u32 %v4582_v42, 16  ;;  %v4802_v31 = vshll.u32 %v4582_v42, 16  ;;  %v4812_v62 = vshrl.u32 %v9273_v50, 16  ;;  %9974 = vst [vmem:[#allocation13_spill] sm:$0xff] %v9305_v14 }
 0x152   : > { %7451 = vmatmul.mubr.bf16.gmra.mrb[24].mxu0 %v7922_v19  ;;  %v4808_v19 = vshll.u32 %v9273_v50, 16  ;;  %v9297_v40 = vsel %vm8564_vm13, %v6319_v36, %v2206_v60  ;;  %v9303_v30 = vrot.slane %v4760_v1, 5  ;;  %v4585_v42 = vld [vmem:[#allocation2 + $0x84] sm:$0xf]  ;;  %v4757_v0 = vor.u32 %v4756_v29, %v4753_v15  ;;  %v4588_v36 = vld [vmem:[#allocation2 + $0x90] sm:$0xf] }
 0x153   : > { %7243 = vmatmul.mubr.bf16.gmra.mrb[8].mxu1 %v9971_v57  ;;  %7454 = vmatprep.mubr.bf16.mxu0 %v7924_v52  ;;  %v7926_v57 = vld [vmem:[#allocation2 + $0xcc] sm:$0xff]   ;;  %v9301_v52 = vsel %vm8564_vm13, %v2208_v44, %v2209_v32  ;;  %v9310_v50 = vrot.slane %v4770_v8, 5  ;;  %v4777_v60 = vrot.slane %v4775_v2, 4  ;;  %v4780_v38 = vrot.slane %v4778_v61, 5  ;;  %9975 = vst [vmem:[#allocation14_spill] sm:$0xff] %v9315_v35 }
 0x154   : > { %7246 = vmatprep.mubr.bf16.mxu1 %v9973_v54  ;;  %7275 = vmatpush3.bf16.msra.mxu1 %v7927_v51  ;;  %v9287_v51 = vld [vmem:[#allocation2 + $0x74] sm:$0x1]  ;;  %v4766_v54 = vrot.slane %v4764_v21, 4  ;;  %v9312_v32 = vrot.slane %v4784_v43, 5  ;;  %v4790_v44 = vrot.slane %v4788_v16, 4  ;;  %v4804_v6 = vrot.slane %v4802_v31, 5 }
 0x155   : > { %7276 = vmatprep.subr.bf16.mxu1 %v7929_v28  ;;  %v4794_v1 = vshll.u32 %v9287_v51, 16  ;;  %v9317_v24 = vrot.slane %v4808_v19, 5  ;;  %v4814_v4 = vrot.slane %v4812_v62, 4  ;;  %v9976_v15 = vcombine.low %v9029_v47, %v9052_v9  ;;  %v9322_v29 = vld [vmem:[#allocation2 + $0x80] sm:$0x1] }
 0x156   : > { %v4823_v21 = vshrl.u32 %v4585_v42, 16  ;;  %v4826_v8 = vshll.u32 %v4585_v42, 16  ;;  %v4832_v2 = vshll.u32 %v9305_v14, 16  ;;  %v4836_v61 = vshrl.u32 %v9305_v14, 16  ;;  %v9342_v14 = vld [vmem:[#allocation2 + $0xa0] sm:$0xf] }
 0x157   : > { %v9977_v43 = vcombine.low %v9056_v22, %v9060_v58  ;;  %v4847_v16 = vshrl.u32 %v4588_v36, 16  ;;  %v4856_v31 = vshll.u32 %v9315_v35, 16  ;;  %v4860_v47 = vshrl.u32 %v9315_v35, 16  ;;  %9978 = vst [vmem:[#allocation15_spill] sm:$0xff] %v9342_v14 }
 0x158   : > { %7277 = vmatpush3.bf16.msra.mxu1 %v7929_v28  ;;  %v4801_v28 = vrot.slane %v4799_v45, 4  ;;  %v4850_v45 = vshll.u32 %v4588_v36, 16  ;;  %v9331_v9 = vrot.slane %v4757_v0, 4  ;;  %v4767_v19 = vor.u32 %v4766_v54, %v9303_v30 }
 0x159   : > { %7278 = vmatprep.subr.bf16.mxu1 %v7931_v37  ;;  %v4781_v62 = vor.u32 %v4780_v38, %v4777_v60  ;;  %v9334_v42 = vrot.slane %v4794_v1, 5  ;;  %v4791_v22 = vor.u32 %v4790_v44, %v9312_v32  ;;  %v4818_v36 = vshll.u32 %v9322_v29, 16  ;;  %v9344_v38 = vld [vmem:[#allocation2 + $0x8c] sm:$0x1]  ;;  %v9351_v1 = vld [vmem:[%s9927_s3 + $0x100] sm:$0xff]  }
 0x15a   : > { %7455 = vmatmul.mubr.bf16.gmra.mrb[28].mxu0 %v7926_v57  ;;  %v4805_v58 = vor.u32 %v4804_v6, %v4801_v28  ;;  %v4828_v57 = vrot.slane %v4826_v8, 5  ;;  %v9340_v35 = vrot.slane %v4832_v2, 5  ;;  %v4838_v0 = vrot.slane %v4836_v61, 4  ;;  %9979 = vst [vmem:[#allocation16_spill] sm:$0xff] %v9351_v1  ;;  %v9354_v28 = vld [vmem:[#allocation2 + $0x98] sm:$0x1] }
 0x15b   : > { %7247 = vmatmul.mubr.bf16.gmra.mrb[12].mxu1 %v9976_v15  ;;  %7474 = vmatprep.mubr.bf16.mxu0 %v9091_v5  ;;  %v4591_v15 = vld [vmem:[#allocation2 + $0x9c] sm:$0xf]  ;;  %v4849_v54 = vrot.slane %v4847_v16, 4  ;;  %v4852_v5 = vrot.slane %v4850_v45, 5  ;;  %v9346_v60 = vrot.slane %v4856_v31, 5  ;;  %v4862_v6 = vrot.slane %v4860_v47, 4 }
 0x15c   : > { %7250 = vmatprep.mubr.bf16.mxu1 %v9977_v43  ;;  %7279 = vmatpush3.bf16.msra.mxu1 %v7931_v37  ;;  %v4815_v37 = vor.u32 %v4814_v4, %v9317_v24  ;;  %v4825_v43 = vrot.slane %v4823_v21, 4  ;;  %v4768_v44 = vrot.slane %v4767_v19, 4  ;;  %v4782_v4 = vrot.slane %v4781_v62, 4  ;;  %v7930_v31 = vld [vmem:[%s9927_s3 + $0x208] sm:$0xff]  }
 0x15d   : > { %7280 = vmatprep.subr.bf16.mxu1 %v7933_v55  ;;  %v4871_v21 = vshrl.u32 %v4591_v15, 16  ;;  %v4792_v8 = vrot.slane %v4791_v22, 4  ;;  %v4820_v2 = vrot.slane %v4818_v36, 5  ;;  %v4880_v61 = vshll.u32 %v9342_v14, 16 }
 0x15e   : > { %v4884_v16 = vshrl.u32 %v9342_v14, 16  ;;  %v9980_v45 = vcombine.low %v9064_v12, %v9068_v25  ;;  %v4806_v47 = vrot.slane %v4805_v58, 4  ;;  %v4816_v19 = vrot.slane %v4815_v37, 4 }
 0x15f   : > { %v4829_v62 = vor.u32 %v4828_v57, %v4825_v43  ;;  %v9981_v22 = vcombine.low %v9095_v34, %v9099_v20  ;;  %v4839_v36 = vor.u32 %v4838_v0, %v9340_v35  ;;  %v4863_v14 = vor.u32 %v4862_v6, %v9346_v60  ;;  %v9387_v43 = vld [vmem:[#allocation2 + $0xa4] sm:$0x1]  ;;  %v9403_v0 = vld [vmem:[#allocation2 + $0xac] sm:$0xf] }
 0x160   : > { %7281 = vmatpush3.bf16.msra.mxu1 %v7933_v55  ;;  %v4874_v55 = vshll.u32 %v4591_v15, 16  ;;  %v4853_v15 = vor.u32 %v4852_v5, %v4849_v54  ;;  %v4866_v12 = vshll.u32 %v9354_v28, 16  ;;  %v4763_v25 = vsel %vm8152_vm2, %v9331_v9, %v9303_v30 }
 0x161   : > { %7554 = vmatprep.subr.bf16.mxu1 %v9351_v1  ;;  %v4842_v1 = vshll.u32 %v9344_v38, 16  ;;  %v4773_v58 = vsel %vm8152_vm2, %v4768_v44, %v9310_v50  ;;  %v4873_v34 = vrot.slane %v4871_v21, 4  ;;  %v4787_v37 = vsel %vm8152_vm2, %v4782_v4, %v9312_v32  ;;  %v4594_v50 = vld [vmem:[#allocation2 + $0xa8] sm:$0xf] }
 0x162   : > { %7475 = vmatmul.mubr.bf16.vlgmr.msra.gmra.mrb[0].mxu0 %v9134_v7  ;;  %v4876_v20 = vrot.slane %v4874_v55, 5  ;;  %v4797_v7 = vsel %vm8152_vm2, %v4792_v8, %v9334_v42  ;;  %v9389_v30 = vrot.slane %v4880_v61, 5  ;;  %v4886_v9 = vrot.slane %v4884_v16, 4 }
 0x163   : > { %7251 = vmatmul.mubr.bf16.gmra.mrb[16].mxu1 %v9980_v45  ;;  %7507 = vmatpush3.bf16.msra.mxu0 %v9122_v63  ;;  %v7932_v63 = vld [vmem:[%s9927_s3 + $0x210] sm:$0xff]   ;;  %v4821_v32 = vsel %vm8152_vm2, %v4816_v19, %v4820_v2  ;;  %v9399_v57 = vrot.slane %v4829_v62, 4  ;;  %v9401_v42 = vrot.slane %v4842_v1, 5  ;;  %v9405_v54 = vrot.slane %v4839_v36, 4 }
 0x164   : > { %7254 = vmatprep.mubr.bf16.mxu1 %v9981_v22  ;;  %7478 = vmatprep.mubr.bf16.mxu0 %v9237_v13  ;;  %v4811_v13 = vsel %vm8152_vm2, %v4806_v47, %v9317_v24  ;;  %v9407_v5 = vrot.slane %v4853_v15, 4  ;;  %v9409_v6 = vrot.slane %v4863_v14, 4  ;;  %v9411_v44 = vrot.slane %v4866_v12, 5  ;;  %v7934_v47 = vld [vmem:[%s9927_s3 + $0x218] sm:$0xff]   ;;  %v5317_v15 = vld [vmem:[#allocation2 + $0x54] sm:$0xe] }
 0x165   : > { %7508 = vmatprep.subr.bf16.mxu0 %v7930_v31  ;;  %v9982_v24 = vsel %vm8152_vm2, %v9259_v48, %v9249_v11  ;;  %v9983_v4 = vsel %vm8152_vm2, %v9234_v18, %v9187_v49  ;;  %v4877_v21 = vor.u32 %v4876_v20, %v4873_v34  ;;  %v4890_v55 = vshll.u32 %v9387_v43, 16  ;;  %v5316_v48 = vld [vmem:[#allocation2 + $0x48] sm:$0xe]  ;;  %v9985_v18 = vld [vmem:[#allocation4_spill] sm:$0xff] }
 0x166   : > { %v9423_v1 = vcombine.low %v9983_v4, %v9982_v24  ;;  %v4895_v8 = vshrl.u32 %v4594_v50, 16  ;;  %v6351_v14 = vcombine.low %v9297_v40, %v9301_v52  ;;  %v4887_v2 = vor.u32 %v4886_v9, %v9389_v30  ;;  %v5318_v20 = vld [vmem:[#allocation2 + $0x60] sm:$0xe]  ;;  %v9989_v4 = vld [vmem:[#allocation6_spill] sm:$0xff] }
 0x167   : > { %7509 = vmatpush3.bf16.msra.mxu0 %v7930_v31  ;;  %v4898_v61 = vshll.u32 %v4594_v50, 16  ;;  %v4904_v11 = vshll.u32 %v9403_v0, 16  ;;  %v9984_v16 = vor.u32 %v8915_v53, %v8906_v41  ;;  %v9986_v45 = vcombine.low %v9126_v39, %v9985_v18 }
 0x168   : > { %7510 = vmatprep.subr.bf16.mxu0 %v7932_v63  ;;  %v9438_v31 = vcombine.low %v4763_v25, %v4773_v58  ;;  %v9443_v19 = vcombine.low %v4787_v37, %v4797_v7  ;;  %v9445_v62 = vcombine.low %v4811_v13, %v4821_v32  ;;  %v9987_v53 = vcombine.low %v9183_v17, %v9208_v23  ;;  %v9466_v23 = vld [vmem:[#allocation2 + $0xb0] sm:$0x1]  ;;  %v9481_v13 = vld [vmem:[#allocation2 + $0xb4] sm:$0xf]  ;;  %v9988_v32 = vld [vmem:[#allocation3_spill] sm:$0xff] }
 0x169   : > { %v9433_v49 = vrot.slane %v9984_v16, 4  ;;  %v4835_v39 = vsel %vm8152_vm2, %v9399_v57, %v9340_v35  ;;  %v4845_v22 = vsel %vm8152_vm2, %v9405_v54, %v9401_v42  ;;  %v9469_v12 = vrot.slane %v4877_v21, 4 }
 0x16a   : > { %7479 = vmatmul.mubr.bf16.gmra.mrb[4].mxu0 %v9239_v26  ;;  %v9471_v25 = vrot.slane %v4890_v55, 5  ;;  %v9473_v58 = vrot.slane %v4895_v8, 4  ;;  %v6580_v34 = vrot.slane %v5316_v48, 9  ;;  %v9476_v37 = vrot.slane %v4887_v2, 4  ;;  %v7937_v26 = vld [vmem:[%s9927_s3 + $0x220] sm:$0xff]  }
 0x16b   : > { %7255 = vmatmul.mubr.bf16.gmra.mrb[20].mxu1 %v9986_v45  ;;  %7482 = vmatprep.mubr.bf16.mxu0 %v9257_v59  ;;  %v4900_v7 = vrot.slane %v4898_v61, 5  ;;  %v9478_v9 = vrot.slane %v4904_v11, 5  ;;  %v4908_v50 = vshrl.u32 %v9403_v0, 16  ;;  %v5406_v24 = vrot.slane %v9988_v32, 5  ;;  %v5319_v48 = vld [vmem:[#allocation2 + $0x6c] sm:$0xe] }
 0x16c   : > { %7258 = vmatprep.mubr.bf16.mxu1 %v9987_v53  ;;  %7511 = vmatpush3.bf16.msra.mxu0 %v7932_v63  ;;  %v5409_v21 = vrot.slane %v9989_v4, 5  ;;  %v6581_v59 = vrot.slane %v5317_v15, 9  ;;  %v9990_v63 = vld [vmem:[#allocation5_spill] sm:$0xff]  ;;  %v4914_v8 = vshll.u32 %v9466_v23, 16  ;;  %v5416_v2 = vrot.slane %v9185_v3, 5  ;;  %v9991_v32 = vld [vmem:[#allocation8_spill] sm:$0xff] }
 0x16d   : > { %7512 = vmatprep.subr.bf16.mxu0 %v7934_v47  ;;  %v5413_v55 = vrot.slane %v9990_v63, 5  ;;  %v6582_v61 = vrot.slane %v5318_v20, 9  ;;  %v5420_v11 = vrot.slane %v9243_v46, 5  ;;  %v4919_v16 = vshrl.u32 %v9481_v13, 16  ;;  %v9993_v63 = vld [vmem:[#allocation10_spill] sm:$0xff] }
 0x16e   : > { %v9495_v18 = vsel %vm8564_vm13, %v6580_v34, %v5406_v24  ;;  %v5408_v45 = vrot.slane %v5406_v24, 4  ;;  %v5423_v46 = vrot.slane %v9245_v27, 5  ;;  %v9992_v4 = vcombine.low %v9212_v10, %v9991_v32  ;;  %v7940_v34 = vld [vmem:[%s9927_s3 + $0x228] sm:$0xff]   ;;  %v9512_v24 = vld [vmem:[#allocation2 + $0xb8] sm:$0xf] }
 0x16f   : > { %v9499_v53 = vsel %vm8564_vm13, %v6581_v59, %v5413_v55  ;;  %v5415_v15 = vrot.slane %v5413_v55, 4  ;;  %v9503_v3 = vsel %vm8564_vm13, %v6582_v61, %v5420_v11  ;;  %v5422_v20 = vrot.slane %v5420_v11, 4  ;;  %v9994_v61 = vld [vmem:[#allocation9_spill] sm:$0xff]  ;;  %v9995_v11 = vld [vmem:[#allocation11_spill] sm:$0xff] }
 0x170   : > { %7513 = vmatpush3.bf16.msra.mxu0 %v7934_v47  ;;  %v9516_v47 = vsel %vm8564_vm13, %v5408_v45, %v5409_v21  ;;  %v6583_v59 = vrot.slane %v5319_v48, 9  ;;  %v5427_v55 = vrot.slane %v9993_v63, 5  ;;  %v5430_v27 = vrot.slane %v9287_v51, 5  ;;  %v2946_v48 = vld [vmem:[#allocation2 + $0x78] sm:$0xf] }
 0x171   : > { %7514 = vmatprep.subr.bf16.mxu0 %v7937_v26  ;;  %v9996_v10 = vcombine.low %v9994_v61, %v9995_v11  ;;  %v4901_v32 = vor.u32 %v4900_v7, %v9473_v58  ;;  %v9528_v36 = vsel %vm8564_vm13, %v5415_v15, %v5416_v2  ;;  %v9532_v21 = vsel %vm8564_vm13, %v5422_v20, %v5423_v46  ;;  %v5320_v63 = vld [vmem:[#allocation2 + $0x78] sm:$0xe]  ;;  %v9998_v2 = vld [vmem:[#allocation12_spill] sm:$0xff] }
 0x172   : > { %7483 = vmatmul.mubr.bf16.gmra.mrb[8].mxu0 %v9423_v1  ;;  %v9541_v7 = vsel %vm8564_vm13, %v6583_v59, %v5427_v55  ;;  %v5429_v45 = vrot.slane %v5427_v55, 4  ;;  %v4910_v1 = vrot.slane %v4908_v50, 4  ;;  %v4922_v15 = vshll.u32 %v9481_v13, 16  ;;  %v7935_v13 = vld [vmem:[#allocation2 + $0xc] sm:$0xff]  }
 0x173   : > { %7259 = vmatmul.mubr.bf16.gmra.mrb[24].mxu1 %v9992_v4  ;;  %7486 = vmatprep.mubr.bf16.mxu0 %v9438_v31  ;;  %v4928_v20 = vshll.u32 %v9512_v24, 16  ;;  %v4893_v46 = vsel %vm8152_vm2, %v9476_v37, %v9471_v25  ;;  %v7943_v31 = vld [vmem:[%s9927_s3 + $0x230] sm:$0xff]   ;;  %v3184_v59 = vshrl.u32 %v2946_v48, 16  ;;  %v3187_v50 = vshll.u32 %v2946_v48, 16  ;;  %v5321_v37 = vld [vmem:[#allocation2 + $0x84] sm:$0xe] }
 0x174   : > { %7262 = vmatprep.mubr.bf16.mxu1 %v9996_v10  ;;  %7515 = vmatpush3.bf16.msra.mxu0 %v7937_v26  ;;  %v9559_v26 = vsel %vm8564_vm13, %v5429_v45, %v5430_v27  ;;  %v9561_v55 = vrot.slane %v4914_v8, 5  ;;  %v9563_v61 = vrot.slane %v4919_v16, 4  ;;  %v4932_v11 = vshrl.u32 %v9512_v24, 16  ;;  %v9997_v27 = vld [vmem:[#allocation7_spill] sm:$0xff]  ;;  %v4600_v45 = vld [vmem:[#allocation2 + $0xc0] sm:$0xf] }
 0x175   : > { %7516 = vmatprep.subr.bf16.mxu0 %v7940_v34  ;;  %v6615_v25 = vcombine.low %v9541_v7, %v9559_v26  ;;  %v9568_v10 = vrot.slane %v4901_v32, 4  ;;  %v3186_v58 = vrot.slane %v3184_v59, 4  ;;  %v3189_v51 = vrot.slane %v3187_v50, 5  ;;  %v9581_v32 = vld [vmem:[#allocation2 + $0xc4] sm:$0xf]  ;;  %v9999_v59 = vld [vmem:[#allocation13_spill] sm:$0xff] }
 0x176   : > { %v3206_v48 = vsel %vm8152_vm2, %v9433_v49, %v9997_v27  ;;  %v4911_v8 = vor.u32 %v4910_v1, %v9478_v9  ;;  %v9575_v16 = vrot.slane %v4922_v15, 5  ;;  %v6584_v4 = vrot.slane %v5320_v63, 9  ;;  %v7946_v49 = vld [vmem:[%s9927_s3 + $0x238] sm:$0xff]  }
 0x177   : > { %v5434_v17 = vrot.slane %v9998_v2, 5  ;;  %v5437_v1 = vrot.slane %v9322_v29, 5  ;;  %v6585_v15 = vrot.slane %v5321_v37, 9  ;;  %v5441_v50 = vrot.slane %v9999_v59, 5  ;;  %v9637_v59 = vld [vmem:[#allocation2 + $0xc8] sm:$0x1] }
 0x178   : > { %7517 = vmatpush3.bf16.msra.mxu0 %v7940_v34  ;;  %v3190_v34 = vor.u32 %v3189_v51, %v3186_v58  ;;  %v9588_v63 = vrot.slane %v4928_v20, 5  ;;  %v9590_v2 = vrot.slane %v4932_v11, 4  ;;  %v5444_v20 = vrot.slane %v9344_v38, 5 }
 0x179   : > { %7518 = vmatprep.subr.bf16.mxu0 %v7943_v31  ;;  %v9594_v40 = vsel %vm8564_vm13, %v6584_v4, %v5434_v17  ;;  %v5436_v52 = vrot.slane %v5434_v17, 4  ;;  %v9601_v29 = vsel %vm8564_vm13, %v6585_v15, %v5441_v50  ;;  %v5443_v58 = vrot.slane %v5441_v50, 4  ;;  %v7936_v17 = vld [vmem:[#allocation2 + $0x18] sm:$0xff]   ;;  %v10003_v50 = vld [vmem:[#allocation16_spill] sm:$0xff] }
 0x17a   : > { %7487 = vmatmul.mubr.bf16.gmra.mrb[12].mxu0 %v9443_v19  ;;  %v3191_v51 = vrot.slane %v3190_v34, 4  ;;  %v4946_v11 = vshll.u32 %v4600_v45, 16  ;;  %v4952_v4 = vshll.u32 %v9581_v32, 16  ;;  %v4956_v37 = vshrl.u32 %v9581_v32, 16 }
 0x17b   : > { %7263 = vmatmul.mubr.bf16.gmra.mrb[28].mxu1 %v6351_v14  ;;  %v9597_v14 = vld [vmem:[#allocation2 + $0xbc] sm:$0x1]  ;;  %7490 = vmatprep.mubr.bf16.mxu0 %v9445_v62  ;;  %v9608_v19 = vsel %vm8564_vm13, %v5436_v52, %v5437_v1  ;;  %v9618_v62 = vsel %vm8564_vm13, %v5443_v58, %v5444_v20  ;;  %v10001_v42 = vsel %vm8152_vm2, %v9407_v5, %v9346_v60  ;;  %v9660_v5 = vld [vmem:[#allocation2 + $0xd0] sm:$0xf] }
 0x17c   : > { %7282 = vmatprep.mubr.bf16.mxu1 %v7935_v13  ;;  %7519 = vmatpush3.bf16.msra.mxu0 %v7943_v31  ;;  %v4943_v13 = vshrl.u32 %v4600_v45, 16  ;;  %v3196_v27 = vsel %vm8152_vm2, %v3191_v51, %v8906_v41  ;;  %v6616_v38 = vcombine.low %v9594_v40, %v9608_v19  ;;  %v7938_v31 = vld [vmem:[#allocation2 + $0x24] sm:$0xff]   ;;  %v4912_v45 = vrot.slane %v4911_v8, 4  ;;  %v10004_v58 = vld [vmem:[#allocation14_spill] sm:$0xff] }
 0x17d   : > { %7520 = vmatprep.subr.bf16.mxu0 %v7946_v49  ;;  %v4938_v34 = vshll.u32 %v9597_v14, 16  ;;  %v9621_v1 = vcombine.low %v3196_v27, %v3206_v48  ;;  %v6617_v15 = vcombine.low %v9601_v29, %v9618_v62  ;;  %v6561_v41 = vcombine.low %v4835_v39, %v4845_v22  ;;  %v4603_v22 = vld [vmem:[#allocation2 + $0xcc] sm:$0xf]  ;;  %v8032_v19 = vld [vmem:[#allocation2 + $0xb0] sm:$0x1] }
 0x17e   : > { %v4925_v8 = vor.u32 %v9575_v16, %v9563_v61  ;;  %v10000_v48 = vsel %vm8152_vm2, %v9409_v6, %v9411_v44  ;;  %v10002_v35 = vsel %vm8152_vm2, %v9469_v12, %v9389_v30  ;;  %v4907_v39 = vsel %vm8152_vm2, %v9568_v10, %v9478_v9  ;;  %v5322_v6 = vld [vmem:[#allocation2 + $0x90] sm:$0xe]  ;;  %v8007_v10 = vld [vmem:[%s9927_s3 + $0x108] sm:$0xff]  }
 0x17f   : > { %v6562_v54 = vcombine.low %v10001_v42, %v10000_v48  ;;  %v6563_v57 = vcombine.low %v10002_v35, %v4893_v46  ;;  %v4945_v44 = vrot.slane %v4943_v13, 4  ;;  %v4948_v61 = vrot.slane %v4946_v11, 5  ;;  %v5323_v13 = vld [vmem:[#allocation2 + $0x9c] sm:$0xe] }
 0x180   : > { %7521 = vmatpush3.bf16.msra.mxu0 %v7946_v49  ;;  %v9658_v16 = vrot.slane %v4952_v4, 5  ;;  %v4958_v60 = vrot.slane %v4956_v37, 4  ;;  %v4917_v30 = vsel %vm8152_vm2, %v4912_v45, %v9561_v55  ;;  %v4935_v12 = vor.u32 %v9590_v2, %v9588_v63 }
 0x181   : > { %v9668_v9 = vrot.slane %v4938_v34, 5  ;;  %v4962_v46 = vshll.u32 %v9637_v59, 16  ;;  %v4926_v49 = vrot.slane %v4925_v8, 4  ;;  %v4967_v52 = vshrl.u32 %v4603_v22, 16  ;;  %v7941_v34 = vld [vmem:[#allocation2 + $0x3c] sm:$0xff]  }
 0x182   : > { %7491 = vmatmul.mubr.bf16.gmra.mrb[16].mxu0 %v6561_v41  ;;  %v6586_v51 = vrot.slane %v5322_v6, 9  ;;  %v5448_v20 = vrot.slane %v10004_v58, 5  ;;  %v4970_v55 = vshll.u32 %v4603_v22, 16  ;;  %v4976_v2 = vshll.u32 %v9660_v5, 16  ;;  %v10005_v22 = vld [vmem:[#allocation15_spill] sm:$0xff] }
 0x183   : > { %7283 = vmatmul.mubr.bf16.vlgmr.msra.gmra.mrb[0].mxu1 %v7936_v17  ;;  %7494 = vmatprep.mubr.bf16.mxu0 %v6562_v54  ;;  %v4980_v11 = vshrl.u32 %v9660_v5, 16  ;;  %v5451_v4 = vrot.slane %v9354_v28, 5  ;;  %v7939_v17 = vld [vmem:[#allocation2 + $0x30] sm:$0xff]   ;;  %v4949_v37 = vor.u32 %v4948_v61, %v4945_v44  ;;  %v4959_v27 = vor.u32 %v4958_v60, %v9658_v16  ;;  %v8009_v58 = vld [vmem:[%s9927_s3 + $0x118] sm:$0xff]  }
 0x184   : > { %7562 = vmatpush3.bf16.msra.mxu1 %v10003_v50  ;;  %7286 = vmatprep.mubr.bf16.mxu1 %v7938_v31  ;;  %v9681_v31 = vsel %vm8564_vm13, %v6586_v51, %v5448_v20  ;;  %v5450_v45 = vrot.slane %v5448_v20, 4  ;;  %v6564_v41 = vcombine.low %v4907_v39, %v4917_v30  ;;  %v4936_v8 = vrot.slane %v4935_v12, 4  ;;  %v8008_v54 = vld [vmem:[%s9927_s3 + $0x110] sm:$0xff]  }
 0x185   : > { %7555 = vmatprep.subr.bf16.mxu1 %v8007_v10  ;;  %v4964_v48 = vrot.slane %v4962_v46, 5  ;;  %v6587_v42 = vrot.slane %v5323_v13, 9  ;;  %v4969_v28 = vrot.slane %v4967_v52, 4  ;;  %v5455_v6 = vrot.slane %v10005_v22, 5  ;;  %v9692_v61 = vld [vmem:[#allocation2 + $0xd4] sm:$0x1] }
 0x186   : > { %v9688_v35 = vsel %vm8564_vm13, %v5450_v45, %v5451_v4  ;;  %v5458_v44 = vrot.slane %v9387_v43, 5  ;;  %v4972_v39 = vrot.slane %v4970_v55, 5  ;;  %v9694_v60 = vrot.slane %v4976_v2, 5  ;;  %v7942_v2 = vld [vmem:[#allocation2 + $0x48] sm:$0xff]   ;;  %v7944_v45 = vld [vmem:[#allocation2 + $0x54] sm:$0xff]  }
 0x187   : > { %v4982_v50 = vrot.slane %v4980_v11, 4  ;;  %v6618_v30 = vcombine.low %v9681_v31, %v9688_v35  ;;  %v4950_v12 = vrot.slane %v4949_v37, 4  ;;  %v4960_v46 = vrot.slane %v4959_v27, 4 }
 0x188   : > { %7563 = vmatpush3.bf16.msra.mxu1 %v8007_v10  ;;  %v9700_v10 = vsel %vm8564_vm13, %v6587_v42, %v5455_v6  ;;  %v5457_v52 = vrot.slane %v5455_v6, 4  ;;  %v4931_v43 = vsel %vm8152_vm2, %v4926_v49, %v9588_v63  ;;  %v4941_v51 = vsel %vm8152_vm2, %v4936_v8, %v9668_v9  ;;  %v5312_v63 = vld [vmem:[#allocation2 + $0x18] sm:$0xe]  ;;  %v5324_v9 = vld [vmem:[#allocation2 + $0xa8] sm:$0xe] }
 0x189   : > { %7556 = vmatprep.subr.bf16.mxu1 %v8008_v54  ;;  %v4986_v20 = vshll.u32 %v9692_v61, 16  ;;  %v4983_v55 = vor.u32 %v4982_v50, %v9694_v60  ;;  %v4955_v11 = vsel %vm8152_vm2, %v4950_v12, %v9658_v16  ;;  %v4965_v4 = vsel %vm8152_vm2, %v4960_v46, %v4964_v48  ;;  %v8012_v48 = vld [vmem:[#allocation2 + $0x20] sm:$0x1] }
 0x18a   : > { %7495 = vmatmul.mubr.bf16.gmra.mrb[20].mxu0 %v6563_v57  ;;  %v9714_v13 = vsel %vm8564_vm13, %v5457_v52, %v5458_v44  ;;  %v4973_v57 = vor.u32 %v4972_v39, %v4969_v28  ;;  %v6565_v27 = vcombine.low %v4931_v43, %v4941_v51  ;;  %v6576_v8 = vrot.slane %v5312_v63, 9  ;;  %v5325_v28 = vld [vmem:[#allocation2 + $0xb4] sm:$0xe]  ;;  %v5313_v39 = vld [vmem:[#allocation2 + $0x24] sm:$0xe] }
 0x18b   : > { %7287 = vmatmul.mubr.bf16.gmra.mrb[4].mxu1 %v7939_v17  ;;  %7498 = vmatprep.mubr.bf16.mxu0 %v6564_v41  ;;  %v6619_v49 = vcombine.low %v9700_v10, %v9714_v13  ;;  %v8010_v17 = vld [vmem:[#allocation2 + $0x1c] sm:$0xf]  ;;  %v8011_v41 = vld [vmem:[%s9927_s3 + $0x120] sm:$0xff]   ;;  %v6588_v42 = vrot.slane %v5324_v9, 9  ;;  %v6566_v16 = vcombine.low %v4955_v11, %v4965_v4  ;;  %v4984_v6 = vrot.slane %v4983_v55, 4  ;;  %v8015_v9 = vld [vmem:[%s9927_s3 + $0x128] sm:$0xff]  }
 0x18c   : > { %7290 = vmatprep.mubr.bf16.mxu1 %v7941_v34  ;;  %7564 = vmatpush3.bf16.msra.mxu1 %v8008_v54  ;;  %v5378_v37 = vrot.slane %v8010_v17, 5  ;;  %v4988_v34 = vrot.slane %v4986_v20, 5  ;;  %v5462_v54 = vrot.slane %v9403_v0, 5  ;;  %v4974_v22 = vrot.slane %v4973_v57, 4  ;;  %v8013_v43 = vld [vmem:[#allocation2 + $0x28] sm:$0xf] }
 0x18d   : > { %7557 = vmatprep.subr.bf16.mxu1 %v8009_v58  ;;  %v5381_v44 = vrot.slane %v8012_v48, 5  ;;  %v5465_v52 = vrot.slane %v9466_v23, 5  ;;  %v5385_v0 = vrot.slane %v8013_v43, 5  ;;  %v5314_v51 = vld [vmem:[#allocation2 + $0x30] sm:$0xe]  ;;  %v6589_v57 = vrot.slane %v5325_v28, 9 }
 0x18e   : > { %v5380_v50 = vrot.slane %v5378_v37, 4  ;;  %v9730_v12 = vsel %vm8564_vm13, %v6588_v42, %v5462_v54  ;;  %v5464_v46 = vrot.slane %v5462_v54, 4  ;;  %v5379_v55 = vsel %vm8564_vm13, %v6576_v8, %v5378_v37  ;;  %v7947_v42 = vld [vmem:[#allocation2 + $0x6c] sm:$0xff]   ;;  %v5315_v43 = vld [vmem:[#allocation2 + $0x3c] sm:$0xe] }
 0x18f   : > { %v6577_v63 = vrot.slane %v5313_v39, 9  ;;  %v4979_v11 = vsel %vm8152_vm2, %v4974_v22, %v9694_v60  ;;  %v4989_v4 = vsel %vm8152_vm2, %v4984_v6, %v4988_v34  ;;  %v5472_v37 = vrot.slane %v9597_v14, 5  ;;  %v8016_v54 = vld [vmem:[#allocation2 + $0x2c] sm:$0x1]  ;;  %v8018_v14 = vld [vmem:[%s9927_s3 + $0x130] sm:$0xff]  }
 0x190   : > { %7565 = vmatpush3.bf16.msra.mxu1 %v8009_v58  ;;  %v8014_v58 = vld [vmem:[#allocation2 + $0x34] sm:$0xf]  ;;  %v9740_v23 = vsel %vm8564_vm13, %v5464_v46, %v5465_v52  ;;  %v5387_v60 = vrot.slane %v5385_v0, 4  ;;  %v5388_v28 = vrot.slane %v8016_v54, 5  ;;  %v6567_v6 = vcombine.low %v4979_v11, %v4989_v4 }
 0x191   : > { %7558 = vmatprep.subr.bf16.mxu1 %v8011_v41  ;;  %v5392_v20 = vrot.slane %v8014_v58, 5  ;;  %v6620_v17 = vcombine.low %v9730_v12, %v9740_v23  ;;  %v5386_v46 = vsel %vm8564_vm13, %v6577_v63, %v5385_v0  ;;  %v8020_v0 = vld [vmem:[%s9927_s3 + $0x138] sm:$0xff]   ;;  %v2943_v63 = vld [vmem:[#allocation2 + $0x6c] sm:$0xf]  ;;  %v5476_v11 = vrot.slane %v9581_v32, 5 }
 0x192   : > { %7499 = vmatmul.mubr.bf16.gmra.mrb[24].mxu0 %v6565_v27  ;;  %v7945_v27 = vld [vmem:[#allocation2 + $0x60] sm:$0xff]   ;;  %v5479_v4 = vrot.slane %v9637_v59, 5  ;;  %v3163_v32 = vshll.u32 %v2943_v63, 16 }
 0x193   : > { %7291 = vmatmul.mubr.bf16.gmra.mrb[8].mxu1 %v7942_v2  ;;  %v5469_v2 = vrot.slane %v9512_v24, 5  ;;  %7502 = vmatprep.mubr.bf16.mxu0 %v6566_v16  ;;  %v5394_v34 = vrot.slane %v5392_v20, 4  ;;  %v8017_v16 = vld [vmem:[#allocation2 + $0x38] sm:$0x1] }
 0x194   : > { %7294 = vmatprep.mubr.bf16.mxu1 %v7944_v45  ;;  %7566 = vmatpush3.bf16.msra.mxu1 %v8011_v41  ;;  %v5382_v45 = vsel %vm8564_vm13, %v5380_v50, %v5381_v44  ;;  %v6578_v41 = vrot.slane %v5314_v51, 9  ;;  %v5395_v22 = vrot.slane %v8017_v16, 5  ;;  %v5326_v44 = vld [vmem:[#allocation2 + $0xc0] sm:$0xe]  ;;  %v5389_v51 = vsel %vm8564_vm13, %v5387_v60, %v5388_v28  ;;  %v7949_v60 = vld [vmem:[#allocation2 + $0x84] sm:$0xff]  }
 0x195   : > { %7559 = vmatprep.subr.bf16.mxu1 %v8015_v9  ;;  %v9755_v24 = vsel %vm8564_vm13, %v6589_v57, %v5469_v2  ;;  %v5471_v8 = vrot.slane %v5469_v2, 4  ;;  %v6608_v39 = vcombine.low %v5379_v55, %v5382_v45  ;;  %v8019_v57 = vld [vmem:[#allocation2 + $0x40] sm:$0xf]  ;;  %v5327_v2 = vld [vmem:[#allocation2 + $0xcc] sm:$0xe]  ;;  %v5483_v16 = vrot.slane %v9660_v5, 5 }
 0x196   : > { %v5393_v52 = vsel %vm8564_vm13, %v6578_v41, %v5392_v20  ;;  %v5396_v58 = vsel %vm8564_vm13, %v5394_v34, %v5395_v22  ;;  %v5399_v55 = vrot.slane %v8019_v57, 5  ;;  %v6579_v20 = vrot.slane %v5315_v43, 9  ;;  %v8021_v41 = vld [vmem:[#allocation2 + $0x44] sm:$0x1] }
 0x197   : > { %v9762_v48 = vsel %vm8564_vm13, %v5471_v8, %v5472_v37  ;;  %v7948_v37 = vld [vmem:[#allocation2 + $0x78] sm:$0xff]   ;;  %v6610_v45 = vcombine.low %v5393_v52, %v5396_v58  ;;  %v5402_v8 = vrot.slane %v8021_v41, 5  ;;  %v5478_v34 = vrot.slane %v5476_v11, 4 }
 0x198   : > { %7567 = vmatpush3.bf16.msra.mxu1 %v8015_v9  ;;  %v6621_v50 = vcombine.low %v9755_v24, %v9762_v48  ;;  %v6590_v9 = vrot.slane %v5326_v44, 9  ;;  %v5401_v54 = vrot.slane %v5399_v55, 4  ;;  %v3160_v22 = vshrl.u32 %v2943_v63, 16  ;;  %v7950_v63 = vld [vmem:[#allocation2 + $0x90] sm:$0xff]  }
 0x199   : > { %7560 = vmatprep.subr.bf16.mxu1 %v8018_v14  ;;  %v5485_v52 = vrot.slane %v5483_v16, 4  ;;  %v5400_v57 = vsel %vm8564_vm13, %v6579_v20, %v5399_v55  ;;  %v2952_v20 = vld [vmem:[#allocation2 + $0x90] sm:$0xf] }
 0x19a   : > { %7503 = vmatmul.mubr.bf16.gmra.mrb[28].mxu0 %v6567_v6  ;;  %v9781_v28 = vsel %vm8564_vm13, %v6590_v9, %v5476_v11  ;;  %v8022_v6 = vld [vmem:[#allocation2 + $0x70] sm:$0xf]  ;;  %v5403_v9 = vsel %vm8564_vm13, %v5401_v54, %v5402_v8  ;;  %v7951_v11 = vld [vmem:[#allocation2 + $0x9c] sm:$0xff]   ;;  %v10006_v8 = vcombine.low %v9495_v18, %v9516_v47  ;;  %v8025_v18 = vld [vmem:[#allocation2 + $0x8c] sm:$0x1] }
 0x19b   : > { %7295 = vmatmul.mubr.bf16.gmra.mrb[12].mxu1 %v7945_v27  ;;  %7522 = vmatprep.mubr.bf16.mxu0 %v6608_v39  ;;  %v6609_v27 = vcombine.low %v5386_v46, %v5389_v51  ;;  %v3169_v59 = vshll.u32 %v8022_v6, 16  ;;  %v3173_v44 = vshrl.u32 %v8022_v6, 16  ;;  %v9787_v39 = vsel %vm8564_vm13, %v5478_v34, %v5479_v4  ;;  %v2949_v4 = vld [vmem:[#allocation2 + $0x84] sm:$0xf]  ;;  %v7952_v6 = vld [vmem:[#allocation2 + $0xa8] sm:$0xff]  }
 0x19c   : > { %7298 = vmatprep.mubr.bf16.mxu1 %v7947_v42  ;;  %7568 = vmatpush3.bf16.msra.mxu1 %v8018_v14  ;;  %v6591_v42 = vrot.slane %v5327_v2, 9  ;;  %v5486_v14 = vrot.slane %v9692_v61, 5  ;;  %v6622_v5 = vcombine.low %v9781_v28, %v9787_v39  ;;  %v3162_v61 = vrot.slane %v3160_v22, 4 }
 0x19d   : > { %7561 = vmatprep.subr.bf16.mxu1 %v8020_v0  ;;  %v3165_v51 = vrot.slane %v3163_v32, 5  ;;  %v3171_v2 = vrot.slane %v3169_v59, 5  ;;  %v3208_v34 = vshrl.u32 %v2949_v4, 16  ;;  %v7953_v59 = vld [vmem:[#allocation2 + $0xb4] sm:$0xff]   ;;  %v3227_v47 = vshll.u32 %v8025_v18, 16 }
 0x19e   : > { %v9791_v46 = vsel %vm8564_vm13, %v6591_v42, %v5483_v16  ;;  %v9797_v43 = vsel %vm8564_vm13, %v5485_v52, %v5486_v14  ;;  %v8023_v42 = vld [vmem:[#allocation2 + $0x74] sm:$0x1]  ;;  %v8024_v16 = vld [vmem:[#allocation2 + $0x88] sm:$0xf] }
 0x19f   : > { %v6623_v58 = vcombine.low %v9791_v46, %v9797_v43  ;;  %v3166_v41 = vor.u32 %v3165_v51, %v3162_v61  ;;  %v3217_v22 = vshll.u32 %v8024_v16, 16  ;;  %v3221_v55 = vshrl.u32 %v8024_v16, 16 }
 0x1a0   : > { %7569 = vmatpush3.bf16.msra.mxu1 %v8020_v0  ;;  %v3175_v0 = vrot.slane %v3173_v44, 4  ;;  %v3210_v14 = vrot.slane %v3208_v34, 4  ;;  %v3232_v44 = vshrl.u32 %v2952_v20, 16 }
 0x1a1   : > { %v3167_v56 = vrot.slane %v3166_v41, 4  ;;  %v9808_v61 = vrot.slane %v3217_v22, 5  ;;  %v3223_v51 = vrot.slane %v3221_v55, 4  ;;  %v10007_v55 = vcombine.low %v9499_v53, %v9528_v36  ;;  %v8028_v53 = vld [vmem:[#allocation2 + $0x98] sm:$0x1] }
 0x1a2   : > { %7523 = vmatmul.mubr.bf16.vlgmr.msra.gmra.mrb[0].mxu0 %v6609_v27  ;;  %v3176_v27 = vor.u32 %v3175_v0, %v3171_v2  ;;  %v3234_v22 = vrot.slane %v3232_v44, 4  ;;  %v3251_v18 = vshll.u32 %v8028_v53, 16 }
 0x1a3   : > { %7299 = vmatmul.mubr.bf16.gmra.mrb[16].mxu1 %v7948_v37  ;;  %7526 = vmatprep.mubr.bf16.mxu0 %v6610_v45  ;;  %v6611_v37 = vcombine.low %v5400_v57, %v5403_v9  ;;  %v3211_v45 = vshll.u32 %v2949_v4, 16  ;;  %v3235_v57 = vshll.u32 %v2952_v20, 16  ;;  %v2955_v9 = vld [vmem:[#allocation2 + $0x9c] sm:$0xf]  ;;  %v3172_v0 = vsel %vm8152_vm2, %v3167_v56, %v3171_v2  ;;  %v7954_v20 = vld [vmem:[#allocation2 + $0xc0] sm:$0xff]  }
 0x1a4   : > { %7302 = vmatprep.mubr.bf16.mxu1 %v7949_v60  ;;  %v3179_v60 = vshll.u32 %v8023_v42, 16  ;;  %v3177_v54 = vrot.slane %v3176_v27, 4  ;;  %v3256_v41 = vshrl.u32 %v2955_v9, 16  ;;  %v3259_v27 = vshll.u32 %v2955_v9, 16  ;;  %v8027_v42 = vld [vmem:[#allocation2 + $0xa0] sm:$0xf] }
 0x1a5   : > { %v3213_v52 = vrot.slane %v3211_v45, 5  ;;  %v3269_v34 = vshrl.u32 %v8027_v42, 16  ;;  %v3224_v16 = vor.u32 %v3223_v51, %v9808_v61  ;;  %v3237_v2 = vrot.slane %v3235_v57, 5  ;;  %v2958_v51 = vld [vmem:[#allocation2 + $0xa8] sm:$0xf] }
 0x1a6   : > { %v3181_v32 = vrot.slane %v3179_v60, 5  ;;  %v3265_v60 = vshll.u32 %v8027_v42, 16  ;;  %v10008_v56 = vcombine.low %v9503_v3, %v9532_v21  ;;  %v8029_v3 = vld [vmem:[#allocation2 + $0xa4] sm:$0x1] }
 0x1a7   : > { %v3214_v45 = vor.u32 %v3213_v52, %v3210_v14  ;;  %v3261_v14 = vrot.slane %v3259_v27, 5  ;;  %v3271_v44 = vrot.slane %v3269_v34, 4  ;;  %v3225_v9 = vrot.slane %v3224_v16, 4 }
 0x1a8   : > { %v9823_v52 = vrot.slane %v3265_v60, 5  ;;  %v3238_v36 = vor.u32 %v3237_v2, %v3234_v22  ;;  %v3275_v21 = vshll.u32 %v8029_v3, 16  ;;  %v3253_v16 = vrot.slane %v3251_v18, 5 }
 0x1a9   : > { %v3215_v57 = vrot.slane %v3214_v45, 4 }
 0x1aa   : > { %7527 = vmatmul.mubr.bf16.gmra.mrb[4].mxu0 %v6611_v37  ;;  %v3239_v45 = vrot.slane %v3238_v36, 4  ;;  %v2964_v36 = vld [vmem:[#allocation2 + $0xc0] sm:$0xf] }
 0x1ab   : > { %7303 = vmatmul.mubr.bf16.gmra.mrb[20].mxu1 %v7950_v63  ;;  %7530 = vmatprep.mubr.bf16.mxu0 %v10006_v8  ;;  %v3182_v63 = vsel %vm8152_vm2, %v3177_v54, %v3181_v32  ;;  %v3229_v54 = vrot.slane %v3227_v47, 5  ;;  %v2961_v47 = vld [vmem:[#allocation2 + $0xb4] sm:$0xf]  ;;  %v3220_v60 = vsel %vm8152_vm2, %v3215_v57, %v9808_v61  ;;  %v3277_v61 = vrot.slane %v3275_v21, 5 }
 0x1ac   : > { %7306 = vmatprep.mubr.bf16.mxu1 %v7951_v11  ;;  %v8026_v11 = vld [vmem:[#allocation2 + $0x94] sm:$0xf]  ;;  %v6424_v8 = vcombine.low %v3172_v0, %v3182_v63  ;;  %v3280_v0 = vshrl.u32 %v2958_v51, 16  ;;  %v3283_v63 = vshll.u32 %v2958_v51, 16  ;;  %v3304_v22 = vshrl.u32 %v2961_v47, 16 }
 0x1ad   : > { %v3241_v4 = vshll.u32 %v8026_v11, 16  ;;  %v3245_v37 = vshrl.u32 %v8026_v11, 16  ;;  %v3230_v34 = vsel %vm8152_vm2, %v3225_v9, %v3229_v54  ;;  %v3307_v2 = vshll.u32 %v2961_v47, 16 }
 0x1ae   : > { %v6426_v57 = vcombine.low %v3220_v60, %v3230_v34  ;;  %v3306_v7 = vrot.slane %v3304_v22, 4 }
 0x1af   : > { %v9821_v32 = vrot.slane %v3241_v4, 5  ;;  %v3309_v26 = vrot.slane %v3307_v2, 5 }
 0x1b1   : > { %v3244_v53 = vsel %vm8152_vm2, %v3239_v45, %v9821_v32 }
 0x1b2   : > { %7531 = vmatmul.mubr.bf16.gmra.mrb[8].mxu0 %v10007_v55  ;;  %v8031_v55 = vld [vmem:[#allocation2 + $0xb8] sm:$0xf] }
 0x1b3   : > { %7307 = vmatmul.mubr.bf16.gmra.mrb[24].mxu1 %v7952_v6  ;;  %7534 = vmatprep.mubr.bf16.mxu0 %v10008_v56  ;;  %v3247_v6 = vrot.slane %v3245_v37, 4  ;;  %v3272_v37 = vor.u32 %v3271_v44, %v9823_v52  ;;  %v3317_v56 = vshrl.u32 %v8031_v55, 16 }
 0x1b4   : > { %7310 = vmatprep.mubr.bf16.mxu1 %v7953_v59  ;;  %v3258_v59 = vrot.slane %v3256_v41, 4  ;;  %v8030_v41 = vld [vmem:[#allocation2 + $0xac] sm:$0xf] }
 0x1b5   : > { %v3248_v11 = vor.u32 %v3247_v6, %v9821_v32  ;;  %v3289_v27 = vshll.u32 %v8030_v41, 16  ;;  %v3293_v42 = vshrl.u32 %v8030_v41, 16  ;;  %v3282_v6 = vrot.slane %v3280_v0, 4  ;;  %v8033_v32 = vld [vmem:[#allocation2 + $0xc4] sm:$0xf] }
 0x1b6   : > { %v3262_v4 = vor.u32 %v3261_v14, %v3258_v59  ;;  %v3285_v59 = vrot.slane %v3283_v63, 5  ;;  %v3273_v14 = vrot.slane %v3272_v37, 4  ;;  %v3319_v9 = vrot.slane %v3317_v56, 4  ;;  %v8034_v41 = vld [vmem:[#allocation2 + $0xbc] sm:$0x1] }
 0x1b7   : > { %v3291_v44 = vrot.slane %v3289_v27, 5  ;;  %v3295_v51 = vrot.slane %v3293_v42, 4  ;;  %v3328_v0 = vshrl.u32 %v2964_v36, 16  ;;  %v3331_v63 = vshll.u32 %v2964_v36, 16  ;;  %v8035_v56 = vld [vmem:[#allocation2 + $0xc8] sm:$0x1] }
 0x1b8   : > { %v3263_v54 = vrot.slane %v3262_v4, 4  ;;  %v3286_v3 = vor.u32 %v3285_v59, %v3282_v6  ;;  %v3337_v47 = vshll.u32 %v8033_v32, 16  ;;  %v3341_v4 = vshrl.u32 %v8033_v32, 16 }
 0x1b9   : > { %v3296_v21 = vor.u32 %v3295_v51, %v3291_v44  ;;  %v3323_v27 = vshll.u32 %v8034_v41, 16  ;;  %v3333_v22 = vrot.slane %v3331_v63, 5 }
 0x1ba   : > { %7535 = vmatmul.mubr.bf16.gmra.mrb[12].mxu0 %v6615_v25  ;;  %v3268_v18 = vsel %vm8152_vm2, %v3263_v54, %v9823_v52  ;;  %v3287_v60 = vrot.slane %v3286_v3, 4  ;;  %v3339_v2 = vrot.slane %v3337_v47, 5 }
 0x1bb   : > { %7311 = vmatmul.mubr.bf16.gmra.mrb[28].mxu1 %v7954_v20  ;;  %v3313_v20 = vshll.u32 %v8031_v55, 16  ;;  %7538 = vmatprep.mubr.bf16.mxu0 %v6616_v38  ;;  %v3299_v38 = vshll.u32 %v8032_v19, 16  ;;  %v3297_v34 = vrot.slane %v3296_v21, 4  ;;  %v3343_v55 = vrot.slane %v3341_v4, 4 }
 0x1bc   : > { %7346 = vmatprep.mubr.bf16.mxu1 %v6424_v8  ;;  %v3249_v8 = vrot.slane %v3248_v11, 4  ;;  %v3278_v11 = vsel %vm8152_vm2, %v3273_v14, %v3277_v61  ;;  %v3325_v62 = vrot.slane %v3323_v27, 5 }
 0x1bd   : > { %v3315_v25 = vrot.slane %v3313_v20, 5  ;;  %v6428_v42 = vcombine.low %v3268_v18, %v3278_v11  ;;  %v3301_v45 = vrot.slane %v3299_v38, 5 }
 0x1be   : > { %v3254_v40 = vsel %vm8152_vm2, %v3249_v8, %v3253_v16  ;;  %v3330_v16 = vrot.slane %v3328_v0, 4  ;;  %v3347_v8 = vshll.u32 %v8035_v56, 16 }
 0x1bf   : > { %v3320_v37 = vor.u32 %v3319_v9, %v3315_v25  ;;  %v6427_v52 = vcombine.low %v3244_v53, %v3254_v40  ;;  %v3302_v31 = vsel %vm8152_vm2, %v3297_v34, %v3301_v45 }
 0x1c0   : > { %v3334_v35 = vor.u32 %v3333_v22, %v3330_v16  ;;  %v3349_v51 = vrot.slane %v3347_v8, 5 }
 0x1c1   : > { %v3321_v29 = vrot.slane %v3320_v37, 4 }
 0x1c2   : > { %7539 = vmatmul.mubr.bf16.gmra.mrb[16].mxu0 %v6617_v15  ;;  %v3292_v15 = vsel %vm8152_vm2, %v3287_v60, %v3291_v44  ;;  %v3335_v14 = vrot.slane %v3334_v35, 4 }
 0x1c3   : > { %7347 = vmatmul.mubr.bf16.vlgmr.msra.gmra.mrb[16].mxu1 %v9621_v1  ;;  %v3310_v1 = vor.u32 %v3309_v26, %v3306_v7  ;;  %7542 = vmatprep.mubr.bf16.mxu0 %v6618_v30  ;;  %v3344_v30 = vor.u32 %v3343_v55, %v3339_v2  ;;  %v3326_v6 = vsel %vm8152_vm2, %v3321_v29, %v3325_v62 }
 0x1c4   : > { %7350 = vmatprep.mubr.bf16.mxu1 %v6426_v57  ;;  %v6429_v59 = vcombine.low %v3292_v15, %v3302_v31  ;;  %v3340_v10 = vsel %vm8152_vm2, %v3335_v14, %v3339_v2 }
 0x1c5   : > { %v3311_v20 = vrot.slane %v3310_v1, 4  ;;  %v3345_v44 = vrot.slane %v3344_v30, 4 }
 0x1c7   : > { %v3316_v61 = vsel %vm8152_vm2, %v3311_v20, %v3315_v25  ;;  %v3350_v13 = vsel %vm8152_vm2, %v3345_v44, %v3349_v51 }
 0x1c8   : > { %v6430_v54 = vcombine.low %v3316_v61, %v3326_v6 }
 0x1ca   : > { %7543 = vmatmul.mubr.bf16.gmra.mrb[20].mxu0 %v6619_v49  ;;  %v6431_v49 = vcombine.low %v3340_v10, %v3350_v13 }
 0x1cb   : > { %7351 = vmatmul.mubr.bf16.gmra.mrb[20].mxu1 %v6427_v52  ;;  %7546 = vmatprep.mubr.bf16.mxu0 %v6620_v17 }
 0x1cc   : > { %7354 = vmatprep.mubr.bf16.mxu1 %v6428_v42 }
 0x1d2   : > { %7547 = vmatmul.mubr.bf16.gmra.mrb[24].mxu0 %v6621_v50 }
 0x1d3   : > { %7355 = vmatmul.mubr.bf16.gmra.mrb[24].mxu1 %v6429_v59  ;;  %7550 = vmatprep.mubr.bf16.mxu0 %v6622_v5 }
 0x1d4   : > { %7358 = vmatprep.mubr.bf16.mxu1 %v6430_v54 }
 0x1da   : > { %7551 = vmatmul.mubr.bf16.gmra.mrb[28].mxu0 %v6623_v58 }
 0x1db   : > { %7359 = vmatmul.mubr.bf16.gmra.mrb[28].mxu1 %v6431_v49 }
 0x256   : > { %v7284_v12 = vpop.f32.mrb[0].mxu1 }
 0x257   : > { %v2760_v23 = vpop.f32.mrb[1].mxu1 }
 0x258   : > { %v7285_v17 = vpop.f32.mrb[2].mxu1 }
 0x259   : > { %v2763_v57 = vpop.f32.mrb[3].mxu1 }
 0x25e   : > { %v7288_v33 = vpop.f32.mrb[4].mxu1 }
 0x25f   : > { %v2776_v7 = vpop.f32.mrb[5].mxu1 }
 0x260   : > { %v7289_v26 = vpop.f32.mrb[6].mxu1 }
 0x261   : > { %v2779_v25 = vpop.f32.mrb[7].mxu1 }
 0x266   : > { %v7292_v24 = vpop.f32.mrb[8].mxu1 }
 0x267   : > { %v2792_v48 = vpop.f32.mrb[9].mxu1 }
 0x268   : > { %v7293_v50 = vpop.f32.mrb[10].mxu1 }
 0x269   : > { %v2795_v28 = vpop.f32.mrb[11].mxu1 }
 0x26e   : > { %v9882_v39 = vpop.f32.mrb[12].mxu1 }
 0x26f   : > { %v9884_v5 = vpop.f32.mrb[13].mxu1 }
 0x270   : > { %v9886_v9 = vpop.f32.mrb[14].mxu1 }
 0x271   : > { %v9888_v46 = vpop.f32.mrb[15].mxu1 }
 0x275   : > { %v7524_v43 = vpop.f32.mrb[0].mxu0 }
 0x276   : > { %v7570_v58 = vadd.f32 %v7524_v43, %v7284_v12  ;;  %v5651_v36 = vpop.f32.mrb[1].mxu0 }
 0x277   : > { %v7571_v53 = vadd.f32 %v5651_v36, %v2760_v23  ;;  %v7525_v40 = vpop.f32.mrb[2].mxu0 }
 0x278   : > { %v7572_v19 = vadd.f32 %v7525_v40, %v7285_v17  ;;  %v5654_v38 = vpop.f32.mrb[3].mxu0 }
 0x279   : > { %v7573_v18 = vadd.f32 %v5654_v38, %v2763_v57 }
 0x27a   : > { %v5811_v11 = vpack.c.bf16 %v7572_v19, %v7570_v58 }
 0x27b   : > { %v5810_v3 = vpack.c.bf16 %v7573_v18, %v7571_v53 }
 0x27c   : > { %6891 = vst [vmem:[%s9895_s26 + $0x8] sm:$0xff] %v5811_v11   ;;  %v5828_v21 = vunpack.c.l.bf16 %v5811_v11  ;;  %v5829_v47 = vunpack.c.h.bf16 %v5811_v11 }
 0x27d   : > { %v5826_v0 = vunpack.c.l.bf16 %v5810_v3  ;;  %v5827_v63 = vunpack.c.h.bf16 %v5810_v3  ;;  %6800 = vst [vmem:[%s9895_s26] sm:$0xff] %v5810_v3   ;;  %v7528_v32 = vpop.f32.mrb[4].mxu0 }
 0x27e   : > { %v7574_v4 = vadd.f32 %v7528_v32, %v7288_v33  ;;  %v5667_v1 = vpop.f32.mrb[5].mxu0  ;;  %v6042_v45 = vmul.f32 %v5828_v21, %v5828_v21  ;;  %v6043_v20 = vmul.f32 %v5829_v47, %v5829_v47 }
 0x27f   : > { %v6002_v37 = vadd.f32 %v5827_v63, %v5826_v0  ;;  %v6040_v41 = vmul.f32 %v5826_v0, %v5826_v0  ;;  %v6041_v27 = vmul.f32 %v5827_v63, %v5827_v63  ;;  %v7575_v52 = vadd.f32 %v5667_v1, %v2776_v7  ;;  %v7529_v42 = vpop.f32.mrb[6].mxu0 }
 0x280   : > { %v7576_v60 = vadd.f32 %v7529_v42, %v7289_v26  ;;  %v5670_v34 = vpop.f32.mrb[7].mxu0 }
 0x281   : > { %v6003_v16 = vadd.f32 %v6002_v37, %v5828_v21  ;;  %v6072_v22 = vadd.f32 %v6041_v27, %v6040_v41  ;;  %v7577_v2 = vadd.f32 %v5670_v34, %v2779_v25 }
 0x282   : > { %v5813_v55 = vpack.c.bf16 %v7576_v60, %v7574_v4 }
 0x283   : > { %v6073_v29 = vadd.f32 %v6072_v22, %v6042_v45  ;;  %v5812_v62 = vpack.c.bf16 %v7577_v2, %v7575_v52  ;;  %v6004_v15 = vadd.f32 %v6003_v16, %v5829_v47 }
 0x284   : > { %6893 = vst [vmem:[%s9895_s26 + $0x18] sm:$0xff] %v5813_v55   ;;  %v5832_v6 = vunpack.c.l.bf16 %v5813_v55  ;;  %v5833_v51 = vunpack.c.h.bf16 %v5813_v55 }
 0x285   : > { %v5830_v31 = vunpack.c.l.bf16 %v5812_v62  ;;  %v5831_v35 = vunpack.c.h.bf16 %v5812_v62  ;;  %6892 = vst [vmem:[%s9895_s26 + $0x10] sm:$0xff] %v5812_v62   ;;  %v6074_v30 = vadd.f32 %v6073_v29, %v6043_v20  ;;  %v7532_v56 = vpop.f32.mrb[8].mxu0 }
 0x286   : > { %v7578_v8 = vadd.f32 %v7532_v56, %v7292_v24  ;;  %v5683_v61 = vpop.f32.mrb[9].mxu0  ;;  %v6046_v33 = vmul.f32 %v5832_v6, %v5832_v6  ;;  %v6047_v24 = vmul.f32 %v5833_v51, %v5833_v51 }
 0x287   : > { %v6005_v59 = vadd.f32 %v6004_v15, %v5830_v31  ;;  %v6044_v54 = vmul.f32 %v5830_v31, %v5830_v31  ;;  %v7579_v14 = vadd.f32 %v5683_v61, %v2792_v48  ;;  %v7533_v44 = vpop.f32.mrb[10].mxu0  ;;  %v6045_v12 = vmul.f32 %v5831_v35, %v5831_v35 }
 0x288   : > { %v7580_v10 = vadd.f32 %v7533_v44, %v7293_v50  ;;  %v5686_v13 = vpop.f32.mrb[11].mxu0 }
 0x289   : > { %v6006_v49 = vadd.f32 %v6005_v59, %v5831_v35  ;;  %v6075_v23 = vadd.f32 %v6074_v30, %v6044_v54  ;;  %v7581_v17 = vadd.f32 %v5686_v13, %v2795_v28 }
 0x28a   : > { %v5815_v57 = vpack.c.bf16 %v7580_v10, %v7578_v8 }
 0x28b   : > { %v6007_v7 = vadd.f32 %v6006_v49, %v5832_v6  ;;  %v6076_v26 = vadd.f32 %v6075_v23, %v6045_v12  ;;  %v5814_v25 = vpack.c.bf16 %v7581_v17, %v7579_v14 }
 0x28c   : > { %6895 = vst [vmem:[%s9895_s26 + $0x28] sm:$0xff] %v5815_v57   ;;  %v5836_v19 = vunpack.c.l.bf16 %v5815_v57  ;;  %v5837_v3 = vunpack.c.h.bf16 %v5815_v57 }
 0x28d   : > { %v6077_v43 = vadd.f32 %v6076_v26, %v6046_v33  ;;  %v5834_v58 = vunpack.c.l.bf16 %v5814_v25  ;;  %v5835_v36 = vunpack.c.h.bf16 %v5814_v25  ;;  %6894 = vst [vmem:[%s9895_s26 + $0x20] sm:$0xff] %v5814_v25   ;;  %v6008_v48 = vadd.f32 %v6007_v7, %v5833_v51  ;;  %v7536_v53 = vpop.f32.mrb[12].mxu0 }
 0x28e   : > { %v7582_v50 = vadd.f32 %v7536_v53, %v9882_v39  ;;  %v5699_v40 = vpop.f32.mrb[13].mxu0  ;;  %v6050_v37 = vmul.f32 %v5836_v19, %v5836_v19  ;;  %v6051_v60 = vmul.f32 %v5837_v3, %v5837_v3 }
 0x28f   : > { %v6009_v38 = vadd.f32 %v6008_v48, %v5834_v58  ;;  %v6048_v18 = vmul.f32 %v5834_v58, %v5834_v58  ;;  %v6078_v28 = vadd.f32 %v6077_v43, %v6047_v24  ;;  %v7537_v11 = vpop.f32.mrb[14].mxu0  ;;  %v7583_v21 = vadd.f32 %v5699_v40, %v9884_v5 }
 0x290   : > { %v7584_v0 = vadd.f32 %v7537_v11, %v9886_v9  ;;  %v5702_v63 = vpop.f32.mrb[15].mxu0  ;;  %v6049_v47 = vmul.f32 %v5835_v36, %v5835_v36 }
 0x291   : > { %v6010_v32 = vadd.f32 %v6009_v38, %v5835_v36  ;;  %v6079_v4 = vadd.f32 %v6078_v28, %v6048_v18  ;;  %v7585_v1 = vadd.f32 %v5702_v63, %v9888_v46 }
 0x292   : > { %v5817_v39 = vpack.c.bf16 %v7584_v0, %v7582_v50 }
 0x293   : > { %v6011_v41 = vadd.f32 %v6010_v32, %v5836_v19  ;;  %v6080_v27 = vadd.f32 %v6079_v4, %v6049_v47  ;;  %v5816_v52 = vpack.c.bf16 %v7585_v1, %v7583_v21 }
 0x294   : > { %6897 = vst [vmem:[%s9895_s26 + $0x38] sm:$0xff] %v5817_v39   ;;  %v5840_v46 = vunpack.c.l.bf16 %v5817_v39  ;;  %v5841_v30 = vunpack.c.h.bf16 %v5817_v39 }
 0x295   : > { %v6081_v45 = vadd.f32 %v6080_v27, %v6050_v37  ;;  %v5838_v5 = vunpack.c.l.bf16 %v5816_v52  ;;  %v5839_v16 = vunpack.c.h.bf16 %v5816_v52  ;;  %6896 = vst [vmem:[%s9895_s26 + $0x30] sm:$0xff] %v5816_v52   ;;  %v6012_v9 = vadd.f32 %v6011_v41, %v5837_v3  ;;  %v7540_v22 = vpop.f32.mrb[16].mxu0 }
 0x296   : > { %v7348_v42 = vpop.f32.mrb[16].mxu1  ;;  %v5715_v20 = vpop.f32.mrb[17].mxu0  ;;  %v6054_v51 = vmul.f32 %v5840_v46, %v5840_v46  ;;  %v6055_v23 = vmul.f32 %v5841_v30, %v5841_v30 }
 0x297   : > { %v3578_v34 = vpop.f32.mrb[17].mxu1  ;;  %v7586_v55 = vadd.f32 %v7540_v22, %v7348_v42  ;;  %v6013_v62 = vadd.f32 %v6012_v9, %v5838_v5  ;;  %v6052_v15 = vmul.f32 %v5838_v5, %v5838_v5  ;;  %v6082_v31 = vadd.f32 %v6081_v45, %v6051_v60  ;;  %v7541_v35 = vpop.f32.mrb[18].mxu0 }
 0x298   : > { %v7349_v2 = vpop.f32.mrb[18].mxu1  ;;  %v7587_v56 = vadd.f32 %v5715_v20, %v3578_v34  ;;  %v5718_v61 = vpop.f32.mrb[19].mxu0  ;;  %v6053_v59 = vmul.f32 %v5839_v16, %v5839_v16 }
 0x299   : > { %v3581_v29 = vpop.f32.mrb[19].mxu1  ;;  %v7588_v8 = vadd.f32 %v7541_v35, %v7349_v2  ;;  %v6014_v6 = vadd.f32 %v6013_v62, %v5839_v16  ;;  %v6083_v54 = vadd.f32 %v6082_v31, %v6052_v15 }
 0x29a   : > { %v7589_v14 = vadd.f32 %v5718_v61, %v3581_v29 }
 0x29b   : > { %v5819_v44 = vpack.c.bf16 %v7588_v8, %v7586_v55  ;;  %v6015_v10 = vadd.f32 %v6014_v6, %v5840_v46  ;;  %v6084_v13 = vadd.f32 %v6083_v54, %v6053_v59 }
 0x29c   : > { %v5818_v49 = vpack.c.bf16 %v7589_v14, %v7587_v56 }
 0x29d   : > { %6899 = vst [vmem:[%s9895_s26 + $0x48] sm:$0xff] %v5819_v44   ;;  %v6085_v57 = vadd.f32 %v6084_v13, %v6054_v51  ;;  %v6016_v26 = vadd.f32 %v6015_v10, %v5841_v30  ;;  %v7544_v25 = vpop.f32.mrb[20].mxu0  ;;  %v5844_v48 = vunpack.c.l.bf16 %v5819_v44  ;;  %v5845_v38 = vunpack.c.h.bf16 %v5819_v44 }
 0x29e   : > { %v7352_v12 = vpop.f32.mrb[20].mxu1  ;;  %v5842_v33 = vunpack.c.l.bf16 %v5818_v49  ;;  %v5843_v7 = vunpack.c.h.bf16 %v5818_v49  ;;  %6898 = vst [vmem:[%s9895_s26 + $0x40] sm:$0xff] %v5818_v49   ;;  %v5731_v58 = vpop.f32.mrb[21].mxu0 }
 0x29f   : > { %v3594_v17 = vpop.f32.mrb[21].mxu1  ;;  %v7590_v43 = vadd.f32 %v7544_v25, %v7352_v12  ;;  %v6086_v40 = vadd.f32 %v6085_v57, %v6055_v23  ;;  %v7545_v19 = vpop.f32.mrb[22].mxu0  ;;  %v6058_v47 = vmul.f32 %v5844_v48, %v5844_v48  ;;  %v6059_v41 = vmul.f32 %v5845_v38, %v5845_v38 }
 0x2a0   : > { %v7353_v24 = vpop.f32.mrb[22].mxu1  ;;  %v6017_v53 = vadd.f32 %v6016_v26, %v5842_v33  ;;  %v6056_v50 = vmul.f32 %v5842_v33, %v5842_v33  ;;  %v7591_v18 = vadd.f32 %v5731_v58, %v3594_v17  ;;  %v5734_v11 = vpop.f32.mrb[23].mxu0  ;;  %v6057_v21 = vmul.f32 %v5843_v7, %v5843_v7 }
 0x2a1   : > { %v3597_v36 = vpop.f32.mrb[23].mxu1  ;;  %v7592_v28 = vadd.f32 %v7545_v19, %v7353_v24 }
 0x2a2   : > { %v6018_v3 = vadd.f32 %v6017_v53, %v5843_v7  ;;  %v6087_v0 = vadd.f32 %v6086_v40, %v6056_v50  ;;  %v7593_v63 = vadd.f32 %v5734_v11, %v3597_v36 }
 0x2a3   : > { %v5821_v32 = vpack.c.bf16 %v7592_v28, %v7590_v43 }
 0x2a4   : > { %v6019_v4 = vadd.f32 %v6018_v3, %v5844_v48  ;;  %v6088_v1 = vadd.f32 %v6087_v0, %v6057_v21  ;;  %v5820_v39 = vpack.c.bf16 %v7593_v63, %v7591_v18 }
 0x2a5   : > { %6901 = vst [vmem:[%s9895_s26 + $0x58] sm:$0xff] %v5821_v32   ;;  %v7548_v45 = vpop.f32.mrb[24].mxu0  ;;  %v5848_v2 = vunpack.c.l.bf16 %v5821_v32  ;;  %v5849_v62 = vunpack.c.h.bf16 %v5821_v32 }
 0x2a6   : > { %v7356_v37 = vpop.f32.mrb[24].mxu1  ;;  %v6089_v52 = vadd.f32 %v6088_v1, %v6058_v47  ;;  %v5846_v42 = vunpack.c.l.bf16 %v5820_v39  ;;  %v5847_v60 = vunpack.c.h.bf16 %v5820_v39  ;;  %6900 = vst [vmem:[%s9895_s26 + $0x50] sm:$0xff] %v5820_v39   ;;  %v6020_v34 = vadd.f32 %v6019_v4, %v5845_v38  ;;  %v5747_v9 = vpop.f32.mrb[25].mxu0 }
 0x2a7   : > { %v3610_v27 = vpop.f32.mrb[25].mxu1  ;;  %v7594_v16 = vadd.f32 %v7548_v45, %v7356_v37  ;;  %v7549_v46 = vpop.f32.mrb[26].mxu0  ;;  %v6062_v59 = vmul.f32 %v5848_v2, %v5848_v2  ;;  %v6063_v10 = vmul.f32 %v5849_v62, %v5849_v62 }
 0x2a8   : > { %v7357_v5 = vpop.f32.mrb[26].mxu1  ;;  %v6021_v55 = vadd.f32 %v6020_v34, %v5846_v42  ;;  %v6060_v20 = vmul.f32 %v5846_v42, %v5846_v42  ;;  %v6090_v29 = vadd.f32 %v6089_v52, %v6059_v41  ;;  %v7595_v15 = vadd.f32 %v5747_v9, %v3610_v27  ;;  %v5750_v35 = vpop.f32.mrb[27].mxu0 }
 0x2a9   : > { %v3613_v22 = vpop.f32.mrb[27].mxu1  ;;  %v7596_v31 = vadd.f32 %v7549_v46, %v7357_v5  ;;  %v6061_v56 = vmul.f32 %v5847_v60, %v5847_v60 }
 0x2aa   : > { %v6022_v30 = vadd.f32 %v6021_v55, %v5847_v60  ;;  %v6091_v8 = vadd.f32 %v6090_v29, %v6060_v20  ;;  %v7597_v61 = vadd.f32 %v5750_v35, %v3613_v22 }
 0x2ab   : > { %v5823_v6 = vpack.c.bf16 %v7596_v31, %v7594_v16 }
 0x2ac   : > { %v6023_v54 = vadd.f32 %v6022_v30, %v5848_v2  ;;  %v6092_v14 = vadd.f32 %v6091_v8, %v6061_v56  ;;  %v5822_v44 = vpack.c.bf16 %v7597_v61, %v7595_v15 }
 0x2ad   : > { %6903 = vst [vmem:[%s9895_s26 + $0x68] sm:$0xff] %v5823_v6   ;;  %v7552_v57 = vpop.f32.mrb[28].mxu0  ;;  %v5852_v24 = vunpack.c.l.bf16 %v5823_v6  ;;  %v5853_v53 = vunpack.c.h.bf16 %v5823_v6 }
 0x2ae   : > { %v7360_v51 = vpop.f32.mrb[28].mxu1  ;;  %v6093_v49 = vadd.f32 %v6092_v14, %v6062_v59  ;;  %v5850_v12 = vunpack.c.l.bf16 %v5822_v44  ;;  %v5851_v23 = vunpack.c.h.bf16 %v5822_v44  ;;  %6902 = vst [vmem:[%s9895_s26 + $0x60] sm:$0xff] %v5822_v44   ;;  %v6024_v17 = vadd.f32 %v6023_v54, %v5849_v62  ;;  %v5763_v26 = vpop.f32.mrb[29].mxu0 }
 0x2af   : > { %v3626_v13 = vpop.f32.mrb[29].mxu1  ;;  %v7598_v7 = vadd.f32 %v7552_v57, %v7360_v51  ;;  %v7553_v48 = vpop.f32.mrb[30].mxu0  ;;  %v6066_v21 = vmul.f32 %v5852_v24, %v5852_v24  ;;  %v6067_v47 = vmul.f32 %v5853_v53, %v5853_v53 }
 0x2b0   : > { %v7361_v33 = vpop.f32.mrb[30].mxu1  ;;  %v6025_v43 = vadd.f32 %v6024_v17, %v5850_v12  ;;  %v6064_v58 = vmul.f32 %v5850_v12, %v5850_v12  ;;  %v6094_v36 = vadd.f32 %v6093_v49, %v6063_v10  ;;  %v7599_v50 = vadd.f32 %v5763_v26, %v3626_v13  ;;  %v5766_v19 = vpop.f32.mrb[31].mxu0 }
 0x2b1   : > { %v3629_v25 = vpop.f32.mrb[31].mxu1  ;;  %v7600_v40 = vadd.f32 %v7553_v48, %v7361_v33  ;;  %v6065_v18 = vmul.f32 %v5851_v23, %v5851_v23 }
 0x2b2   : > { %v6026_v38 = vadd.f32 %v6025_v43, %v5851_v23  ;;  %v6095_v28 = vadd.f32 %v6094_v36, %v6064_v58  ;;  %v7601_v11 = vadd.f32 %v5766_v19, %v3629_v25 }
 0x2b3   : > { %v5825_v3 = vpack.c.bf16 %v7600_v40, %v7598_v7 }
 0x2b4   : > { %v6027_v0 = vadd.f32 %v6026_v38, %v5852_v24  ;;  %v6096_v63 = vadd.f32 %v6095_v28, %v6065_v18  ;;  %v5824_v32 = vpack.c.bf16 %v7601_v11, %v7599_v50 }
 0x2b5   : > { %6905 = vst [vmem:[%s9895_s26 + $0x78] sm:$0xff] %v5825_v3   ;;  %v5856_v41 = vunpack.c.l.bf16 %v5825_v3  ;;  %v5857_v60 = vunpack.c.h.bf16 %v5825_v3 }
 0x2b6   : > { %v6097_v4 = vadd.f32 %v6096_v63, %v6066_v21  ;;  %v5854_v1 = vunpack.c.l.bf16 %v5824_v32  ;;  %v5855_v39 = vunpack.c.h.bf16 %v5824_v32  ;;  %6904 = vst [vmem:[%s9895_s26 + $0x70] sm:$0xff] %v5824_v32   ;;  %v6028_v37 = vadd.f32 %v6027_v0, %v5853_v53 }
 0x2b7   : > { %v6070_v16 = vmul.f32 %v5856_v41, %v5856_v41  ;;  %v6071_v2 = vmul.f32 %v5857_v60, %v5857_v60 }
 0x2b8   : > { %v6029_v27 = vadd.f32 %v6028_v37, %v5854_v1  ;;  %v6068_v52 = vmul.f32 %v5854_v1, %v5854_v1  ;;  %v6098_v42 = vadd.f32 %v6097_v4, %v6067_v47  ;;  %v6069_v45 = vmul.f32 %v5855_v39, %v5855_v39 }
 0x2ba   : > { %v6030_v34 = vadd.f32 %v6029_v27, %v5855_v39  ;;  %v6099_v5 = vadd.f32 %v6098_v42, %v6068_v52 }
 0x2bc   : > { %v6031_v9 = vadd.f32 %v6030_v34, %v5856_v41  ;;  %v6100_v22 = vadd.f32 %v6099_v5, %v6069_v45 }
 0x2be   : > { %v6032_v55 = vadd.f32 %v6031_v9, %v5857_v60  ;;  %v6101_v20 = vadd.f32 %v6100_v22, %v6070_v16 }
 0x2c0   : > { %v6033_v29 = vrot.slane %v6032_v55, 4  ;;  %v6102_v46 = vadd.f32 %v6101_v20, %v6071_v2 }
 0x2c2   : > { %v6034_v62 = vadd.f32 %v6033_v29, %v6032_v55  ;;  %v6103_v15 = vrot.slane %v6102_v46, 4 }
 0x2c4   : > { %v6035_v31 = vrot.slane %v6034_v62, 2  ;;  %v6104_v35 = vadd.f32 %v6103_v15, %v6102_v46 }
 0x2c6   : > { %v6036_v30 = vadd.f32 %v6035_v31, %v6034_v62  ;;  %v6105_v56 = vrot.slane %v6104_v35, 2 }
 0x2c8   : > { %v6037_v8 = vrot.slane %v6036_v30, 1  ;;  %v6106_v61 = vadd.f32 %v6105_v56, %v6104_v35 }
 0x2ca   : > { %v6038_v6 = vadd.f32 %v6037_v8, %v6036_v30  ;;  %v6107_v59 = vrot.slane %v6106_v61, 1 }
 0x2cc   : > { %6039 = vst [vmem:[%s235_s29] sm:$0x1] %v6038_v6  ;;  %v6108_v54 = vadd.f32 %v6107_v59, %v6106_v61 }
 0x2ce   : > { %6109 = vst [vmem:[%s235_s29 + $0x1] sm:$0x1] %v6108_v54 }
 0x2cf PF: > { %s16_s18 = sadd.s32 1, %s8042_s18  }
 0x2d0   : > { %p13_p4 = scmp.ge.s32.totalorder %s16_s18, 4  }
 0x2d2   :  { %15 = sbr.rel (!%p13_p4) target bundleno = 1 (0x1), region = 88 }

</bundles_post_ra>
